<compile_context>
chip_gen: v6e
topology: v6e:2x2x1
jax: 0.10.0
libtpu: 0.0.40
codegen_flags: <defaults>
</compile_context>

<pallas_src>
import functools

import numpy as np
import jax
import jax.numpy as jnp
from jax import lax
from jax.experimental import pallas as pl
from jax.experimental.pallas import tpu as pltpu

DX = 0.01
DT = 0.5
MU_UP = 0.021


def _pick_lane_chunk(hw, hidden):
    """Largest lane chunk (multiple of 128, divides HW) keeping z <= ~36 vregs."""
    target = max(128, ((4096 // max(hidden, 1)) // 128) * 128)
    c = min(hw, target)
    c = (c // 128) * 128
    while c >= 128 and hw % c != 0:
        c -= 128
    if c < 128:
        c = hw          # tiny HW: no chunking
    return c


# ----------------------------------------------------------------------------
# Fused rollout kernel: one grid iteration = T_blk RCNNCell updates for one n.
# ----------------------------------------------------------------------------
def rcnn_rollout_kernel(mask_ref, init_ref, w123_ref, b123_ref, w4_ref, b4_ref,
                        coef_ref, out_ref, state_ref, nn_ref, *,
                        H, W, hidden, t_blk, lane_chunk):
    # mask_ref  : VMEM (8, HW)  f32   boundary-blend masks [col<W-1, col<W-1, col>=1,
    #                                  col>=1, col<W-2, col<W-2, col>=2, col>=2]
    # init_ref  : VMEM (3, HW)        initial state for this batch element (flat)
    # w123_ref  : VMEM (9*hidden, 3)  packed Wh1/Wh2/Wh3 x {u,v,h} 1x1-conv weights
    # b123_ref  : VMEM (9*hidden, 1)  their biases
    # w4_ref    : VMEM (3, 3*hidden)  block-diagonal packed Wh4_{u,v,h}
    # b4_ref    : VMEM (3, 1)         Wh4 biases
    # coef_ref  : VMEM (2, 1)         [mu_up*sigmoid(CA), mu_up*sigmoid(CB)]
    # out_ref   : VMEM (t_blk, 3, HW) this chunk's next states (lane-dense)
    # state_ref : VMEM scratch (3, HW) rollout state, resident across time chunks
    # nn_ref    : VMEM scratch (3, HW) pi-block output accumulator
    HW = H * W
    g = 3 * hidden
    n_chunks = HW // lane_chunk

    # Rollout state persists in VMEM scratch across the time-chunk grid axis.
    # CORRECTNESS: grid must stay (N, time_chunks) with the time axis innermost and
    # marked "arbitrary"; reordering the grid or marking time "parallel" would corrupt
    # the rollout silently.
    @pl.when(pl.program_id(1) == 0)
    def _():
        state_ref[...] = init_ref[...]

    # Loop-invariant operands, hoisted out of the time loop.
    w123 = w123_ref[...]
    b123 = b123_ref[...]
    w4 = w4_ref[...]
    b4 = b4_ref[...]
    coef = coef_ref[...]
    m_lt = (mask_ref[0:2, :] != 0.0, mask_ref[4:6, :] != 0.0)   # col < W-d, d = 1, 2
    m_ge = (mask_ref[2:4, :] != 0.0, mask_ref[6:8, :] != 0.0)   # col >= d,  d = 1, 2

    def rot(x, s):
        return pltpu.roll(x, s % HW, axis=1)

    def lap4(uv):
        # 4th-order periodic Laplacian on the flat lane-dense (2, HW) layout: row shifts
        # are exact flat rolls by +-d*W; column shifts are two flat rolls blended at the
        # row boundary with the precomputed masks (XLU work, nearly free).
        def col_pair(d):
            plus = jnp.where(m_lt[d - 1], rot(uv, -d), rot(uv, W - d))
            minus = jnp.where(m_ge[d - 1], rot(uv, d), rot(uv, d - W))
            return plus + minus

        def row_pair(d):
            return rot(uv, d * W) + rot(uv, -d * W)

        return (1.0 / (DX * DX)) * (
            -5.0 * uv
            + (4.0 / 3.0) * (col_pair(1) + row_pair(1))
            + (-1.0 / 12.0) * (col_pair(2) + row_pair(2)))

    def step_body(s, carry):
        h = state_ref[...]                       # (3, HW)  rows = (u, v, p)
        uv = h[0:2, :]
        lap_uv = lap4(uv)

        # pi-block per lane chunk: nine 1x1 convs as one (9h,3)x(3,C) matmul, triple
        # product, then the three Wh4 heads as one block-diagonal (3,3h)x(3h,C) matmul.
        # Chunking bounds z to <= ~36 vregs -> no VMEM round-trip of the intermediate.
        def chunk_body(ci, c2):
            c0 = pl.multiple_of(ci * lane_chunk, lane_chunk)
            hc = state_ref[:, pl.ds(c0, lane_chunk)]
            z = jnp.dot(w123, hc, preferred_element_type=jnp.float32,
                        precision=lax.Precision.HIGHEST) + b123
            prod = z[0:g, :] * z[g:2 * g, :] * z[2 * g:3 * g, :]
            nn_ref[:, pl.ds(c0, lane_chunk)] = jnp.dot(
                w4, prod, preferred_element_type=jnp.float32,
                precision=lax.Precision.HIGHEST) + b4
            return c2

        lax.fori_loop(0, n_chunks, chunk_body, 0)

        nn = nn_ref[...]
        nxt_uv = uv + (coef * lap_uv + nn[0:2, :]) * DT
        nxt_p = h[1:2, :] + nn[2:3, :] * DT       # p_prev == v_prev (PyTorch h[:,1:2])
        nxt = jnp.concatenate([nxt_uv, nxt_p], axis=0)   # coalesced (3, HW) stores
        state_ref[...] = nxt
        out_ref[s] = nxt
        return carry

    lax.fori_loop(0, t_blk, step_body, 0)


def rcnn_rollout(init_state, cell, step, t_blk=None):
    """Run `step` RCNNCell updates in one fused Pallas call.

    init_state: (N, 3, H, W) float32.  Returns (step, N, 3, H, W)."""
    N, C, H, W = init_state.shape
    assert C == 3
    HW = H * W
    assert HW % 128 == 0, "lane-dense layout requires H*W to be a multiple of 128"
    hidden = cell['W123'].shape[0] // 9

    if t_blk is None:
        # Amortize the per-grid-iteration overhead; 2 x T_blk x 12 KiB double-buffered
        # output block stays < 1 MiB -> safe even on v7x's 64 MiB VMEM.
        t_blk = min(step, 32)
    t_blk = max(1, min(t_blk, step))
    n_time_chunks = -(-step // t_blk)
    total_steps = n_time_chunks * t_blk          # padded tail is computed then discarded

    lane_chunk = _pick_lane_chunk(HW, hidden)

    init_flat = init_state.reshape(N, 3, HW)     # lane-dense state
    col = jnp.arange(HW, dtype=jnp.int32) % W
    masks = jnp.stack([col < W - 1, col < W - 1,
                       col >= 1, col >= 1,
                       col < W - 2, col < W - 2,
                       col >= 2, col >= 2], axis=0).astype(jnp.float32)   # (8, HW)
    coef = jnp.concatenate(
        [(MU_UP * jax.nn.sigmoid(cell['CA'])).reshape(1, 1),
         (MU_UP * jax.nn.sigmoid(cell['CB'])).reshape(1, 1)], axis=0).astype(jnp.float32)

    kernel = functools.partial(rcnn_rollout_kernel, H=H, W=W, hidden=hidden,
                               t_blk=t_blk, lane_chunk=lane_chunk)
    out = pl.pallas_call(
        kernel,
        out_shape=jax.ShapeDtypeStruct((total_steps, N, 3, HW), jnp.float32),
        grid=(N, n_time_chunks),
        in_specs=[
            pl.BlockSpec((8, HW), lambda n, c: (0, 0)),             # boundary masks
            pl.BlockSpec((None, 3, HW), lambda n, c: (n, 0, 0)),    # init state (per n)
            pl.BlockSpec((9 * hidden, 3), lambda n, c: (0, 0)),     # packed Wh1/2/3
            pl.BlockSpec((9 * hidden, 1), lambda n, c: (0, 0)),     # packed biases
            pl.BlockSpec((3, 3 * hidden), lambda n, c: (0, 0)),     # block-diag Wh4
            pl.BlockSpec((3, 1), lambda n, c: (0, 0)),              # Wh4 biases
            pl.BlockSpec((2, 1), lambda n, c: (0, 0)),              # diffusion coefs
        ],
        out_specs=pl.BlockSpec((t_blk, None, 3, HW), lambda n, c: (c, n, 0, 0)),
        scratch_shapes=[pltpu.VMEM((3, HW), jnp.float32),           # rollout state
                        pltpu.VMEM((3, HW), jnp.float32)],          # pi-block output
        compiler_params=pltpu.CompilerParams(
            # Batch axis feeds both v7x TensorCores; the time-chunk axis must stay
            # serial ("arbitrary") for the VMEM-resident state to be correct.
            dimension_semantics=("parallel", "arbitrary")),
    )(masks, init_flat, cell['W123'], cell['b123'], cell['W4blk'], cell['b4'], coef)
    out = out[:step]
    return out.reshape(step, N, 3, H, W)


# ----------------------------------------------------------------------------
# Upscaler (plain JAX glue — transposed convs, runs once per forward).
# ----------------------------------------------------------------------------
def conv_transpose_pt(x, w, b, stride, padding, output_padding):
    # x: (N, Cin, H, W); w: (Cin, Cout, kH, kW)  (PyTorch ConvTranspose2d layout)
    k = w.shape[2]
    w_t = jnp.transpose(jnp.flip(w, axis=(2, 3)), (1, 0, 2, 3))    # (Cout, Cin, kH, kW)
    pad_lo = k - 1 - padding
    pad_hi = k - 1 - padding + output_padding
    y = lax.conv_general_dilated(
        x, w_t, window_strides=(1, 1),
        padding=[(pad_lo, pad_hi), (pad_lo, pad_hi)],
        lhs_dilation=(stride, stride),
        dimension_numbers=('NCHW', 'OIHW', 'NCHW'))
    return y + b[None, :, None, None]


def upscaler_forward(x, up):
    y = conv_transpose_pt(x, up['ct1_w'], up['ct1_b'], stride=2, padding=2, output_padding=1)
    y = jax.nn.sigmoid(y)
    y = conv_transpose_pt(y, up['ct2_w'], up['ct2_b'], stride=2, padding=2, output_padding=1)
    y = jnp.einsum('oi,nihw->nohw', up['c3_w'][:, :, 0, 0], y) + up['c3_b'][None, :, None, None]
    return y


# ----------------------------------------------------------------------------
# RCNN forward (upscaler + fused recurrent rollout).
# ----------------------------------------------------------------------------
@functools.partial(jax.jit, static_argnames=('step', 't_blk'))
def rcnn_forward(init_state_low, params, step, t_blk=None):
    init_state = upscaler_forward(init_state_low, params['up'])
    states = rcnn_rollout(init_state, params['cell'], step, t_blk=t_blk)  # (step,N,3,H,W)
    outputs = [init_state] + [states[s] for s in range(step)]
    # PyTorch keeps internal_state at s == step-2 (placeholder for step < 2).
    second_last_state = states[step - 2] if step >= 2 else init_state
    return outputs, second_last_state


# ----------------------------------------------------------------------------
# Pure-JAX reference (for correctness check).
# ----------------------------------------------------------------------------
def _cell_step_ref(h, cell):
    N, C, H, W = h.shape
    coef_u = MU_UP * jax.nn.sigmoid(cell['CA'])
    coef_v = MU_UP * jax.nn.sigmoid(cell['CB'])

    def lap(x):   # periodic 4th-order laplacian on (N, H, W)
        r = -5.0 * x
        r = r + (4.0 / 3.0) * (jnp.roll(x, 1, -1) + jnp.roll(x, -1, -1)
                               + jnp.roll(x, 1, -2) + jnp.roll(x, -1, -2))
        r = r + (-1.0 / 12.0) * (jnp.roll(x, 2, -1) + jnp.roll(x, -2, -1)
                                 + jnp.roll(x, 2, -2) + jnp.roll(x, -2, -2))
        return r / (DX * DX)

    hf = h.reshape(N, 3, H * W)
    hp = jax.lax.Precision.HIGHEST
    z = jnp.einsum('kc,ncs->nks', cell['W123'], hf, precision=hp) + cell['b123'][None]
    g = z.shape[1] // 3
    prod = z[:, 0:g] * z[:, g:2 * g] * z[:, 2 * g:3 * g]
    nn = (jnp.einsum('ok,nks->nos', cell['W4blk'], prod, precision=hp)
          + cell['b4'][None]).reshape(N, 3, H, W)
    u_n = h[:, 0] + (coef_u * lap(h[:, 0]) + nn[:, 0]) * DT
    v_n = h[:, 1] + (coef_v * lap(h[:, 1]) + nn[:, 1]) * DT
    p_n = h[:, 1] + nn[:, 2] * DT
    return jnp.stack([u_n, v_n, p_n], axis=1)


def rcnn_forward_ref(init_state_low, params, step):
    init_state = upscaler_forward(init_state_low, params['up'])
    outputs = [init_state]
    h = init_state
    second_last = init_state
    for s in range(step):
        h = _cell_step_ref(h, params['cell'])
        if s == step - 2:
            second_last = h
        outputs.append(h)
    return outputs, second_last


# ----------------------------------------------------------------------------
# Deterministic parameter initialization (host-packed weight layouts).
# ----------------------------------------------------------------------------
def xavier_uniform(key, out_c, in_c, c=0.02):
    bound = float(np.sqrt(6.0 / (in_c + out_c)))
    return c * jax.random.uniform(key, (out_c, in_c), jnp.float32, -bound, bound)


def init_params(key, hidden):
    keys = jax.random.split(key, 16)
    # Wh{1,2,3}_{u,v,h}: conv-major (1,2,3), path-minor (u,v,h)  -> (9*hidden, 3)
    w_list, idx = [], 0
    for _conv in range(3):
        for _path in range(3):
            w_list.append(xavier_uniform(keys[idx], hidden, 3))
            idx += 1
    W123 = jnp.concatenate(w_list, axis=0)
    b123 = jnp.zeros((9 * hidden, 1), jnp.float32)

    w4_u = xavier_uniform(keys[9], 1, hidden)
    w4_v = xavier_uniform(keys[10], 1, hidden)
    w4_h = xavier_uniform(keys[11], 1, hidden)
    W4blk = jnp.zeros((3, 3 * hidden), jnp.float32)
    W4blk = W4blk.at[0, 0:hidden].set(w4_u[0])
    W4blk = W4blk.at[1, hidden:2 * hidden].set(w4_v[0])
    W4blk = W4blk.at[2, 2 * hidden:3 * hidden].set(w4_h[0])
    b4 = jnp.zeros((3, 1), jnp.float32)

    np.random.seed(1234)  # same scheme as the PyTorch module for CA / CB
    CA = jnp.float32((np.random.rand() - 0.5) * 2)
    CB = jnp.float32((np.random.rand() - 0.5) * 2)

    def u_init(k, shape, fan_in):
        s = float(1.0 / np.sqrt(fan_in))
        return jax.random.uniform(k, shape, jnp.float32, -s, s)

    up = {
        'ct1_w': u_init(keys[12], (3, 8, 6, 6), 3 * 6 * 6),
        'ct1_b': jnp.zeros((8,), jnp.float32),
        'ct2_w': u_init(keys[13], (8, 8, 7, 7), 8 * 7 * 7),
        'ct2_b': jnp.zeros((8,), jnp.float32),
        'c3_w': u_init(keys[14], (3, 8, 1, 1), 8),
        'c3_b': jnp.zeros((3,), jnp.float32),
    }
    cell = dict(W123=W123, b123=b123, W4blk=W4blk, b4=b4, CA=CA, CB=CB)
    return dict(up=up, cell=cell)


if __name__ == "__main__":
    N = 2
    hidden = 16
    low_hw = 7          # upscaler: 7 -> 15 -> 32  => cell spatial size 32x32 (HW = 1024)
    step = 4
    t_blk = 3           # exercises multi-chunk time axis + padded final chunk

    key = jax.random.PRNGKey(0)
    params = init_params(key, hidden)
    init_state_low = 0.1 * jax.random.normal(
        jax.random.PRNGKey(0), (N, 3, low_hw, low_hw), jnp.float32)

    outputs, second_last_state = rcnn_forward(init_state_low, params, step=step, t_blk=t_blk)
    outputs = [jax.block_until_ready(o) for o in outputs]
    jax.block_until_ready(second_last_state)

    assert outputs[0].shape == (N, 3, 32, 32)
    assert outputs[-1].shape == (N, 3, 32, 32)
    assert len(outputs) == step + 1

    # Correctness check against a pure-JAX reference.  Both paths use f32 HIGHEST-
    # precision matmuls; the explicit Euler scheme on random fields is violently
    # unstable (values grow each step), so compare with a global-scale relative bound.
    ref_outputs, ref_second = rcnn_forward_ref(init_state_low, params, step=step)
    for o, r in zip(outputs, ref_outputs):
        r = np.asarray(r)
        scale = max(1.0, float(np.max(np.abs(r))))
        err = float(np.max(np.abs(np.asarray(o) - r)))
        assert err <= 5e-2 * scale, (err, scale)
    r = np.asarray(ref_second)
    scale = max(1.0, float(np.max(np.abs(r))))
    err = float(np.max(np.abs(np.asarray(second_last_state) - r)))
    assert err <= 5e-2 * scale, (err, scale)

    print("KERNEL_OK")
</pallas_src>

<mosaic_0001>
module attributes {stable_mosaic.version = 11 : i64} {
  func.func @rcnn_rollout_kernel(%arg0: i32, %arg1: i32, %arg2: memref<8x1024xf32, #tpu.memory_space<vmem>>, %arg3: memref<1x3x1024xf32, #tpu.memory_space<vmem>>, %arg4: memref<144x3xf32, #tpu.memory_space<vmem>>, %arg5: memref<144x1xf32, #tpu.memory_space<vmem>>, %arg6: memref<3x48xf32, #tpu.memory_space<vmem>>, %arg7: memref<3x1xf32, #tpu.memory_space<vmem>>, %arg8: memref<2x1xf32, #tpu.memory_space<vmem>>, %arg9: memref<3x1x3x1024xf32, #tpu.memory_space<vmem>>, %arg10: memref<3x1024xf32, #tpu.memory_space<vmem>>, %arg11: memref<3x1024xf32, #tpu.memory_space<vmem>>) attributes {dimension_semantics = [#tpu.dimension_semantics<parallel>, #tpu.dimension_semantics<arbitrary>], iteration_bounds = array<i64: 2, 2>, scalar_prefetch = 0 : i64, scratch_operands = 2 : i64, tpu.core_type = #tpu.core_type<tc>, window_params = [{pipeline_mode = #tpu.pipeline_mode<synchronous>, transform_indices = @transform_0, window_bounds = array<i64: 8, 1024>}, {transform_indices = @transform_1, window_bounds = array<i64: 1, 3, 1024>}, {pipeline_mode = #tpu.pipeline_mode<synchronous>, transform_indices = @transform_2, window_bounds = array<i64: 144, 3>}, {pipeline_mode = #tpu.pipeline_mode<synchronous>, transform_indices = @transform_3, window_bounds = array<i64: 144, 1>}, {pipeline_mode = #tpu.pipeline_mode<synchronous>, transform_indices = @transform_4, window_bounds = array<i64: 3, 48>}, {pipeline_mode = #tpu.pipeline_mode<synchronous>, transform_indices = @transform_5, window_bounds = array<i64: 3, 1>}, {pipeline_mode = #tpu.pipeline_mode<synchronous>, transform_indices = @transform_6, window_bounds = array<i64: 2, 1>}, {transform_indices = @transform_7, window_bounds = array<i64: 3, 1, 3, 1024>}]} {
    %c0_i32 = arith.constant 0 : i32
    %0 = arith.cmpi eq, %arg1, %c0_i32 : i32
    %1 = arith.extui %0 : i1 to i32
    %c0_i32_0 = arith.constant 0 : i32
    %2 = arith.cmpi ne, %1, %c0_i32_0 : i32
    scf.if %2 {
      %c0_20 = arith.constant 0 : index
      %c0_21 = arith.constant 0 : index
      %c0_22 = arith.constant 0 : index
      %21 = vector.load %arg3[%c0_20, %c0_21, %c0_22] : memref<1x3x1024xf32, #tpu.memory_space<vmem>>, vector<1x3x1024xf32>
      %22 = vector.shape_cast %21 : vector<1x3x1024xf32> to vector<3x1024xf32>
      %c0_23 = arith.constant 0 : index
      %c0_24 = arith.constant 0 : index
      %23 = vector.load %arg10[%c0_23, %c0_24] : memref<3x1024xf32, #tpu.memory_space<vmem>>, vector<3x1024xf32>
      tpu.vector_store %arg10[%c0_23, %c0_24], %22 {strides = array<i32>} : memref<3x1024xf32, #tpu.memory_space<vmem>>, vector<3x1024xf32>,
    } else {
    }
    %c0 = arith.constant 0 : index
    %c0_1 = arith.constant 0 : index
    %3 = vector.load %arg4[%c0, %c0_1] : memref<144x3xf32, #tpu.memory_space<vmem>>, vector<144x3xf32>
    %c0_2 = arith.constant 0 : index
    %c0_3 = arith.constant 0 : index
    %4 = vector.load %arg5[%c0_2, %c0_3] : memref<144x1xf32, #tpu.memory_space<vmem>>, vector<144x1xf32>
    %c0_4 = arith.constant 0 : index
    %c0_5 = arith.constant 0 : index
    %5 = vector.load %arg6[%c0_4, %c0_5] : memref<3x48xf32, #tpu.memory_space<vmem>>, vector<3x48xf32>
    %c0_6 = arith.constant 0 : index
    %c0_7 = arith.constant 0 : index
    %6 = vector.load %arg7[%c0_6, %c0_7] : memref<3x1xf32, #tpu.memory_space<vmem>>, vector<3x1xf32>
    %c0_8 = arith.constant 0 : index
    %c0_9 = arith.constant 0 : index
    %7 = vector.load %arg8[%c0_8, %c0_9] : memref<2x1xf32, #tpu.memory_space<vmem>>, vector<2x1xf32>
    %c0_10 = arith.constant 0 : index
    %c0_11 = arith.constant 0 : index
    %8 = vector.load %arg2[%c0_10, %c0_11] : memref<8x1024xf32, #tpu.memory_space<vmem>>, vector<2x1024xf32>
    %cst = arith.constant 0.000000e+00 : f32
    %9 = vector.broadcast %cst : f32 to vector<2x1024xf32>
    %10 = arith.cmpf one, %8, %9 : vector<2x1024xf32>
    %c4 = arith.constant 4 : index
    %c0_12 = arith.constant 0 : index
    %11 = vector.load %arg2[%c4, %c0_12] : memref<8x1024xf32, #tpu.memory_space<vmem>>, vector<2x1024xf32>
    %cst_13 = arith.constant 0.000000e+00 : f32
    %12 = vector.broadcast %cst_13 : f32 to vector<2x1024xf32>
    %13 = arith.cmpf one, %11, %12 : vector<2x1024xf32>
    %c2 = arith.constant 2 : index
    %c0_14 = arith.constant 0 : index
    %14 = vector.load %arg2[%c2, %c0_14] : memref<8x1024xf32, #tpu.memory_space<vmem>>, vector<2x1024xf32>
    %cst_15 = arith.constant 0.000000e+00 : f32
    %15 = vector.broadcast %cst_15 : f32 to vector<2x1024xf32>
    %16 = arith.cmpf one, %14, %15 : vector<2x1024xf32>
    %c6 = arith.constant 6 : index
    %c0_16 = arith.constant 0 : index
    %17 = vector.load %arg2[%c6, %c0_16] : memref<8x1024xf32, #tpu.memory_space<vmem>>, vector<2x1024xf32>
    %cst_17 = arith.constant 0.000000e+00 : f32
    %18 = vector.broadcast %cst_17 : f32 to vector<2x1024xf32>
    %19 = arith.cmpf one, %17, %18 : vector<2x1024xf32>
    %c0_i32_18 = arith.constant 0 : i32
    %c3_i32 = arith.constant 3 : i32
    %20 = arith.addi %c0_i32_18, %c3_i32 : i32
    %c1_i32 = arith.constant 1 : i32
    scf.for %arg12 = %c0_i32_18 to %20 step %c1_i32  : i32 {
      %c0_20 = arith.constant 0 : index
      %c0_21 = arith.constant 0 : index
      %21 = vector.load %arg10[%c0_20, %c0_21] : memref<3x1024xf32, #tpu.memory_space<vmem>>, vector<3x1024xf32>
      %22 = vector.extract_strided_slice %21 {offsets = [0, 0], sizes = [2, 1024], strides = [1, 1]} : vector<3x1024xf32> to vector<2x1024xf32>
      %cst_22 = arith.constant -5.000000e+00 : f32
      %23 = vector.broadcast %cst_22 : f32 to vector<2x1024xf32>
      %24 = arith.mulf %23, %22 : vector<2x1024xf32>
      %c1023_i32 = arith.constant 1023 : i32
      %25 = tpu.dynamic_rotate %22 by %c1023_i32 dim 1 : vector<2x1024xf32>, i32 -> vector<2x1024xf32>
      %c31_i32 = arith.constant 31 : i32
      %26 = tpu.dynamic_rotate %22 by %c31_i32 dim 1 : vector<2x1024xf32>, i32 -> vector<2x1024xf32>
      %27 = arith.select %10, %25, %26 : vector<2x1024xi1>, vector<2x1024xf32>
      %c1_i32_23 = arith.constant 1 : i32
      %28 = tpu.dynamic_rotate %22 by %c1_i32_23 dim 1 : vector<2x1024xf32>, i32 -> vector<2x1024xf32>
      %c993_i32 = arith.constant 993 : i32
      %29 = tpu.dynamic_rotate %22 by %c993_i32 dim 1 : vector<2x1024xf32>, i32 -> vector<2x1024xf32>
      %30 = arith.select %16, %28, %29 : vector<2x1024xi1>, vector<2x1024xf32>
      %31 = arith.addf %27, %30 : vector<2x1024xf32>
      %c32_i32 = arith.constant 32 : i32
      %32 = tpu.dynamic_rotate %22 by %c32_i32 dim 1 : vector<2x1024xf32>, i32 -> vector<2x1024xf32>
      %c992_i32 = arith.constant 992 : i32
      %33 = tpu.dynamic_rotate %22 by %c992_i32 dim 1 : vector<2x1024xf32>, i32 -> vector<2x1024xf32>
      %34 = arith.addf %32, %33 : vector<2x1024xf32>
      %35 = arith.addf %31, %34 : vector<2x1024xf32>
      %cst_24 = arith.constant 1.33333337 : f32
      %36 = vector.broadcast %cst_24 : f32 to vector<2x1024xf32>
      %37 = arith.mulf %36, %35 : vector<2x1024xf32>
      %38 = arith.addf %24, %37 : vector<2x1024xf32>
      %c1022_i32 = arith.constant 1022 : i32
      %39 = tpu.dynamic_rotate %22 by %c1022_i32 dim 1 : vector<2x1024xf32>, i32 -> vector<2x1024xf32>
      %c30_i32 = arith.constant 30 : i32
      %40 = tpu.dynamic_rotate %22 by %c30_i32 dim 1 : vector<2x1024xf32>, i32 -> vector<2x1024xf32>
      %41 = arith.select %13, %39, %40 : vector<2x1024xi1>, vector<2x1024xf32>
      %c2_i32 = arith.constant 2 : i32
      %42 = tpu.dynamic_rotate %22 by %c2_i32 dim 1 : vector<2x1024xf32>, i32 -> vector<2x1024xf32>
      %c994_i32 = arith.constant 994 : i32
      %43 = tpu.dynamic_rotate %22 by %c994_i32 dim 1 : vector<2x1024xf32>, i32 -> vector<2x1024xf32>
      %44 = arith.select %19, %42, %43 : vector<2x1024xi1>, vector<2x1024xf32>
      %45 = arith.addf %41, %44 : vector<2x1024xf32>
      %c64_i32 = arith.constant 64 : i32
      %46 = tpu.dynamic_rotate %22 by %c64_i32 dim 1 : vector<2x1024xf32>, i32 -> vector<2x1024xf32>
      %c960_i32 = arith.constant 960 : i32
      %47 = tpu.dynamic_rotate %22 by %c960_i32 dim 1 : vector<2x1024xf32>, i32 -> vector<2x1024xf32>
      %48 = arith.addf %46, %47 : vector<2x1024xf32>
      %49 = arith.addf %45, %48 : vector<2x1024xf32>
      %cst_25 = arith.constant -0.0833333358 : f32
      %50 = vector.broadcast %cst_25 : f32 to vector<2x1024xf32>
      %51 = arith.mulf %50, %49 : vector<2x1024xf32>
      %52 = arith.addf %38, %51 : vector<2x1024xf32>
      %cst_26 = arith.constant 1.000000e+04 : f32
      %53 = vector.broadcast %cst_26 : f32 to vector<2x1024xf32>
      %54 = arith.mulf %53, %52 : vector<2x1024xf32>
      %c0_i32_27 = arith.constant 0 : i32
      %c4_i32 = arith.constant 4 : i32
      %55 = arith.addi %c0_i32_27, %c4_i32 : i32
      %c1_i32_28 = arith.constant 1 : i32
      scf.for %arg13 = %c0_i32_27 to %55 step %c1_i32_28  : i32 {
        %c256_i32 = arith.constant 256 : i32
        %75 = arith.muli %arg13, %c256_i32 : i32
        %76 = tpu.assume_multiple %75, 256 : i32
        %c0_39 = arith.constant 0 : index
        %77 = arith.index_cast %76 : i32 to index
        %78 = vector.load %arg10[%c0_39, %77] : memref<3x1024xf32, #tpu.memory_space<vmem>>, vector<3x256xf32>
        %cst_40 = arith.constant dense<0.000000e+00> : vector<144x256xf32>
        %79 = tpu.matmul %3, %78, %cst_40 {dimension_numbers = #tpu.dot_dimension_numbers<[1], [0], [0], [1], [0, 0, 1, 1], [], []>, precision = #tpu.contract_precision<fp32>} : vector<144x3xf32>, vector<3x256xf32>, vector<144x256xf32> -> vector<144x256xf32>
        %80 = vector.broadcast %4 : vector<144x1xf32> to vector<144x256xf32>
        %81 = arith.addf %79, %80 : vector<144x256xf32>
        %82 = vector.extract_strided_slice %81 {offsets = [0, 0], sizes = [48, 256], strides = [1, 1]} : vector<144x256xf32> to vector<48x256xf32>
        %83 = vector.extract_strided_slice %81 {offsets = [48, 0], sizes = [48, 256], strides = [1, 1]} : vector<144x256xf32> to vector<48x256xf32>
        %84 = arith.mulf %82, %83 : vector<48x256xf32>
        %85 = vector.extract_strided_slice %81 {offsets = [96, 0], sizes = [48, 256], strides = [1, 1]} : vector<144x256xf32> to vector<48x256xf32>
        %86 = arith.mulf %84, %85 : vector<48x256xf32>
        %cst_41 = arith.constant dense<0.000000e+00> : vector<3x256xf32>
        %87 = tpu.matmul %5, %86, %cst_41 {dimension_numbers = #tpu.dot_dimension_numbers<[1], [0], [0], [1], [0, 0, 1, 1], [], []>, precision = #tpu.contract_precision<fp32>} : vector<3x48xf32>, vector<48x256xf32>, vector<3x256xf32> -> vector<3x256xf32>
        %88 = vector.broadcast %6 : vector<3x1xf32> to vector<3x256xf32>
        %89 = arith.addf %87, %88 : vector<3x256xf32>
        %c0_42 = arith.constant 0 : index
        %90 = arith.index_cast %76 : i32 to index
        %91 = vector.load %arg11[%c0_42, %90] : memref<3x1024xf32, #tpu.memory_space<vmem>>, vector<3x256xf32>
        tpu.vector_store %arg11[%c0_42, %90], %89 {strides = array<i32>} : memref<3x1024xf32, #tpu.memory_space<vmem>>, vector<3x256xf32>,
      }
      %c4_i32_29 = arith.constant 4 : i32
      %c0_30 = arith.constant 0 : index
      %c0_31 = arith.constant 0 : index
      %56 = vector.load %arg11[%c0_30, %c0_31] : memref<3x1024xf32, #tpu.memory_space<vmem>>, vector<3x1024xf32>
      %57 = vector.broadcast %7 : vector<2x1xf32> to vector<2x1024xf32>
      %58 = arith.mulf %57, %54 : vector<2x1024xf32>
      %59 = vector.extract_strided_slice %56 {offsets = [0, 0], sizes = [2, 1024], strides = [1, 1]} : vector<3x1024xf32> to vector<2x1024xf32>
      %60 = arith.addf %58, %59 : vector<2x1024xf32>
      %cst_32 = arith.constant 5.000000e-01 : f32
      %61 = vector.broadcast %cst_32 : f32 to vector<2x1024xf32>
      %62 = arith.mulf %60, %61 : vector<2x1024xf32>
      %63 = arith.addf %22, %62 : vector<2x1024xf32>
      %64 = vector.extract_strided_slice %21 {offsets = [1, 0], sizes = [1, 1024], strides = [1, 1]} : vector<3x1024xf32> to vector<1x1024xf32>
      %65 = vector.extract_strided_slice %56 {offsets = [2, 0], sizes = [1, 1024], strides = [1, 1]} : vector<3x1024xf32> to vector<1x1024xf32>
      %cst_33 = arith.constant 5.000000e-01 : f32
      %66 = vector.broadcast %cst_33 : f32 to vector<1x1024xf32>
      %67 = arith.mulf %65, %66 : vector<1x1024xf32>
      %68 = arith.addf %64, %67 : vector<1x1024xf32>
      %69 = tpu.concatenate %63, %68 in 0 : vector<2x1024xf32>, vector<1x1024xf32> -> vector<3x1024xf32>
      %c0_34 = arith.constant 0 : index
      %c0_35 = arith.constant 0 : index
      %70 = vector.load %arg10[%c0_34, %c0_35] : memref<3x1024xf32, #tpu.memory_space<vmem>>, vector<3x1024xf32>
      tpu.vector_store %arg10[%c0_34, %c0_35], %69 {strides = array<i32>} : memref<3x1024xf32, #tpu.memory_space<vmem>>, vector<3x1024xf32>,
      %71 = arith.index_cast %arg12 : i32 to index
      %c0_36 = arith.constant 0 : index
      %c0_37 = arith.constant 0 : index
      %c0_38 = arith.constant 0 : index
      %72 = vector.load %arg9[%71, %c0_36, %c0_37, %c0_38] : memref<3x1x3x1024xf32, #tpu.memory_space<vmem>>, vector<1x1x3x1024xf32>
      %73 = vector.shape_cast %72 : vector<1x1x3x1024xf32> to vector<3x1024xf32>
      %74 = vector.shape_cast %69 : vector<3x1024xf32> to vector<1x1x3x1024xf32>
      tpu.vector_store %arg9[%71, %c0_36, %c0_37, %c0_38], %74 {strides = array<i32>} : memref<3x1x3x1024xf32, #tpu.memory_space<vmem>>, vector<1x1x3x1024xf32>,
    }
    %c3_i32_19 = arith.constant 3 : i32
    return
  }
  func.func @transform_0(%arg0: i32, %arg1: i32) -> (i32, i32) {
    %c0_i32 = arith.constant 0 : i32
    %c0_i32_0 = arith.constant 0 : i32
    %c0_i32_1 = arith.constant 0 : i32
    return %c0_i32, %c0_i32_0 : i32, i32
  }
  func.func @transform_1(%arg0: i32, %arg1: i32) -> (i32, i32, i32) {
    %c0_i32 = arith.constant 0 : i32
    %c0_i32_0 = arith.constant 0 : i32
    %c0_i32_1 = arith.constant 0 : i32
    return %arg0, %c0_i32, %c0_i32_0 : i32, i32, i32
  }
  func.func @transform_2(%arg0: i32, %arg1: i32) -> (i32, i32) {
    %c0_i32 = arith.constant 0 : i32
    %c0_i32_0 = arith.constant 0 : i32
    %c0_i32_1 = arith.constant 0 : i32
    return %c0_i32, %c0_i32_0 : i32, i32
  }
  func.func @transform_3(%arg0: i32, %arg1: i32) -> (i32, i32) {
    %c0_i32 = arith.constant 0 : i32
    %c0_i32_0 = arith.constant 0 : i32
    %c0_i32_1 = arith.constant 0 : i32
    return %c0_i32, %c0_i32_0 : i32, i32
  }
  func.func @transform_4(%arg0: i32, %arg1: i32) -> (i32, i32) {
    %c0_i32 = arith.constant 0 : i32
    %c0_i32_0 = arith.constant 0 : i32
    %c0_i32_1 = arith.constant 0 : i32
    return %c0_i32, %c0_i32_0 : i32, i32
  }
  func.func @transform_5(%arg0: i32, %arg1: i32) -> (i32, i32) {
    %c0_i32 = arith.constant 0 : i32
    %c0_i32_0 = arith.constant 0 : i32
    %c0_i32_1 = arith.constant 0 : i32
    return %c0_i32, %c0_i32_0 : i32, i32
  }
  func.func @transform_6(%arg0: i32, %arg1: i32) -> (i32, i32) {
    %c0_i32 = arith.constant 0 : i32
    %c0_i32_0 = arith.constant 0 : i32
    %c0_i32_1 = arith.constant 0 : i32
    return %c0_i32, %c0_i32_0 : i32, i32
  }
  func.func @transform_7(%arg0: i32, %arg1: i32) -> (i32, i32, i32, i32) {
    %c0_i32 = arith.constant 0 : i32
    %c0_i32_0 = arith.constant 0 : i32
    %c0_i32_1 = arith.constant 0 : i32
    return %arg1, %arg0, %c0_i32, %c0_i32_0 : i32, i32, i32, i32
  }
}

</mosaic_0001>

<bundles_post_ra>
// kernel: rcnn_forward.1
= control target key start
LH: loop header
LB: loop body
LE: loop exit
PB: predicated region body
PF: predicated region fallthrough
CT: control target
= control target key end

     0   :  { %s3735_s24 = smov 0   ;;  %s3737_s25 = smov 0   ;;  %s5802_s0 = inlined_call_operand.vmem [shape: f32[8,1024], index: 0, kind: input, shape index: {}]   ;;  %s5803_s1 = inlined_call_operand.vmem [shape: f32[2,3,1024], index: 1, kind: input, shape index: {}]   ;;  %s5804_s2 = inlined_call_operand.vmem [shape: f32[144,3], index: 2, kind: input, shape index: {}]   ;;  %s5805_s3 = inlined_call_operand.vmem [shape: f32[144,1], index: 3, kind: input, shape index: {}]   ;;  %s5806_s4 = inlined_call_operand.vmem [shape: f32[3,48], index: 4, kind: input, shape index: {}]   ;;  %s5807_s5 = inlined_call_operand.vmem [shape: f32[3,1], index: 5, kind: input, shape index: {}]   ;;  %s5808_s6 = inlined_call_operand.vmem [shape: f32[2,1], index: 6, kind: input, shape index: {}]   ;;  %s5809_s7 = inlined_call_operand.vmem [shape: f32[6,2,3,1024], index: 7, kind: output, shape index: {}]  }
   0x1   :  { %s3739_s26 = smov 0   ;;  %s3741_s27 = smov 0  }
   0x2   :  { %s3743_s28 = smov 0   ;;  %s3745_s29 = smov 0  }
   0x3   :  { %s3747_s30 = smov 0  }
   0x4 LB: > { %s26_s8 = sadd.s32 1, %s3663_s28  ;;  %s29_s9 = sadd.s32 1, %s3667_s29  ;;  %s3671_s30 = sphi %s3747_s30, %s17_s30   ;;  %s3667_s29 = sphi %s3745_s29, %s6101_s29   ;;  %s3663_s28 = sphi %s3743_s28, %s6100_s28   ;;  %s3659_s27 = sphi %s3741_s27, %s6099_s27   ;;  %s3655_s26 = sphi %s3739_s26, %s6098_s26   ;;  %s3651_s25 = sphi %s3737_s25, %s6097_s25   ;;  %s3647_s24 = sphi %s3735_s24, %s6096_s24  }
   0x5   : > { %p27_p0 = scmp.ge.s32.totalorder %s26_s8, 2  ;;  %s3485_s10 = sadd.s32 4294967295, %s3671_s30  }
   0x6   : > { %p200_p1 = scmp.ne.s32.totalorder %s3651_s25, %s3647_s24  ;;  %p201_p2 = scmp.eq.s32.totalorder %s3485_s10, 3 }
   0x7   : > { %s6103_s8 = smov (%p27_p0, %s26_s8), 0  ;;  %s6105_s9 = smov (!%p27_p0, %s29_s9), %s3667_s29 }
   0x8   : > { %s185_s11 = ssub.s32 %s3663_s28, %s6103_s8  ;;  %p31_p3 = scmp.ge.s32.totalorder %s6105_s9, 2 }
   0x9   : > { %p3489_p4 = scmp.ge.s32.totalorder %s3671_s30, 1  ;;  %p3781_p5 = por %p201_p2, %p200_p1 }
   0xa   : > { %p251_p6 = scmp.lt.s32.totalorder %s3671_s30, 5  ;;  %s6107_s9 = smov (%p31_p3, %s6105_s9), 0 }
   0xb   : > { %s186_s13 = ssub.s32 %s3667_s29, %s6107_s9  ;;  %s190_s15 = sadd.s32 1, %s3651_s25 }
   0xc   : > { %p252_p7 = pnand %p3489_p4, %p251_p6  ;;  %s187_s14 = sor.u32 %s186_s13, %s185_s11 }
   0xd   : > { %p188_p8 = scmp.eq.s32.totalorder %s187_s14, 0 }
   0xe   : > { %255 = sbr.rel (%p252_p7) target bundleno = 1102 (0x44e), region = 48 }
   0xf   : > { %s3792_s16 = scalar_select %p188_p8, %s3651_s25, %s190_s15  }
  0x13   : > { %s279_s17 = sand.u32 1, %s3647_s24   ;;  %p282_p9 = scmp.lt.s32.totalorder %s3659_s27, 1 }
  0x14   : > { %s3510_s18 = smul.u32 96, %s279_s17  ;;  %p3492_p10 = scmp.ne.s32.totalorder %s3655_s26, 0 }
  0x15   : > { %s283_s19 = scalar_select %p282_p9, %s3659_s27, 1 }
  0x16   : > { %s3800_s10 = scalar_lea.vmem [#allocation4], %s3510_s18  ;;  %291 = sbr.rel (%p3492_p10) target bundleno = 30 (0x1e), region = 52 }
  0x17   : > { %s3507_s20 = sshll.u32 %s283_s19, 5 }
  0x18   : > { %s286_s23 = scalar_lea.vmem %s5803_s1, %s3507_s20 }
  0x1b   : > { %v292_v0 = vld [vmem:[%s286_s23] sm:$0x77]  ;;  %v293_v1 = vld [vmem:[%s286_s23 + $0x8] sm:$0x77]  ;;  %v294_v2 = vld [vmem:[%s286_s23 + $0x10] sm:$0x77] }
  0x1c   : > { %296 = vst [vmem:[#allocation2] sm:$0x77] %v292_v0  ;;  %297 = vst [vmem:[#allocation2 + $0x8] sm:$0x77] %v293_v1  ;;  %v295_v3 = vld [vmem:[%s286_s23 + $0x18] sm:$0x77] }
  0x1d   : > { %298 = vst [vmem:[#allocation2 + $0x10] sm:$0x77] %v294_v2  ;;  %299 = vst [vmem:[#allocation2 + $0x18] sm:$0x77] %v295_v3 }
  0x1e PF: > { %v3806_v4 = vld [vmem:[%s5804_s2] sm:$0xff]  ;;  %v3811_v5 = vld [vmem:[%s5804_s2 + $0x8] sm:$0xff]  ;;  %v3816_v6 = vld [vmem:[%s5804_s2 + $0x10] sm:$0xff]  ;;  %s4190_s22 = smov 0  }
  0x1f   : > { %5878 = vst [vmem:[#allocation5_spill] sm:$0xff] %v3806_v4  ;;  %5879 = vst [vmem:[#allocation6_spill] sm:$0xff] %v3811_v5  ;;  %v3821_v7 = vld [vmem:[%s5804_s2 + $0x18] sm:$0xff]  ;;  %v3826_v8 = vld [vmem:[%s5804_s2 + $0x20] sm:$0xff] }
  0x20   : > { %5880 = vst [vmem:[#allocation7_spill] sm:$0xff] %v3816_v6  ;;  %5881 = vst [vmem:[#allocation8_spill] sm:$0xff] %v3821_v7  ;;  %v3831_v9 = vld [vmem:[%s5804_s2 + $0x28] sm:$0xff]  ;;  %v3836_v10 = vld [vmem:[%s5804_s2 + $0x30] sm:$0xff] }
  0x21   : > { %5882 = vst [vmem:[#allocation9_spill] sm:$0xff] %v3826_v8  ;;  %5883 = vst [vmem:[#allocation10_spill] sm:$0xff] %v3831_v9  ;;  %v3841_v11 = vld [vmem:[%s5804_s2 + $0x38] sm:$0xff]  ;;  %v3846_v12 = vld [vmem:[%s5804_s2 + $0x40] sm:$0xff] }
  0x22   : > { %5884 = vst [vmem:[#allocation11_spill] sm:$0xff] %v3836_v10  ;;  %5885 = vst [vmem:[#allocation12_spill] sm:$0xff] %v3841_v11  ;;  %v3851_v13 = vld [vmem:[%s5804_s2 + $0x48] sm:$0xff]  ;;  %v3856_v14 = vld [vmem:[%s5804_s2 + $0x50] sm:$0xff] }
  0x23   : > { %5886 = vst [vmem:[#allocation13_spill] sm:$0xff] %v3846_v12  ;;  %5887 = vst [vmem:[#allocation14_spill] sm:$0xff] %v3851_v13  ;;  %v3861_v15 = vld [vmem:[%s5804_s2 + $0x58] sm:$0xff]  ;;  %v3866_v16 = vld [vmem:[%s5804_s2 + $0x60] sm:$0xff] }
  0x24   : > { %5888 = vst [vmem:[#allocation15_spill] sm:$0xff] %v3856_v14  ;;  %5889 = vst [vmem:[#allocation16_spill] sm:$0xff] %v3861_v15  ;;  %v3871_v17 = vld [vmem:[%s5804_s2 + $0x68] sm:$0xff]  ;;  %v3876_v18 = vld [vmem:[%s5804_s2 + $0x70] sm:$0xff] }
  0x25   : > { %5890 = vst [vmem:[#allocation17_spill] sm:$0xff] %v3866_v16  ;;  %5891 = vst [vmem:[#allocation18_spill] sm:$0xff] %v3871_v17  ;;  %v3881_v19 = vld [vmem:[%s5804_s2 + $0x78] sm:$0xff]  ;;  %v3886_v20 = vld [vmem:[%s5804_s2 + $0x80] sm:$0xff] }
  0x26   : > { %5892 = vst [vmem:[#allocation19_spill] sm:$0xff] %v3876_v18  ;;  %5893 = vst [vmem:[#allocation20_spill] sm:$0xff] %v3881_v19  ;;  %v3891_v21 = vld [vmem:[%s5804_s2 + $0x88] sm:$0xff]  ;;  %v3896_v22 = vld [vmem:[%s5805_s3] sm:$0xff] }
  0x27   : > { %5894 = vst [vmem:[#allocation21_spill] sm:$0xff] %v3886_v20  ;;  %5895 = vst [vmem:[#allocation22_spill] sm:$0xff] %v3891_v21  ;;  %v3901_v23 = vld [vmem:[%s5805_s3 + $0x8] sm:$0xff]  ;;  %v3906_v24 = vld [vmem:[%s5805_s3 + $0x10] sm:$0xff] }
  0x28   : > { %5896 = vst [vmem:[#allocation23_spill] sm:$0xff] %v3896_v22  ;;  %5897 = vst [vmem:[#allocation24_spill] sm:$0xff] %v3901_v23  ;;  %v3911_v25 = vld [vmem:[%s5805_s3 + $0x18] sm:$0xff]  ;;  %v3916_v26 = vld [vmem:[%s5805_s3 + $0x20] sm:$0xff] }
  0x29   : > { %5898 = vst [vmem:[#allocation25_spill] sm:$0xff] %v3906_v24  ;;  %5899 = vst [vmem:[#allocation26_spill] sm:$0xff] %v3911_v25  ;;  %v3921_v27 = vld [vmem:[%s5805_s3 + $0x28] sm:$0xff]  ;;  %v3926_v28 = vld [vmem:[%s5805_s3 + $0x30] sm:$0xff] }
  0x2a   : > { %5900 = vst [vmem:[#allocation27_spill] sm:$0xff] %v3916_v26  ;;  %5901 = vst [vmem:[#allocation28_spill] sm:$0xff] %v3921_v27  ;;  %v3931_v29 = vld [vmem:[%s5805_s3 + $0x38] sm:$0xff]  ;;  %v3936_v30 = vld [vmem:[%s5805_s3 + $0x40] sm:$0xff] }
  0x2b   : > { %5902 = vst [vmem:[#allocation29_spill] sm:$0xff] %v3926_v28  ;;  %5903 = vst [vmem:[#allocation30_spill] sm:$0xff] %v3931_v29  ;;  %v3941_v31 = vld [vmem:[%s5805_s3 + $0x48] sm:$0xff]  ;;  %v3946_v32 = vld [vmem:[%s5805_s3 + $0x50] sm:$0xff] }
  0x2c   : > { %5904 = vst [vmem:[#allocation31_spill] sm:$0xff] %v3936_v30  ;;  %5905 = vst [vmem:[#allocation32_spill] sm:$0xff] %v3941_v31  ;;  %v3951_v33 = vld [vmem:[%s5805_s3 + $0x58] sm:$0xff]  ;;  %v3956_v34 = vld [vmem:[%s5805_s3 + $0x60] sm:$0xff] }
  0x2d   : > { %5906 = vst [vmem:[#allocation33_spill] sm:$0xff] %v3946_v32  ;;  %5907 = vst [vmem:[#allocation34_spill] sm:$0xff] %v3951_v33  ;;  %v3961_v35 = vld [vmem:[%s5805_s3 + $0x68] sm:$0xff]  ;;  %v3966_v36 = vld [vmem:[%s5805_s3 + $0x70] sm:$0xff] }
  0x2e   : > { %5908 = vst [vmem:[#allocation35_spill] sm:$0xff] %v3956_v34  ;;  %5909 = vst [vmem:[#allocation36_spill] sm:$0xff] %v3961_v35  ;;  %v3971_v37 = vld [vmem:[%s5805_s3 + $0x78] sm:$0xff]  ;;  %v3976_v38 = vld [vmem:[%s5805_s3 + $0x80] sm:$0xff] }
  0x2f   : > { %5910 = vst [vmem:[#allocation37_spill] sm:$0xff] %v3966_v36  ;;  %5911 = vst [vmem:[#allocation38_spill] sm:$0xff] %v3971_v37  ;;  %v3981_v39 = vld [vmem:[%s5805_s3 + $0x88] sm:$0xff]  ;;  %v3986_v40 = vld [vmem:[%s5806_s4] sm:$0x7] }
  0x30   : > { %5912 = vst [vmem:[#allocation39_spill] sm:$0xff] %v3976_v38  ;;  %5913 = vst [vmem:[#allocation40_spill] sm:$0xff] %v3981_v39  ;;  %v3991_v41 = vld [vmem:[%s5807_s5] sm:$0x7]  ;;  %v4006_v44 = vld [vmem:[%s5802_s0 + $0x8] sm:$0x3] }
  0x31   : > { %5914 = vst [vmem:[#allocation41_spill] sm:$0xff] %v3986_v40  ;;  %5915 = vst [vmem:[#allocation42_spill] sm:$0xff] %v3991_v41  ;;  %v3996_v42 = vld [vmem:[%s5808_s6] sm:$0x3]  ;;  %v4011_v45 = vld [vmem:[%s5802_s0 + $0x10] sm:$0x3] }
  0x32   : > { %5916 = vst [vmem:[#allocation43_spill] sm:$0xff] %v3996_v42  ;;  %v4001_v43 = vld [vmem:[%s5802_s0] sm:$0x3]  ;;  %5918 = vst [vmem:[#allocation45_spill] sm:$0xff] %v4006_v44  ;;  %v4016_v46 = vld [vmem:[%s5802_s0 + $0x18] sm:$0x3] }
  0x33   : > { %5917 = vst [vmem:[#allocation44_spill] sm:$0xff] %v4001_v43  ;;  %5919 = vst [vmem:[#allocation46_spill] sm:$0xff] %v4011_v45  ;;  %v4021_v47 = vld [vmem:[%s5802_s0 + $0x20] sm:$0x3]  ;;  %v4026_v48 = vld [vmem:[%s5802_s0 + $0x28] sm:$0x3] }
  0x34   : > { %5920 = vst [vmem:[#allocation47_spill] sm:$0xff] %v4016_v46  ;;  %5921 = vst [vmem:[#allocation48_spill] sm:$0xff] %v4021_v47  ;;  %v4031_v49 = vld [vmem:[%s5802_s0 + $0x30] sm:$0x3]  ;;  %v4036_v50 = vld [vmem:[%s5802_s0 + $0x38] sm:$0x3] }
  0x35   : > { %5922 = vst [vmem:[#allocation49_spill] sm:$0xff] %v4026_v48  ;;  %5923 = vst [vmem:[#allocation50_spill] sm:$0xff] %v4031_v49  ;;  %vm351_vm4 = vcmp.ne.f32.partialorder %v4021_v47, 0.0  ;;  %vm352_vm5 = vcmp.ne.f32.partialorder %v4026_v48, 0.0  ;;  %v4047_v51 = vld [vmem:[%s5802_s0] sm:$0x30] }
  0x36   : > { %5924 = vst [vmem:[#allocation51_spill] sm:$0xff] %v4036_v50  ;;  %5925 = vst [vmem:[#allocation52_spill] sm:$0xff] %v4047_v51  ;;  %vm353_vm6 = vcmp.ne.f32.partialorder %v4031_v49, 0.0  ;;  %vm354_vm7 = vcmp.ne.f32.partialorder %v4036_v50, 0.0  ;;  %v4054_v52 = vld [vmem:[%s5802_s0 + $0x8] sm:$0x30] }
  0x37   : > { %5926 = vst [vmem:[#allocation53_spill] sm:$0xff] %v4054_v52  ;;  %v4059_v53 = vld [vmem:[%s5802_s0 + $0x10] sm:$0x30]  ;;  %v4064_v54 = vld [vmem:[%s5802_s0 + $0x18] sm:$0x30] }
  0x38   : > { %5927 = vst [vmem:[#allocation54_spill] sm:$0xff] %v4059_v53  ;;  %5928 = vst [vmem:[#allocation55_spill] sm:$0xff] %v4064_v54  ;;  %v4069_v55 = vld [vmem:[%s5802_s0 + $0x20] sm:$0x30]  ;;  %v4074_v56 = vld [vmem:[%s5802_s0 + $0x28] sm:$0x30] }
  0x39   : > { %5929 = vst [vmem:[#allocation56_spill] sm:$0xff] %v4069_v55  ;;  %5930 = vst [vmem:[#allocation57_spill] sm:$0xff] %v4074_v56  ;;  %v4079_v57 = vld [vmem:[%s5802_s0 + $0x30] sm:$0x30]  ;;  %v4084_v58 = vld [vmem:[%s5802_s0 + $0x38] sm:$0x30] }
  0x3a   : > { %5931 = vst [vmem:[#allocation58_spill] sm:$0xff] %v4079_v57  ;;  %5932 = vst [vmem:[#allocation59_spill] sm:$0xff] %v4084_v58  ;;  %v4095_v59 = vld [vmem:[%s5802_s0] sm:$0xc]  ;;  %v4102_v60 = vld [vmem:[%s5802_s0 + $0x8] sm:$0xc] }
  0x3b   : > { %5933 = vst [vmem:[#allocation60_spill] sm:$0xff] %v4095_v59  ;;  %5934 = vst [vmem:[#allocation61_spill] sm:$0xff] %v4102_v60  ;;  %v4107_v61 = vld [vmem:[%s5802_s0 + $0x10] sm:$0xc]  ;;  %v4112_v62 = vld [vmem:[%s5802_s0 + $0x18] sm:$0xc] }
  0x3c   : > { %5935 = vst [vmem:[#allocation62_spill] sm:$0xff] %v4107_v61  ;;  %5936 = vst [vmem:[#allocation63_spill] sm:$0xff] %v4112_v62  ;;  %v4117_v63 = vld [vmem:[%s5802_s0 + $0x20] sm:$0xc]  ;;  %v4122_v0 = vld [vmem:[%s5802_s0 + $0x28] sm:$0xc] }
  0x3d   : > { %5937 = vst [vmem:[#allocation64_spill] sm:$0xff] %v4117_v63  ;;  %5938 = vst [vmem:[#allocation65_spill] sm:$0xff] %v4122_v0  ;;  %v4127_v1 = vld [vmem:[%s5802_s0 + $0x30] sm:$0xc]  ;;  %v4132_v2 = vld [vmem:[%s5802_s0 + $0x38] sm:$0xc] }
  0x3e   : > { %5939 = vst [vmem:[#allocation66_spill] sm:$0xff] %v4127_v1  ;;  %5940 = vst [vmem:[#allocation67_spill] sm:$0xff] %v4132_v2  ;;  %v4143_v3 = vld [vmem:[%s5802_s0] sm:$0xc0]  ;;  %v4150_v42 = vld [vmem:[%s5802_s0 + $0x8] sm:$0xc0] }
  0x3f   : > { %5941 = vst [vmem:[#allocation68_spill] sm:$0xff] %v4143_v3  ;;  %5942 = vst [vmem:[#allocation69_spill] sm:$0xff] %v4150_v42  ;;  %v4155_v40 = vld [vmem:[%s5802_s0 + $0x10] sm:$0xc0]  ;;  %v4160_v21 = vld [vmem:[%s5802_s0 + $0x18] sm:$0xc0] }
  0x40   : > { %5943 = vst [vmem:[#allocation70_spill] sm:$0xff] %v4155_v40  ;;  %5944 = vst [vmem:[#allocation71_spill] sm:$0xff] %v4160_v21  ;;  %v4165_v20 = vld [vmem:[%s5802_s0 + $0x20] sm:$0xc0]  ;;  %v4170_v19 = vld [vmem:[%s5802_s0 + $0x28] sm:$0xc0] }
  0x41   : > { %5945 = vst [vmem:[#allocation72_spill] sm:$0xff] %v4165_v20  ;;  %5946 = vst [vmem:[#allocation73_spill] sm:$0xff] %v4170_v19  ;;  %v4175_v18 = vld [vmem:[%s5802_s0 + $0x30] sm:$0xc0]  ;;  %v4180_v17 = vld [vmem:[%s5802_s0 + $0x38] sm:$0xc0] }
  0x42   : > { %5947 = vst [vmem:[#allocation74_spill] sm:$0xff] %v4175_v18  ;;  %5948 = vst [vmem:[#allocation75_spill] sm:$0xff] %v4180_v17  ;;  %vm395_vm8 = vcmp.ne.f32.partialorder %v4143_v3, 0.0  ;;  %vm396_vm10 = vcmp.ne.f32.partialorder %v4150_v42, 0.0  ;;  %vm397_vm9 = vcmp.ne.f32.partialorder %v4155_v40, 0.0  ;;  %vm398_vm11 = vcmp.ne.f32.partialorder %v4160_v21, 0.0 }
  0x43   : > { %vm399_vm12 = vcmp.ne.f32.partialorder %v4165_v20, 0.0  ;;  %vm400_vm13 = vcmp.ne.f32.partialorder %v4170_v19, 0.0 }
  0x44 LB: >> { %v4195_v41 = vld [vmem:[#allocation2 + $0x8] sm:$0x77]  ;;  %v4197_v16 = vld [vmem:[#allocation2] sm:$0x77]  ;;  %s3681_s23 = smov 127   ;;  %s3682_s24 = smov 31   ;;  %v5810_v36 = vlaneseq  ;;  %s3675_s22 = sphi %s4190_s22, %s408_s22  }
  0x45   : >> { %5949 = vst [vmem:[#allocation76_spill] sm:$0xff] %v4195_v41  ;;  %5950 = vst [vmem:[#allocation77_spill] sm:$0xff] %v4197_v16  ;;  %433 = vrot.lane.b32.xlu1 %v4195_v41, %s3681_s23  ;;  %429 = vrot.lane.b32.xlu0 %v4197_v16, %s3681_s23  ;;  %v4203_v34 = vcombine.high %v4195_v41, %v4195_v41  ;;  %v4207_v35 = vcombine.high %v4197_v16, %v4197_v16  ;;  %v4209_v28 = vld [vmem:[#allocation2 + $0x10] sm:$0x77]  ;;  %v4217_v22 = vld [vmem:[#allocation2 + $0x18] sm:$0x77] }
  0x46   : >> { %5951 = vst [vmem:[#allocation78_spill] sm:$0xff] %v4209_v28  ;;  %v4215_v15 = vcombine.high %v4209_v28, %v4209_v28  ;;  %5952 = vst [vmem:[#allocation79_spill] sm:$0xff] %v4217_v22  ;;  %v4223_v14 = vcombine.high %v4217_v22, %v4217_v22  ;;  %s3683_s11 = smov 1   ;;  %s3684_s13 = smov 97   ;;  %v4281_v29 = vand.u32 127, %v5810_v36  ;;  %v5953_v44 = vld [vmem:[#allocation45_spill] sm:$0xff] }
  0x47   : >> { %s3685_s14 = smov 32   ;;  %s3686_s15 = smov 96   ;;  %vm5954_vm1 = vcmp.ne.f32.partialorder %v5953_v44, 0.0  ;;  %v5955_v45 = vld [vmem:[#allocation46_spill] sm:$0xff]  ;;  %v5957_v46 = vld [vmem:[#allocation47_spill] sm:$0xff]  ;;  %v5961_v43 = vld [vmem:[#allocation44_spill] sm:$0xff] }
  0x48   : >> { %s3687_s17 = smov 126   ;;  %s3688_s18 = smov 2   ;;  %vm447_vm14 = vcmp.lt.s32.totalorder %v4281_v29, 127  ;;  %vm472_vm15 = vcmp.lt.s32.totalorder %v4281_v29, 31  ;;  %vm5956_vm2 = vcmp.ne.f32.partialorder %v5955_v45, 0.0  ;;  %vm5958_vm3 = vcmp.ne.f32.partialorder %v5957_v46, 0.0 }
  0x49   : >> { %435 = vrot.lane.b32.xlu1 %v4203_v34, %s3681_s23  ;;  %431 = vrot.lane.b32.xlu0 %v4207_v35, %s3681_s23  ;;  %s3689_s19 = smov 98   ;;  %vm5962_vm0 = vcmp.ne.f32.partialorder %v5961_v43, 0.0  ;;  %s3690_s20 = smov 30   ;;  %v5965_v59 = vld [vmem:[#allocation60_spill] sm:$0xff]  ;;  %v5967_v60 = vld [vmem:[#allocation61_spill] sm:$0xff]  ;;  %v5969_v61 = vld [vmem:[#allocation62_spill] sm:$0xff] }
  0x4a   : >> { %s3691_s21 = smov 64   ;;  %v5971_v62 = vld [vmem:[#allocation63_spill] sm:$0xff]  ;;  %v5973_v63 = vld [vmem:[#allocation64_spill] sm:$0xff]  ;;  %v5977_v1 = vld [vmem:[#allocation66_spill] sm:$0xff] }
  0x4b   : >> { %v5975_v2 = vld [vmem:[#allocation67_spill] sm:$0xff]  ;;  %v5979_v0 = vld [vmem:[#allocation65_spill] sm:$0xff]  ;;  %v5989_v53 = vld [vmem:[#allocation54_spill] sm:$0xff] }
  0x4c   : >> { %v5987_v52 = vld [vmem:[#allocation53_spill] sm:$0xff]  ;;  %v5995_v18 = vld [vmem:[#allocation74_spill] sm:$0xff]  ;;  %v5997_v51 = vld [vmem:[#allocation52_spill] sm:$0xff] }
  0x4d   : >> { %439 = vrot.lane.b32.xlu1 %v4215_v15, %s3681_s23  ;;  %437 = vrot.lane.b32.xlu0 %v4209_v28, %s3681_s23  ;;  %v5999_v17 = vld [vmem:[#allocation75_spill] sm:$0xff]  ;;  %v6003_v55 = vld [vmem:[#allocation56_spill] sm:$0xff]  ;;  %v6005_v56 = vld [vmem:[#allocation57_spill] sm:$0xff] }
  0x4e   : >> { %v6001_v54 = vld [vmem:[#allocation55_spill] sm:$0xff]  ;;  %v6009_v57 = vld [vmem:[#allocation58_spill] sm:$0xff] }
  0x4f   : >> { %v6007_v58 = vld [vmem:[#allocation59_spill] sm:$0xff] }
  0x51   : >> { %443 = vrot.lane.b32.xlu1 %v4223_v14, %s3681_s23  ;;  %441 = vrot.lane.b32.xlu0 %v4217_v22, %s3681_s23  ;;  %s4715_s23 = smov 0  }
  0x55   : >> { %458 = vrot.lane.b32.xlu1 %v4207_v35, %s3682_s24  ;;  %456 = vrot.lane.b32.xlu0 %v4197_v16, %s3682_s24 }
  0x59   : >> { %462 = vrot.lane.b32.xlu1 %v4203_v34, %s3682_s24  ;;  %460 = vrot.lane.b32.xlu0 %v4195_v41, %s3682_s24 }
  0x5d   : >> { %466 = vrot.lane.b32.xlu1 %v4215_v15, %s3682_s24  ;;  %464 = vrot.lane.b32.xlu0 %v4209_v28, %s3682_s24 }
  0x61   : >> { %470 = vrot.lane.b32.xlu1 %v4223_v14, %s3682_s24  ;;  %468 = vrot.lane.b32.xlu0 %v4217_v22, %s3682_s24 }
  0x65   : >> { %491 = vrot.lane.b32.xlu1 %v4207_v35, %s3683_s11  ;;  %489 = vrot.lane.b32.xlu0 %v4197_v16, %s3683_s11 }
  0x69   : >> { %495 = vrot.lane.b32.xlu1 %v4203_v34, %s3683_s11  ;;  %493 = vrot.lane.b32.xlu0 %v4195_v41, %s3683_s11 }
  0x6d   : >> { %499 = vrot.lane.b32.xlu1 %v4215_v15, %s3683_s11  ;;  %497 = vrot.lane.b32.xlu0 %v4209_v28, %s3683_s11 }
  0x71   : >> { %503 = vrot.lane.b32.xlu1 %v4223_v14, %s3683_s11  ;;  %501 = vrot.lane.b32.xlu0 %v4217_v22, %s3683_s11 }
  0x75   : >> { %516 = vrot.lane.b32.xlu1 %v4207_v35, %s3684_s13  ;;  %514 = vrot.lane.b32.xlu0 %v4197_v16, %s3684_s13 }
  0x79   : >> { %520 = vrot.lane.b32.xlu1 %v4203_v34, %s3684_s13  ;;  %518 = vrot.lane.b32.xlu0 %v4195_v41, %s3684_s13 }
  0x7d   : >> { %524 = vrot.lane.b32.xlu1 %v4215_v15, %s3684_s13  ;;  %522 = vrot.lane.b32.xlu0 %v4209_v28, %s3684_s13 }
  0x81   : >> { %528 = vrot.lane.b32.xlu1 %v4223_v14, %s3684_s13  ;;  %526 = vrot.lane.b32.xlu0 %v4217_v22, %s3684_s13 }
  0x85   : >> { %629 = vrot.lane.b32.xlu1 %v4207_v35, %s3685_s14  ;;  %627 = vrot.lane.b32.xlu0 %v4197_v16, %s3685_s14 }
  0x89   : >> { %633 = vrot.lane.b32.xlu1 %v4203_v34, %s3685_s14  ;;  %631 = vrot.lane.b32.xlu0 %v4195_v41, %s3685_s14 }
  0x8d   : >> { %637 = vrot.lane.b32.xlu1 %v4215_v15, %s3685_s14  ;;  %635 = vrot.lane.b32.xlu0 %v4209_v28, %s3685_s14 }
  0x91   : >> { %641 = vrot.lane.b32.xlu1 %v4223_v14, %s3685_s14  ;;  %639 = vrot.lane.b32.xlu0 %v4217_v22, %s3685_s14 }
  0x95   : >> { %654 = vrot.lane.b32.xlu1 %v4207_v35, %s3686_s15  ;;  %652 = vrot.lane.b32.xlu0 %v4197_v16, %s3686_s15 }
  0x99   : >> { %658 = vrot.lane.b32.xlu1 %v4203_v34, %s3686_s15  ;;  %656 = vrot.lane.b32.xlu0 %v4195_v41, %s3686_s15 }
  0x9d   : >> { %662 = vrot.lane.b32.xlu1 %v4215_v15, %s3686_s15  ;;  %660 = vrot.lane.b32.xlu0 %v4209_v28, %s3686_s15 }
  0xa1   : >> { %666 = vrot.lane.b32.xlu1 %v4223_v14, %s3686_s15  ;;  %664 = vrot.lane.b32.xlu0 %v4217_v22, %s3686_s15 }
  0xa5   : >> { %723 = vrot.lane.b32.xlu1 %v4207_v35, %s3687_s17  ;;  %721 = vrot.lane.b32.xlu0 %v4197_v16, %s3687_s17 }
  0xa9   : >> { %827 = vrot.lane.b32.xlu1 %v4197_v16, %s3688_s18  ;;  %725 = vrot.lane.b32.xlu0 %v4195_v41, %s3687_s17 }
  0xad   : >> { %831 = vrot.lane.b32.xlu1 %v4195_v41, %s3688_s18  ;;  %829 = vrot.lane.b32.xlu0 %v4207_v35, %s3688_s18 }
  0xb1   : >> { %835 = vrot.lane.b32.xlu1 %v4209_v28, %s3688_s18  ;;  %833 = vrot.lane.b32.xlu0 %v4203_v34, %s3688_s18 }
  0xb5   : >> { %839 = vrot.lane.b32.xlu1 %v4217_v22, %s3688_s18  ;;  %837 = vrot.lane.b32.xlu0 %v4215_v15, %s3688_s18 }
  0xb7   : >> { %v434_v13 = vpop.permute.xlu1 %433  ;;  %v430_v23 = vpop.permute.xlu0 %429 }
  0xb9   : >> { %852 = vrot.lane.b32.xlu1 %v4197_v16, %s3689_s19  ;;  %841 = vrot.lane.b32.xlu0 %v4223_v14, %s3688_s18 }
  0xbb   : >> { %v436_v37 = vpop.permute.xlu1 %435  ;;  %v432_v12 = vpop.permute.xlu0 %431 }
  0xbc   : >> { %v452_v30 = vsel %vm447_vm14, %v434_v13, %v436_v37  ;;  %v453_v24 = vsel %vm447_vm14, %v432_v12, %v434_v13  ;;  %v454_v36 = vsel %vm447_vm14, %v430_v23, %v432_v12 }
  0xbd   : >> { %856 = vrot.lane.b32.xlu1 %v4195_v41, %s3689_s19  ;;  %854 = vrot.lane.b32.xlu0 %v4207_v35, %s3689_s19 }
  0xbf   : >> { %v440_v11 = vpop.permute.xlu1 %439  ;;  %v438_v38 = vpop.permute.xlu0 %437 }
  0xc0   : >> { %v450_v31 = vsel %vm447_vm14, %v438_v38, %v440_v11  ;;  %v451_v10 = vsel %vm447_vm14, %v436_v37, %v438_v38 }
  0xc1   : >> { %860 = vrot.lane.b32.xlu1 %v4209_v28, %s3689_s19  ;;  %858 = vrot.lane.b32.xlu0 %v4203_v34, %s3689_s19 }
  0xc3   : >> { %v444_v12 = vpop.permute.xlu1 %443  ;;  %v442_v13 = vpop.permute.xlu0 %441 }
  0xc4   : >> { %v455_v25 = vsel %vm447_vm14, %v444_v12, %v430_v23  ;;  %v448_v39 = vsel %vm447_vm14, %v442_v13, %v444_v12  ;;  %v449_v9 = vsel %vm447_vm14, %v440_v11, %v442_v13  ;;  %vm505_vm14 = vcmp.lt.s32.totalorder %v4281_v29, 1 }
  0xc5   : >> { %864 = vrot.lane.b32.xlu1 %v4217_v22, %s3689_s19  ;;  %862 = vrot.lane.b32.xlu0 %v4215_v15, %s3689_s19 }
  0xc7   : >> { %v459_v37 = vpop.permute.xlu1 %458  ;;  %v457_v38 = vpop.permute.xlu0 %456 }
  0xc8   : >> { %v479_v32 = vsel %vm472_vm15, %v457_v38, %v459_v37 }
  0xc9   : >> { %v4320_v23 = vsel %vm5954_vm1, %v453_v24, %v479_v32  ;;  %727 = vrot.lane.b32.xlu1 %v4203_v34, %s3687_s17  ;;  %866 = vrot.lane.b32.xlu0 %v4223_v14, %s3689_s19  ;;  %vm643_vm1 = vcmp.lt.s32.totalorder %v4281_v29, 32 }
  0xcb   : >> { %v463_v11 = vpop.permute.xlu1 %462  ;;  %v461_v12 = vpop.permute.xlu0 %460 }
  0xcc   : >> { %v477_v13 = vsel %vm472_vm15, %v461_v12, %v463_v11  ;;  %v478_v33 = vsel %vm472_vm15, %v459_v37, %v461_v12 }
  0xcd   : >> { %v4332_v8 = vsel %vm5956_vm2, %v452_v30, %v478_v33  ;;  %v4336_v24 = vsel %vm5958_vm3, %v451_v10, %v477_v13  ;;  %731 = vrot.lane.b32.xlu1 %v4215_v15, %s3687_s17  ;;  %729 = vrot.lane.b32.xlu0 %v4209_v28, %s3687_s17  ;;  %vm5980_vm2 = vcmp.ne.f32.partialorder %v5979_v0, 0.0  ;;  %vm6006_vm3 = vcmp.ne.f32.partialorder %v6005_v56, 0.0 }
  0xcf   : >> { %v467_v32 = vpop.permute.xlu1 %466  ;;  %v465_v44 = vpop.permute.xlu0 %464 }
  0xd0   : >> { %v475_v26 = vsel %vm472_vm15, %v465_v44, %v467_v32  ;;  %v476_v37 = vsel %vm472_vm15, %v463_v11, %v465_v44 }
  0xd1   : >> { %v4348_v30 = vsel %vm351_vm4, %v450_v31, %v476_v37  ;;  %v4352_v10 = vsel %vm352_vm5, %v449_v9, %v475_v26  ;;  %735 = vrot.lane.b32.xlu1 %v4223_v14, %s3687_s17  ;;  %733 = vrot.lane.b32.xlu0 %v4217_v22, %s3687_s17 }
  0xd3   : >> { %v471_v33 = vpop.permute.xlu1 %470  ;;  %v469_v12 = vpop.permute.xlu0 %468 }
  0xd4   : >> { %v480_v13 = vsel %vm472_vm15, %v471_v33, %v457_v38  ;;  %v473_v44 = vsel %vm472_vm15, %v469_v12, %v471_v33  ;;  %v474_v31 = vsel %vm472_vm15, %v467_v32, %v469_v12  ;;  %vm530_vm15 = vcmp.lt.s32.totalorder %v4281_v29, 97 }
  0xd5   : >> { %v481_v9 = vsel %vm5962_vm0, %v454_v36, %v480_v13  ;;  %v4368_v26 = vsel %vm353_vm6, %v448_v39, %v474_v31  ;;  %v4372_v11 = vsel %vm354_vm7, %v455_v25, %v473_v44  ;;  %748 = vrot.lane.b32.xlu1 %v4207_v35, %s3690_s20  ;;  %746 = vrot.lane.b32.xlu0 %v4197_v16, %s3690_s20  ;;  %vm5970_vm0 = vcmp.ne.f32.partialorder %v5969_v61, 0.0 }
  0xd7   : >> { %v492_v38 = vpop.permute.xlu1 %491  ;;  %v490_v32 = vpop.permute.xlu0 %489 }
  0xd8   : >> { %v512_v36 = vsel %vm505_vm14, %v490_v32, %v492_v38 }
  0xd9   : >> { %752 = vrot.lane.b32.xlu1 %v4203_v34, %s3690_s20  ;;  %750 = vrot.lane.b32.xlu0 %v4195_v41, %s3690_s20 }
  0xdb   : >> { %v496_v39 = vpop.permute.xlu1 %495  ;;  %v494_v37 = vpop.permute.xlu0 %493 }
  0xdc   : >> { %v510_v25 = vsel %vm505_vm14, %v494_v37, %v496_v39  ;;  %v511_v33 = vsel %vm505_vm14, %v492_v38, %v494_v37 }
  0xdd   : >> { %756 = vrot.lane.b32.xlu1 %v4215_v15, %s3690_s20  ;;  %754 = vrot.lane.b32.xlu0 %v4209_v28, %s3690_s20 }
  0xdf   : >> { %v500_v12 = vpop.permute.xlu1 %499  ;;  %v498_v13 = vpop.permute.xlu0 %497 }
  0xe0   : >> { %v4389_v44 = vsel %vm505_vm14, %v498_v13, %v500_v12  ;;  %v509_v31 = vsel %vm505_vm14, %v496_v39, %v498_v13 }
  0xe1   : >> { %760 = vrot.lane.b32.xlu1 %v4223_v14, %s3690_s20  ;;  %758 = vrot.lane.b32.xlu0 %v4217_v22, %s3690_s20 }
  0xe3   : >> { %v504_v43 = vpop.permute.xlu1 %503  ;;  %v502_v45 = vpop.permute.xlu0 %501 }
  0xe4   : >> { %v513_v38 = vsel %vm505_vm14, %v504_v43, %v490_v32  ;;  %v506_v37 = vsel %vm505_vm14, %v502_v45, %v504_v43  ;;  %v507_v46 = vsel %vm505_vm14, %v500_v12, %v502_v45  ;;  %vm5966_vm14 = vcmp.ne.f32.partialorder %v5965_v59, 0.0 }
  0xe5   : >> { %967 = vrot.lane.b32.xlu1 %v4207_v35, %s3691_s21  ;;  %965 = vrot.lane.b32.xlu0 %v4197_v16, %s3691_s21  ;;  %v547_v47 = vrot.slane %v513_v38, 6  ;;  %v548_v38 = vrot.slane %v512_v36, 6 }
  0xe7   : >> { %v517_v39 = vpop.permute.xlu1 %516  ;;  %v515_v13 = vpop.permute.xlu0 %514 }
  0xe8   : >> { %v537_v32 = vsel %vm530_vm15, %v515_v13, %v517_v39 }
  0xe9   : >> { %v571_v48 = vrot.slane %v537_v32, 6  ;;  %971 = vrot.lane.b32.xlu1 %v4203_v34, %s3691_s21  ;;  %969 = vrot.lane.b32.xlu0 %v4195_v41, %s3691_s21  ;;  %v549_v32 = vrot.slane %v511_v33, 6 }
  0xeb   : >> { %v587_v35 = vsel %vm5966_vm14, %v547_v47, %v571_v48  ;;  %v521_v43 = vpop.permute.xlu1 %520  ;;  %v519_v45 = vpop.permute.xlu0 %518  ;;  %vm5968_vm14 = vcmp.ne.f32.partialorder %v5967_v60, 0.0 }
  0xec   : >> { %v603_v12 = vrot.slane %v587_v35, 2  ;;  %v535_v49 = vsel %vm530_vm15, %v519_v45, %v521_v43  ;;  %v536_v50 = vsel %vm530_vm15, %v517_v39, %v519_v45  ;;  %v551_v45 = vrot.slane %v509_v31, 6 }
  0xed   : >> { %v572_v27 = vrot.slane %v536_v50, 6  ;;  %v573_v7 = vrot.slane %v535_v49, 6  ;;  %975 = vrot.lane.b32.xlu1 %v4215_v15, %s3691_s21  ;;  %973 = vrot.lane.b32.xlu0 %v4209_v28, %s3691_s21  ;;  %v550_v50 = vrot.slane %v510_v25, 6 }
  0xee   : >> { %v4422_v34 = vadd.f32 %v603_v12, %v481_v9 }
  0xef   : >> { %v588_v47 = vsel %vm5968_vm14, %v548_v38, %v572_v27  ;;  %v589_v48 = vsel %vm5970_vm0, %v549_v32, %v573_v7  ;;  %v525_v35 = vpop.permute.xlu1 %524  ;;  %v523_v39 = vpop.permute.xlu0 %522  ;;  %v553_v38 = vrot.slane %v507_v46, 6  ;;  %vm5972_vm0 = vcmp.ne.f32.partialorder %v5971_v62, 0.0 }
  0xf0   : >> { %v604_v36 = vrot.slane %v588_v47, 2  ;;  %v605_v33 = vrot.slane %v589_v48, 2  ;;  %v533_v49 = vsel %vm530_vm15, %v523_v39, %v525_v35  ;;  %v534_v15 = vsel %vm530_vm15, %v521_v43, %v523_v39 }
  0xf1   : >> { %v574_v9 = vrot.slane %v534_v15, 6  ;;  %v575_v12 = vrot.slane %v533_v49, 6  ;;  %979 = vrot.lane.b32.xlu1 %v4223_v14, %s3691_s21  ;;  %977 = vrot.lane.b32.xlu0 %v4217_v22, %s3691_s21  ;;  %vm5974_vm14 = vcmp.ne.f32.partialorder %v5973_v63, 0.0 }
  0xf2   : >> { %v620_v7 = vadd.f32 %v604_v36, %v4320_v23  ;;  %v621_v27 = vadd.f32 %v605_v33, %v4332_v8  ;;  %v554_v8 = vrot.slane %v506_v37, 6  ;;  %v552_v33 = vrot.slane %v4389_v44, 6 }
  0xf3   : >> { %v590_v32 = vsel %vm5972_vm0, %v550_v50, %v574_v9  ;;  %v591_v25 = vsel %vm5974_vm14, %v551_v45, %v575_v12  ;;  %v529_v31 = vpop.permute.xlu1 %528  ;;  %v527_v43 = vpop.permute.xlu0 %526  ;;  %vm5976_vm0 = vcmp.ne.f32.partialorder %v5975_v2, 0.0  ;;  %vm5978_vm14 = vcmp.ne.f32.partialorder %v5977_v1, 0.0 }
  0xf4   : >> { %v606_v47 = vrot.slane %v590_v32, 2  ;;  %v607_v14 = vrot.slane %v591_v25, 2  ;;  %v538_v48 = vsel %vm530_vm15, %v529_v31, %v515_v13  ;;  %v531_v23 = vsel %vm530_vm15, %v527_v43, %v529_v31 }
  0xf5   : >> { %v578_v46 = vrot.slane %v538_v48, 6  ;;  %v532_v39 = vsel %vm530_vm15, %v525_v35, %v527_v43  ;;  %v577_v36 = vrot.slane %v531_v23, 6  ;;  %vm843_vm15 = vcmp.lt.s32.totalorder %v4281_v29, 2 }
  0xf6   : >> { %v622_v49 = vadd.f32 %v606_v47, %v4336_v24  ;;  %v623_v15 = vadd.f32 %v607_v14, %v4348_v30  ;;  %v576_v50 = vrot.slane %v532_v39, 6 }
  0xf7   : >> { %v594_v45 = vsel %vm5976_vm0, %v554_v8, %v578_v46  ;;  %v593_v13 = vsel %vm5978_vm14, %v553_v38, %v577_v36  ;;  %v630_v9 = vpop.permute.xlu1 %629  ;;  %v628_v37 = vpop.permute.xlu0 %627  ;;  %vm868_vm0 = vcmp.lt.s32.totalorder %v4281_v29, 98  ;;  %vm762_vm14 = vcmp.lt.s32.totalorder %v4281_v29, 30 }
  0xf8   : >> { %v610_v12 = vrot.slane %v594_v45, 2  ;;  %v592_v35 = vsel %vm5980_vm2, %v552_v33, %v576_v50  ;;  %v609_v32 = vrot.slane %v593_v13, 2  ;;  %v650_v44 = vsel %vm643_vm1, %v628_v37, %v630_v9 }
  0xf9   : >> { %v608_v24 = vrot.slane %v592_v35, 2  ;;  %vm668_vm2 = vcmp.lt.s32.totalorder %v4281_v29, 96 }
  0xfa   : >> { %v626_v30 = vadd.f32 %v610_v12, %v4372_v11  ;;  %v625_v25 = vadd.f32 %v609_v32, %v4368_v26 }
  0xfb   : >> { %v624_v31 = vadd.f32 %v608_v24, %v4352_v10  ;;  %v634_v43 = vpop.permute.xlu1 %633  ;;  %v632_v47 = vpop.permute.xlu0 %631 }
  0xfc   : >> { %v648_v38 = vsel %vm643_vm1, %v632_v47, %v634_v43  ;;  %v649_v14 = vsel %vm643_vm1, %v630_v9, %v632_v47 }
  0xff   : >> { %v638_v48 = vpop.permute.xlu1 %637  ;;  %v636_v23 = vpop.permute.xlu0 %635 }
 0x100   : >> { %v646_v8 = vsel %vm643_vm1, %v636_v23, %v638_v48  ;;  %v647_v11 = vsel %vm643_vm1, %v634_v43, %v636_v23 }
 0x103   : >> { %v642_v46 = vpop.permute.xlu1 %641  ;;  %v640_v26 = vpop.permute.xlu0 %639 }
 0x104   : >> { %v651_v10 = vsel %vm643_vm1, %v642_v46, %v628_v37  ;;  %v644_v39 = vsel %vm643_vm1, %v640_v26, %v642_v46  ;;  %v645_v36 = vsel %vm643_vm1, %v638_v48, %v640_v26  ;;  %vm737_vm1 = vcmp.lt.s32.totalorder %v4281_v29, 126 }
 0x107   : >> { %v655_v33 = vpop.permute.xlu1 %654  ;;  %v653_v50 = vpop.permute.xlu0 %652 }
 0x108   : >> { %v675_v45 = vsel %vm668_vm2, %v653_v50, %v655_v33 }
 0x109   : >> { %v677_v13 = vadd.f32 %v675_v45, %v651_v10 }
 0x10b   : >> { %v685_v9 = vadd.f32 %v677_v13, %v4422_v34  ;;  %v659_v12 = vpop.permute.xlu1 %658  ;;  %v657_v35 = vpop.permute.xlu0 %656 }
 0x10c   : >> { %v673_v37 = vsel %vm668_vm2, %v657_v35, %v659_v12  ;;  %v674_v32 = vsel %vm668_vm2, %v655_v33, %v657_v35 }
 0x10d   : >> { %v678_v24 = vadd.f32 %v674_v32, %v650_v44  ;;  %v679_v43 = vadd.f32 %v673_v37, %v649_v14  ;;  %v4489_v10 = vmul.f32 1.3333334, %v685_v9 }
 0x10f   : >> { %v686_v47 = vadd.f32 %v678_v24, %v620_v7  ;;  %v687_v48 = vadd.f32 %v679_v43, %v621_v27  ;;  %v663_v23 = vpop.permute.xlu1 %662  ;;  %v661_v46 = vpop.permute.xlu0 %660 }
 0x110   : >> { %v671_v26 = vsel %vm668_vm2, %v661_v46, %v663_v23  ;;  %v672_v34 = vsel %vm668_vm2, %v659_v12, %v661_v46 }
 0x111   : >> { %v4491_v45 = vmul.f32 1.3333334, %v686_v47  ;;  %v680_v13 = vadd.f32 %v672_v34, %v648_v38  ;;  %v681_v0 = vadd.f32 %v671_v26, %v647_v11  ;;  %v4501_v12 = vmul.f32 1.3333334, %v687_v48 }
 0x113   : >> { %v688_v14 = vadd.f32 %v680_v13, %v622_v49  ;;  %v689_v7 = vadd.f32 %v681_v0, %v623_v15  ;;  %v667_v27 = vpop.permute.xlu1 %666  ;;  %v665_v33 = vpop.permute.xlu0 %664 }
 0x114   : >> { %v676_v35 = vsel %vm668_vm2, %v667_v27, %v653_v50  ;;  %v669_v37 = vsel %vm668_vm2, %v665_v33, %v667_v27  ;;  %v670_v9 = vsel %vm668_vm2, %v663_v23, %v665_v33  ;;  %vm5988_vm2 = vcmp.ne.f32.partialorder %v5987_v52, 0.0 }
 0x115   : >> { %v4503_v38 = vmul.f32 1.3333334, %v688_v14  ;;  %v684_v11 = vadd.f32 %v676_v35, %v644_v39  ;;  %v682_v49 = vadd.f32 %v670_v9, %v646_v8  ;;  %v683_v0 = vadd.f32 %v669_v37, %v645_v36 }
 0x116   : >> { %v4517_v39 = vmul.f32 1.3333334, %v689_v7 }
 0x117   : >> { %v692_v32 = vadd.f32 %v684_v11, %v626_v30  ;;  %v724_v50 = vpop.permute.xlu1 %723  ;;  %v4508_v24 = vpop.permute.xlu0 %721  ;;  %v690_v43 = vadd.f32 %v682_v49, %v624_v31  ;;  %v691_v47 = vadd.f32 %v683_v0, %v625_v25 }
 0x118   : >> { %v4513_v48 = vsel %vm737_vm1, %v4508_v24, %v724_v50  ;;  %5982 = vst [vmem:[#allocation81_spill] sm:$0xff] %v4517_v39 }
 0x119   : >> { %v4515_v23 = vmul.f32 1.3333334, %v692_v32  ;;  %v4519_v8 = vmul.f32 1.3333334, %v690_v43  ;;  %v4521_v36 = vmul.f32 1.3333334, %v691_v47 }
 0x11b   : >> { %5981 = vst [vmem:[#allocation80_spill] sm:$0xff] %v4515_v23  ;;  %5983 = vst [vmem:[#allocation82_spill] sm:$0xff] %v4519_v8  ;;  %v828_v46 = vpop.permute.xlu1 %827  ;;  %v726_v30 = vpop.permute.xlu0 %725 }
 0x11c   : >> { %5984 = vst [vmem:[#allocation83_spill] sm:$0xff] %v4521_v36  ;;  %v743_v31 = vsel %vm737_vm1, %v724_v50, %v726_v30 }
 0x11f   : >> { %v832_v34 = vpop.permute.xlu1 %831  ;;  %v830_v13 = vpop.permute.xlu0 %829 }
 0x120   : >> { %v849_v14 = vsel %vm843_vm15, %v830_v13, %v832_v34  ;;  %v850_v7 = vsel %vm843_vm15, %v828_v46, %v830_v13 }
 0x121   : >> { %v886_v61 = vrot.slane %v850_v7, 2  ;;  %v887_v23 = vrot.slane %v849_v14, 2 }
 0x123   : >> { %v836_v27 = vpop.permute.xlu1 %835  ;;  %v834_v33 = vpop.permute.xlu0 %833 }
 0x127   : >> { %v840_v35 = vpop.permute.xlu1 %839  ;;  %v838_v37 = vpop.permute.xlu0 %837 }
 0x12b   : >> { %v853_v9 = vpop.permute.xlu1 %852  ;;  %v842_v11 = vpop.permute.xlu0 %841 }
 0x12f   : >> { %v857_v49 = vpop.permute.xlu1 %856  ;;  %v855_v0 = vpop.permute.xlu0 %854 }
 0x130   : >> { %v874_v15 = vsel %vm868_vm0, %v855_v0, %v857_v49  ;;  %v875_v42 = vsel %vm868_vm0, %v853_v9, %v855_v0 }
 0x131   : >> { %v910_v1 = vrot.slane %v874_v15, 2  ;;  %v780_v15 = vrot.slane %v743_v31, 4  ;;  %v909_v14 = vrot.slane %v875_v42, 2  ;;  %v847_v42 = vsel %vm843_vm15, %v834_v33, %v836_v27 }
 0x133   : >> { %v861_v32 = vpop.permute.xlu1 %860  ;;  %v859_v50 = vpop.permute.xlu0 %858  ;;  %v926_v62 = vsel %vm396_vm10, %v886_v61, %v910_v1 }
 0x134   : >> { %v873_v60 = vsel %vm868_vm0, %v857_v49, %v859_v50  ;;  %v942_v8 = vrot.slane %v926_v62, 2 }
 0x135   : >> { %v911_v63 = vrot.slane %v873_v60, 2 }
 0x137   : >> { %v865_v43 = vpop.permute.xlu1 %864  ;;  %v863_v47 = vpop.permute.xlu0 %862  ;;  %v927_v7 = vsel %vm397_vm9, %v887_v23, %v911_v63  ;;  %v851_v63 = vsel %vm843_vm15, %v842_v11, %v828_v46 }
 0x138   : >> { %v943_v23 = vrot.slane %v927_v7, 2  ;;  %v871_v46 = vsel %vm868_vm0, %v861_v32, %v863_v47 }
 0x13b   : >> { %v4534_v25 = vpop.permute.xlu1 %727  ;;  %v867_v26 = vpop.permute.xlu0 %866 }
 0x13c   : >> { %v742_v49 = vsel %vm737_vm1, %v726_v30, %v4534_v25  ;;  %v4568_v30 = vmul.f32 -5.0, %v4197_v16  ;;  %v869_v7 = vsel %vm868_vm0, %v865_v43, %v867_v26 }
 0x13d   : >> { %v781_v62 = vrot.slane %v742_v49, 4  ;;  %v870_v49 = vsel %vm868_vm0, %v863_v47, %v865_v43  ;;  %v844_v43 = vsel %vm843_vm15, %v840_v35, %v842_v11  ;;  %v4607_v11 = vmul.f32 -5.0, %v4209_v28 }
 0x13e   : >> { %v914_v40 = vrot.slane %v870_v49, 2 }
 0x13f   : >> { %v4537_v44 = vpop.permute.xlu1 %731  ;;  %v4539_v13 = vpop.permute.xlu0 %729 }
 0x143   : >> { %v4543_v2 = vpop.permute.xlu1 %735  ;;  %v4545_v59 = vpop.permute.xlu0 %733 }
 0x147   : >> { %v749_v6 = vpop.permute.xlu1 %748  ;;  %v747_v5 = vpop.permute.xlu0 %746 }
 0x148   : >> { %v769_v4 = vsel %vm762_vm14, %v747_v5, %v749_v6 }
 0x149   : >> { %v804_v36 = vrot.slane %v769_v4, 4 }
 0x14b   : >> { %v820_v61 = vsel %vm5988_vm2, %v780_v15, %v804_v36  ;;  %v753_v60 = vpop.permute.xlu1 %752  ;;  %v751_v1 = vpop.permute.xlu0 %750  ;;  %v4573_v36 = vmul.f32 -5.0, %v4195_v41  ;;  %vm5990_vm2 = vcmp.ne.f32.partialorder %v5989_v53, 0.0 }
 0x14c   : >> { %v4563_v39 = vadd.f32 %v942_v8, %v820_v61  ;;  %v768_v4 = vsel %vm762_vm14, %v749_v6, %v751_v1  ;;  %v872_v8 = vsel %vm868_vm0, %v859_v50, %v861_v32  ;;  %v848_v50 = vsel %vm843_vm15, %v832_v34, %v834_v33 }
 0x14d   : >> { %v805_v31 = vrot.slane %v768_v4, 4  ;;  %v885_v4 = vrot.slane %v851_v63, 2  ;;  %v846_v32 = vsel %vm843_vm15, %v836_v27, %v838_v37  ;;  %v912_v47 = vrot.slane %v872_v8, 2 }
 0x14e   : >> { %v915_v34 = vrot.slane %v869_v7, 2  ;;  %v889_v27 = vrot.slane %v847_v42, 2 }
 0x14f   : >> { %v821_v0 = vsel %vm5990_vm2, %v781_v62, %v805_v31  ;;  %v4579_v6 = vpop.permute.xlu1 %756  ;;  %v755_v15 = vpop.permute.xlu0 %754  ;;  %v876_v62 = vsel %vm868_vm0, %v867_v26, %v853_v9  ;;  %v845_v31 = vsel %vm843_vm15, %v838_v37, %v840_v35  ;;  %v779_v26 = vrot.slane %v4513_v48, 4 }
 0x150   : >> { %v4587_v61 = vadd.f32 %v943_v23, %v821_v0  ;;  %v925_v23 = vsel %vm395_vm8, %v885_v4, %v909_v14  ;;  %v913_v0 = vrot.slane %v871_v46, 2  ;;  %v888_v9 = vrot.slane %v848_v50, 2 }
 0x151   : >> { %v916_v52 = vrot.slane %v876_v62, 2  ;;  %v890_v37 = vrot.slane %v846_v32, 2  ;;  %v891_v41 = vrot.slane %v845_v31, 2  ;;  %v892_v14 = vrot.slane %v844_v43, 2 }
 0x152   : >> { %v941_v8 = vrot.slane %v925_v23, 2  ;;  %v928_v49 = vsel %vm398_vm11, %v888_v9, %v912_v47  ;;  %v929_v48 = vsel %vm399_vm12, %v889_v27, %v913_v0  ;;  %vm5996_vm15 = vcmp.ne.f32.partialorder %v5995_v18, 0.0 }
 0x153   : >> { %v761_v33 = vpop.permute.xlu1 %760  ;;  %v759_v63 = vpop.permute.xlu0 %758  ;;  %v930_v46 = vsel %vm400_vm13, %v890_v37, %v914_v40  ;;  %vm5998_vm0 = vcmp.ne.f32.partialorder %v5997_v51, 0.0  ;;  %vm6000_vm2 = vcmp.ne.f32.partialorder %v5999_v17, 0.0  ;;  %v767_v4 = vsel %vm762_vm14, %v751_v1, %v753_v60 }
 0x154   : >> { %v770_v53 = vsel %vm762_vm14, %v761_v33, %v747_v5  ;;  %v4617_v5 = vsel %vm5996_vm15, %v891_v41, %v915_v34  ;;  %v4623_v50 = vsel %vm6000_vm2, %v892_v14, %v916_v52  ;;  %v766_v62 = vsel %vm762_vm14, %v753_v60, %v755_v15 }
 0x155   : >> { %v803_v35 = vrot.slane %v770_v53, 4  ;;  %v944_v31 = vrot.slane %v928_v49, 2  ;;  %v741_v41 = vsel %vm737_vm1, %v4534_v25, %v4539_v13  ;;  %v765_v32 = vsel %vm762_vm14, %v755_v15, %v4579_v6 }
 0x156   : >> { %vm981_vm15 = vcmp.lt.s32.totalorder %v4281_v29, 64  ;;  %v945_v52 = vrot.slane %v929_v48, 2  ;;  %v946_v43 = vrot.slane %v930_v46, 2  ;;  %v947_v1 = vrot.slane %v4617_v5, 2 }
 0x157   : >> { %v819_v53 = vsel %vm5998_vm0, %v779_v26, %v803_v35  ;;  %v968_v7 = vpop.permute.xlu1 %967  ;;  %v966_v42 = vpop.permute.xlu0 %965  ;;  %v740_v60 = vsel %vm737_vm1, %v4539_v13, %v4537_v44  ;;  %v948_v47 = vrot.slane %v4623_v50, 2  ;;  %v739_v25 = vsel %vm737_vm1, %v4537_v44, %v4545_v59 }
 0x158   : >> { %v4629_v40 = vadd.f32 %v941_v8, %v819_v53  ;;  %v806_v23 = vrot.slane %v767_v4, 4  ;;  %v807_v15 = vrot.slane %v766_v62, 4  ;;  %v782_v26 = vrot.slane %v741_v41, 4 }
 0x159   : >> { %v808_v9 = vrot.slane %v765_v32, 4  ;;  %v783_v13 = vrot.slane %v740_v60, 4  ;;  %v763_v35 = vsel %vm762_vm14, %v759_v63, %v761_v33  ;;  %v988_v14 = vsel %vm981_vm15, %v966_v42, %v968_v7 }
 0x15a   : >> { %v745_v8 = vsel %vm737_vm1, %v4543_v2, %v4508_v24  ;;  %v784_v49 = vrot.slane %v739_v25, 4  ;;  %v764_v48 = vsel %vm762_vm14, %v4579_v6, %v759_v63  ;;  %v738_v33 = vsel %vm737_vm1, %v4545_v59, %v4543_v2 }
 0x15b   : >> { %v972_v0 = vpop.permute.xlu1 %971  ;;  %v970_v34 = vpop.permute.xlu0 %969  ;;  %vm6002_vm0 = vcmp.ne.f32.partialorder %v6001_v54, 0.0  ;;  %vm6004_vm2 = vcmp.ne.f32.partialorder %v6003_v55, 0.0  ;;  %v810_v62 = vrot.slane %v763_v35, 4  ;;  %v786_v59 = vrot.slane %v745_v8, 4 }
 0x15c   : >> { %v986_v27 = vsel %vm981_vm15, %v970_v34, %v972_v0  ;;  %v987_v37 = vsel %vm981_vm15, %v968_v7, %v970_v34  ;;  %v822_v5 = vsel %vm6002_vm0, %v782_v26, %v806_v23  ;;  %v823_v53 = vsel %vm6004_vm2, %v783_v13, %v807_v15 }
 0x15d   : >> { %v992_v44 = vadd.f32 %v987_v37, %v986_v27  ;;  %v991_v46 = vadd.f32 %v988_v14, %v987_v37  ;;  %v824_v4 = vsel %vm6006_vm3, %v784_v49, %v808_v9  ;;  %v809_v2 = vrot.slane %v764_v48, 4 }
 0x15e   : >> { %v785_v60 = vrot.slane %v738_v33, 4  ;;  %v960_v25 = vadd.f32 %v944_v31, %v822_v5  ;;  %v961_v34 = vadd.f32 %v945_v52, %v823_v53  ;;  %v962_v26 = vadd.f32 %v946_v43, %v824_v4 }
 0x15f   : >> { %v1008_v7 = vrot.slane %v992_v44, 4  ;;  %v976_v50 = vpop.permute.xlu1 %975  ;;  %v974_v24 = vpop.permute.xlu0 %973  ;;  %v1007_v23 = vrot.slane %v991_v46, 4  ;;  %vm6008_vm3 = vcmp.ne.f32.partialorder %v6007_v58, 0.0  ;;  %vm6010_vm1 = vcmp.ne.f32.partialorder %v6009_v57, 0.0 }
 0x160   : >> { %v984_v6 = vsel %vm981_vm15, %v974_v24, %v976_v50  ;;  %v985_v63 = vsel %vm981_vm15, %v972_v0, %v974_v24  ;;  %v826_v44 = vsel %vm6008_vm3, %v786_v59, %v810_v62  ;;  %v416_v59 = vmul.f32 -5.0, %v4217_v22 }
 0x161   : >> { %v993_v41 = vadd.f32 %v986_v27, %v985_v63  ;;  %v994_v32 = vadd.f32 %v985_v63, %v984_v6  ;;  %v1024_v15 = vadd.f32 %v1008_v7, %v4587_v61  ;;  %v825_v61 = vsel %vm6010_vm1, %v785_v60, %v809_v2 }
 0x162   : >> { %v1023_v49 = vadd.f32 %v1007_v23, %v4563_v39  ;;  %v963_v24 = vadd.f32 %v947_v1, %v825_v61  ;;  %v964_v4 = vadd.f32 %v948_v47, %v826_v44  ;;  %v6012_v23 = vcombine.low %v4489_v10, %v4491_v45  ;;  %v6018_v44 = vld [vmem:[#allocation80_spill] sm:$0xff] }
 0x163   : >> { %v1009_v37 = vrot.slane %v993_v41, 4  ;;  %v1010_v9 = vrot.slane %v994_v32, 4  ;;  %v980_v13 = vpop.permute.xlu1 %979  ;;  %v978_v35 = vpop.permute.xlu0 %977  ;;  %v1032_v48 = vmul.f32 -0.083333336, %v1024_v15 }
 0x164   : >> { %v989_v0 = vsel %vm981_vm15, %v980_v13, %v966_v42  ;;  %v982_v27 = vsel %vm981_vm15, %v978_v35, %v980_v13  ;;  %v983_v31 = vsel %vm981_vm15, %v976_v50, %v978_v35  ;;  %v6011_v50 = vcombine.low %v4501_v12, %v4503_v38  ;;  %v6017_v35 = vld [vmem:[#allocation83_spill] sm:$0xff] }
 0x165   : >> { %v1025_v52 = vadd.f32 %v1009_v37, %v960_v25  ;;  %v990_v43 = vadd.f32 %v989_v0, %v988_v14  ;;  %v995_v8 = vadd.f32 %v984_v6, %v983_v31  ;;  %v996_v46 = vadd.f32 %v983_v31, %v982_v27 }
 0x166   : >> { %v997_v33 = vadd.f32 %v989_v0, %v982_v27  ;;  %v1026_v5 = vadd.f32 %v1010_v9, %v961_v34  ;;  %v718_v63 = vadd.f32 %v6011_v50, %v4573_v36  ;;  %v1031_v2 = vmul.f32 -0.083333336, %v1023_v49  ;;  %v6013_v36 = vld [vmem:[#allocation81_spill] sm:$0xff] }
 0x167   : >> { %v1033_v53 = vmul.f32 -0.083333336, %v1025_v52  ;;  %v1006_v42 = vrot.slane %v990_v43, 4  ;;  %v1011_v7 = vrot.slane %v995_v8, 4  ;;  %v1012_v62 = vrot.slane %v996_v46, 4 }
 0x168   : >> { %v1013_v29 = vrot.slane %v997_v33, 4  ;;  %v1034_v60 = vmul.f32 -0.083333336, %v1026_v5  ;;  %v717_v15 = vadd.f32 %v6012_v23, %v4568_v30  ;;  %v6019_v0 = vcombine.low %v6017_v35, %v6018_v44 }
 0x169   : >> { %v1047_v14 = vcombine.high %v1032_v48, %v1033_v53  ;;  %v1022_v6 = vadd.f32 %v1006_v42, %v4629_v40  ;;  %v1027_v39 = vadd.f32 %v1011_v7, %v962_v26  ;;  %v1028_v41 = vadd.f32 %v1012_v62, %v963_v24  ;;  %v6014_v40 = vld [vmem:[#allocation82_spill] sm:$0xff] }
 0x16a   : >> { %v1029_v32 = vadd.f32 %v1013_v29, %v964_v4  ;;  %v6015_v34 = vcombine.low %v6013_v36, %v6014_v40  ;;  %v720_v27 = vadd.f32 %v6019_v0, %v416_v59 }
 0x16b   : >> { %v1055_v25 = vadd.f32 %v1047_v14, %v718_v63  ;;  %v1030_v1 = vmul.f32 -0.083333336, %v1022_v6  ;;  %v1035_v47 = vmul.f32 -0.083333336, %v1027_v39  ;;  %v1036_v12 = vmul.f32 -0.083333336, %v1028_v41 }
 0x16c   : >> { %v1037_v38 = vmul.f32 -0.083333336, %v1029_v32  ;;  %v719_v26 = vadd.f32 %v6015_v34, %v4607_v11 }
 0x16d   : >> { %v4704_v37 = vmul.f32 10000.0, %v1055_v25  ;;  %v1046_v9 = vcombine.high %v1030_v1, %v1031_v2  ;;  %v1048_v13 = vcombine.high %v1034_v60, %v1035_v47 }
 0x16e   : >> { %v1049_v31 = vcombine.high %v1036_v12, %v1037_v38 }
 0x16f   : >> { %6016 = vst [vmem:[#allocation81_spill] sm:$0xff] %v4704_v37  ;;  %v1054_v61 = vadd.f32 %v1046_v9, %v717_v15  ;;  %v1056_v52 = vadd.f32 %v1048_v13, %v719_v26 }
 0x170   : >> { %v1057_v10 = vadd.f32 %v1049_v31, %v720_v27 }
 0x171   : >> { %v4709_v45 = vmul.f32 10000.0, %v1054_v61  ;;  %v4711_v30 = vmul.f32 10000.0, %v1056_v52 }
 0x172   : >> { %v4713_v43 = vmul.f32 10000.0, %v1057_v10 }
 0x173   : >> { %6020 = vst [vmem:[#allocation82_spill] sm:$0xff] %v4709_v45  ;;  %6021 = vst [vmem:[#allocation83_spill] sm:$0xff] %v4711_v30 }
 0x174   : >> { %6022 = vst [vmem:[#allocation80_spill] sm:$0xff] %v4713_v43 }
 0x175 LB: >>> { %vm1166_vm14 = vcmask 23552   ;;  %v5855_v11 = vmov 0.0   ;;  %v6023_v8 = vld [vmem:[#allocation5_spill] sm:$0xff]  ;;  %v6024_v48 = vld [vmem:[#allocation6_spill] sm:$0xff]  ;;  %v6025_v33 = vld [vmem:[#allocation7_spill] sm:$0xff]  ;;  %s3493_s24 = sshll.u32 %s3679_s23, 8  ;;  %s3679_s23 = sphi %s4715_s23, %s1067_s23  }
 0x176   : >>> { %1292 = vmatprep.mubr.f32.mxu0 %v5855_v11  ;;  %v1168_v49 = vsel %vm1166_vm14, %v6023_v8, 0  ;;  %v1171_v46 = vsel %vm1166_vm14, %v6024_v48, 0  ;;  %1565 = vmatprep.mubr.f32.mxu1 %v5855_v11  ;;  %v1174_v5 = vsel %vm1166_vm14, %v6025_v33, 0  ;;  %v6026_v24 = vld [vmem:[#allocation8_spill] sm:$0xff]  ;;  %v3693_v62 = vmov 0   ;;  %s4737_s11 = sshra.s32 %s3493_s24, 7 }
 0x177   : >>> { %v4729_v53 = vand.u32 4294901760, %v1168_v49  ;;  %v4731_v42 = vand.u32 4294901760, %v1171_v46  ;;  %v4733_v7 = vand.u32 4294901760, %v1174_v5  ;;  %v1177_v4 = vsel %vm1166_vm14, %v6026_v24, 0  ;;  %3601 = vset.pattern.permute.xlu0 %v3693_v62  ;;  %3602 = vset.pattern.permute.xlu1 %v3693_v62  ;;  %v6027_v29 = vld [vmem:[#allocation28_spill] sm:$0xff]  ;;  %v6028_v50 = vld [vmem:[#allocation27_spill] sm:$0xff] }
 0x178   : >>> { %1101 = vperm.xlu0 %3601, %v6027_v29   ;;  %1096 = vperm.xlu1 %3602, %v6028_v50   ;;  %s3494_s13 = sshll.u32 %s4737_s11, 2  ;;  %vm1221_vm15 = vcmask 1042432   ;;  %v4751_v39 = vand.u32 4294901760, %v1177_v4  ;;  %v6029_v32 = vld [vmem:[#allocation9_spill] sm:$0xff]  ;;  %v6030_v47 = vld [vmem:[#allocation34_spill] sm:$0xff]  ;;  %v6033_v27 = vld [vmem:[#allocation40_spill] sm:$0xff] }
 0x179   : >>> { %v4743_v63 = vsub.f32 %v1168_v49, %v4729_v53  ;;  %v4746_v14 = vsub.f32 %v1171_v46, %v4731_v42  ;;  %v4749_v6 = vsub.f32 %v1174_v5, %v4733_v7  ;;  %s1072_s14 = scalar_lea.vmem [#allocation2], %s3494_s13  ;;  %v1180_v60 = vsel %vm1166_vm14, %v6029_v32, 0  ;;  %v6031_v23 = vld [vmem:[#allocation33_spill] sm:$0xff]  ;;  %v6032_v38 = vld [vmem:[#allocation10_spill] sm:$0xff]  ;;  %v6035_v48 = vld [vmem:[#allocation11_spill] sm:$0xff]  ;;  %s3157_s15 = scalar_lea.vmem [#allocation3], %s3494_s13 }
 0x17a   : >>> { %v1073_v59 = vld [vmem:[%s1072_s14] sm:$0x77]  ;;  %v1183_v36 = vsel %vm1166_vm14, %v6032_v38, 0  ;;  %v4772_v26 = vsub.f32 %v1177_v4, %v4751_v39  ;;  %v4774_v9 = vand.u32 4294901760, %v1180_v60  ;;  %v6034_v31 = vld [vmem:[#allocation26_spill] sm:$0xff]  ;;  %v1186_v46 = vsel %vm1166_vm14, %v6035_v48, 0 }
 0x17b   : >>> { %v5848_v2 = vand.u32 4294901760, %v4743_v63  ;;  %v5846_v41 = vand.u32 4294901760, %v4746_v14  ;;  %v1165_v25 = vcombine.high %v1073_v59, %v1073_v59  ;;  %v1222_v1 = vsel %vm1221_vm15, %v1073_v59, 0  ;;  %v6036_v62 = vld [vmem:[#allocation32_spill] sm:$0xff]  ;;  %v6037_v50 = vld [vmem:[#allocation39_spill] sm:$0xff]  ;;  %v6041_v48 = vld [vmem:[#allocation13_spill] sm:$0xff] }
 0x17c   : >>> { %1131 = vperm.xlu0 %3601, %v6030_v47   ;;  %1126 = vperm.xlu1 %3602, %v6031_v23   ;;  %v4762_v15 = vand.u32 4294901760, %v1222_v1  ;;  %v5845_v34 = vand.u32 4294901760, %v4749_v6  ;;  %v5843_v10 = vand.u32 4294901760, %v4772_v26  ;;  %v4792_v8 = vsub.f32 %v1180_v60, %v4774_v9  ;;  %s1067_s23 = sadd.s32 1, %s3679_s23  }
 0x17d   : >>> { %v1296_v12 = vsub.f32 %v4743_v63, %v5848_v2  ;;  %v1224_v40 = vsel %vm1221_vm15, %v1165_v25, 0  ;;  %v1307_v44 = vsub.f32 %v4746_v14, %v5846_v41  ;;  %v4794_v49 = vand.u32 4294901760, %v1183_v36  ;;  %v6038_v25 = vld [vmem:[#allocation12_spill] sm:$0xff]  ;;  %p1064_p11 = scmp.ge.s32.totalorder %s1067_s23, 4  }
 0x17e   : >>> { %v4776_v13 = vand.u32 4294901760, %v1224_v40  ;;  %v4782_v0 = vsub.f32 %v1222_v1, %v4762_v15  ;;  %v1318_v4 = vsub.f32 %v4749_v6, %v5845_v34  ;;  %v4811_v60 = vand.u32 4294901760, %v1186_v46  ;;  %s3508_s17 = sshll.u32 (%p1064_p11), %s3675_s22, 5  ;;  %s408_s22 = sadd.s32 (%p1064_p11), 1, %s3675_s22  }
 0x17f   : >>> { %v1297_v35 = vand.u32 4294901760, %v1296_v12  ;;  %v1308_v33 = vand.u32 4294901760, %v1307_v44  ;;  %v4809_v32 = vsub.f32 %v1183_v36, %v4794_v49  ;;  %v1189_v1 = vsel %vm1166_vm14, %v6038_v25, 0  ;;  %v6040_v36 = vld [vmem:[#allocation31_spill] sm:$0xff]  ;;  %s3347_s18 = scalar_lea.vmem (%p1064_p11), %s3800_s10, %s3508_s17 [#allocation4]  ;;  %p405_p12 = scmp.ge.s32.totalorder (%p1064_p11), %s408_s22, 3  }
 0x180   : >>> { %1161 = vperm.xlu0 %3601, %v6033_v27   ;;  %1091 = vperm.xlu1 %3602, %v6034_v31   ;;  %v1522_v61 = vsub.f32 %v1224_v40, %v4776_v13  ;;  %v5850_v52 = vand.u32 4294901760, %v4782_v0  ;;  %v1319_v23 = vand.u32 4294901760, %v1318_v4  ;;  %v1329_v12 = vsub.f32 %v4772_v26, %v5843_v10  ;;  %v6039_v40 = vld [vmem:[#allocation25_spill] sm:$0xff]  ;;  %v6043_v4 = vld [vmem:[#allocation24_spill] sm:$0xff] }
 0x181   : >>> { %1257 = vmatprep.subr.mxu0 %v4776_v13  ;;  %v5842_v38 = vand.u32 4294901760, %v4792_v8  ;;  %v5841_v31 = vand.u32 4294901760, %v4809_v32  ;;  %vm2553_vm0 = vcmask 392192   ;;  %vm3316_vm2 = vcmask (%p1064_p11), 1041408  }
 0x182   : >>> { %1259 = vmatpush1.msra.mxu0 %v4762_v15  ;;  %v1523_v5 = vand.u32 4294901760, %v1522_v61  ;;  %v1530_v24 = vsub.f32 %v4782_v0, %v5850_v52  ;;  %v1330_v44 = vand.u32 4294901760, %v1329_v12 }
 0x183   : >>> { %1298 = vmatmul.mubr.f32.vlgmr.msra.gmra.mxu0 %v1297_v35  ;;  %1724 = vmatprep.subr.mxu0 %v1522_v61  ;;  %v4822_v35 = vand.u32 4294901760, %v1189_v1  ;;  %v1340_v27 = vsub.f32 %v4792_v8, %v5842_v38 }
 0x184   : >>> { %1303 = vmatprep.mubr.f32.mxu0 %v5855_v11  ;;  %1121 = vperm.xlu0 %3601, %v6036_v62   ;;  %v1524_v29 = vsub.f32 %v1522_v61, %v1523_v5  ;;  %v1531_v59 = vand.u32 4294901760, %v1530_v24  ;;  %v4830_v61 = vsub.f32 %v1186_v46, %v4811_v60  ;;  %v1351_v62 = vsub.f32 %v4809_v32, %v5841_v31 }
 0x185   : >>> { %1727 = vmatpush1.msra.mxu0 %v4782_v0  ;;  %1156 = vperm.xlu1 %3602, %v6037_v50   ;;  %v4839_v24 = vsub.f32 %v1189_v1, %v4822_v35  ;;  %v1341_v46 = vand.u32 4294901760, %v1340_v27  ;;  %v6045_v1 = vld [vmem:[#allocation30_spill] sm:$0xff] }
 0x186   : >>> { %2167 = vmatprep.subr.mxu0 %v1523_v5  ;;  %v1525_v47 = vand.u32 4294901760, %v1524_v29  ;;  %v6042_v5 = vld [vmem:[#allocation38_spill] sm:$0xff]  ;;  %v5839_v29 = vand.u32 4294901760, %v4830_v61  ;;  %v1352_v12 = vand.u32 4294901760, %v1351_v62 }
 0x187   : >>> { %1309 = vmatmul.mubr.f32.gmra.mxu0 %v1308_v33  ;;  %v1192_v33 = vsel %vm1166_vm14, %v6041_v48, 0  ;;  %v6048_v48 = vld [vmem:[#allocation23_spill] sm:$0xff] }
 0x188   : >>> { %1314 = vmatprep.mubr.f32.mxu0 %v5855_v11  ;;  %1086 = vperm.xlu0 %3601, %v6039_v40   ;;  %v4848_v50 = vand.u32 4294901760, %v1192_v33  ;;  %v1362_v40 = vsub.f32 %v4830_v61, %v5839_v29 }
 0x189   : >>> { %1526 = vmatprep.subr.mxu1 %v1525_v47  ;;  %1116 = vperm.xlu1 %3602, %v6040_v36   ;;  %v5838_v47 = vand.u32 4294901760, %v4839_v24 }
 0x18a   : >>> { %1532 = vmatpush1.msra.mxu1 %v1531_v59  ;;  %v6044_v59 = vld [vmem:[#allocation14_spill] sm:$0xff]  ;;  %v4863_v36 = vsub.f32 %v1192_v33, %v4848_v50  ;;  %v6050_v33 = vld [vmem:[#allocation29_spill] sm:$0xff]  ;;  %v1363_v62 = vand.u32 4294901760, %v1362_v40 }
 0x18b   : >>> { %1320 = vmatmul.mubr.f32.gmra.mxu0 %v1319_v23  ;;  %1567 = vmatmul.mubr.f32.vlgmr.msra.gmra.mxu1 %v4729_v53  ;;  %v1195_v25 = vsel %vm1166_vm14, %v6044_v59, 0  ;;  %v6046_v23 = vld [vmem:[#allocation37_spill] sm:$0xff] }
 0x18c   : >>> { %1325 = vmatprep.mubr.f32.mxu0 %v5855_v11  ;;  %1572 = vmatprep.mubr.f32.mxu1 %v5855_v11  ;;  %v5837_v59 = vand.u32 4294901760, %v4863_v36 }
 0x18d   : >>> { %1151 = vperm.xlu0 %3601, %v6042_v5   ;;  %1936 = vmatprep.subr.mxu1 %v4776_v13  ;;  %v1373_v5 = vsub.f32 %v4839_v24, %v5838_v47 }
 0x18e   : >>> { %1938 = vmatpush1.msra.mxu1 %v4762_v15  ;;  %1081 = vperm.xlu1 %3602, %v6043_v4   ;;  %v6049_v4 = vld [vmem:[#allocation16_spill] sm:$0xff] }
 0x18f   : >>> { %1331 = vmatmul.mubr.f32.gmra.mxu0 %v1330_v44  ;;  %1574 = vmatmul.mubr.f32.gmra.mxu1 %v4731_v42  ;;  %v4865_v44 = vand.u32 4294901760, %v1195_v25 }
 0x190   : >>> { %1336 = vmatprep.mubr.f32.mxu0 %v5855_v11  ;;  %1579 = vmatprep.mubr.f32.mxu1 %v5855_v11 }
 0x191   : >>> { %1111 = vperm.xlu0 %3601, %v6045_v1   ;;  %2362 = vmatprep.subr.mxu1 %v4776_v13  ;;  %v6047_v13 = vld [vmem:[#allocation15_spill] sm:$0xff]  ;;  %v4881_v1 = vsub.f32 %v1195_v25, %v4865_v44  ;;  %v1384_v25 = vsub.f32 %v4863_v36, %v5837_v59 }
 0x192   : >>> { %1146 = vperm.xlu1 %3602, %v6046_v23   ;;  %v1198_v27 = vsel %vm1166_vm14, %v6047_v13, 0  ;;  %v6051_v13 = vld [vmem:[#allocation36_spill] sm:$0xff] }
 0x193   : >>> { %1342 = vmatmul.mubr.f32.gmra.mxu0 %v1341_v46  ;;  %1581 = vmatmul.mubr.f32.gmra.mxu1 %v4733_v7  ;;  %v1201_v46 = vsel %vm1166_vm14, %v6049_v4, 0  ;;  %v4883_v23 = vand.u32 4294901760, %v1198_v27  ;;  %v6052_v4 = vld [vmem:[#allocation35_spill] sm:$0xff]  ;;  %v5840_v40 = vand.u32 4294901760, %v4881_v1  ;;  %v1385_v59 = vand.u32 4294901760, %v1384_v25 }
 0x194   : >>> { %1347 = vmatprep.mubr.f32.mxu0 %v5855_v11  ;;  %1586 = vmatprep.mubr.f32.mxu1 %v5855_v11 }
 0x195   : >>> { %1076 = vperm.xlu0 %3601, %v6048_v48   ;;  %v4888_v48 = vand.u32 4294901760, %v1201_v46 }
 0x196   : >>> { %1106 = vperm.xlu1 %3602, %v6050_v33   ;;  %v4897_v33 = vsub.f32 %v1198_v27, %v4883_v23  ;;  %v1395_v27 = vsub.f32 %v4881_v1, %v5840_v40 }
 0x197   : >>> { %1353 = vmatmul.mubr.f32.gmra.mxu0 %v1352_v12  ;;  %1588 = vmatmul.mubr.f32.gmra.mxu1 %v4751_v39  ;;  %v1374_v12 = vand.u32 4294901760, %v1373_v5  ;;  %v4905_v5 = vsub.f32 %v1201_v46, %v4888_v48 }
 0x198   : >>> { %1358 = vmatprep.mubr.f32.mxu0 %v5855_v11  ;;  %1593 = vmatprep.mubr.f32.mxu1 %v5855_v11  ;;  %v5844_v47 = vand.u32 4294901760, %v4897_v33  ;;  %v1396_v40 = vand.u32 4294901760, %v1395_v27 }
 0x199   : >>> { %1141 = vperm.xlu0 %3601, %v6051_v13   ;;  %v6053_v13 = vld [vmem:[#allocation17_spill] sm:$0xff] }
 0x19a   : >>> { %1136 = vperm.xlu1 %3602, %v6052_v4   ;;  %v1204_v4 = vsel %vm1166_vm14, %v6053_v13, 0  ;;  %v6055_v13 = vld [vmem:[#allocation18_spill] sm:$0xff]  ;;  %v1406_v31 = vsub.f32 %v4897_v33, %v5844_v47 }
 0x19b   : >>> { %1364 = vmatmul.mubr.f32.gmra.mxu0 %v1363_v62  ;;  %1595 = vmatmul.mubr.f32.gmra.mxu1 %v4774_v9  ;;  %v6054_v62 = vld [vmem:[#allocation42_spill] sm:$0xff]  ;;  %v4912_v29 = vand.u32 4294901760, %v1204_v4  ;;  %v1207_v46 = vsel %vm1166_vm14, %v6055_v13, 0 }
 0x19c   : >>> { %1369 = vmatprep.mubr.f32.mxu0 %v5855_v11  ;;  %1600 = vmatprep.mubr.f32.mxu1 %v5855_v11  ;;  %v4928_v10 = vand.u32 4294901760, %v1207_v46  ;;  %v1407_v27 = vand.u32 4294901760, %v1406_v31 }
 0x19d   : >>> { %2550 = vperm.xlu0 %3601, %v6054_v62   ;;  %v6056_v62 = vld [vmem:[#allocation19_spill] sm:$0xff]  ;;  %v4926_v38 = vsub.f32 %v1204_v4, %v4912_v29 }
 0x19e   : >>> { %v1210_v25 = vsel %vm1166_vm14, %v6056_v62, 0  ;;  %v6057_v62 = vld [vmem:[#allocation20_spill] sm:$0xff]  ;;  %v4942_v34 = vsub.f32 %v1207_v46, %v4928_v10  ;;  %v6058_v46 = vld [vmem:[#allocation21_spill] sm:$0xff] }
 0x19f   : >>> { %1375 = vmatmul.mubr.f32.gmra.mxu0 %v1374_v12  ;;  %1602 = vmatmul.mubr.f32.gmra.mxu1 %v4794_v49  ;;  %v5847_v12 = vand.u32 4294901760, %v4905_v5  ;;  %v4932_v13 = vand.u32 4294901760, %v1210_v25  ;;  %v5849_v47 = vand.u32 4294901760, %v4926_v38  ;;  %v1216_v2 = vsel %vm1166_vm14, %v6058_v46, 0  ;;  %v6059_v46 = vld [vmem:[#allocation22_spill] sm:$0xff] }
 0x1a0   : >>> { %1380 = vmatprep.mubr.f32.mxu0 %v5855_v11  ;;  %1607 = vmatprep.mubr.f32.mxu1 %v5855_v11  ;;  %v4968_v52 = vand.u32 4294901760, %v1216_v2 }
 0x1a1   : >>> { %v1417_v4 = vsub.f32 %v4905_v5, %v5847_v12  ;;  %v1428_v31 = vsub.f32 %v4926_v38, %v5849_v47  ;;  %v4954_v12 = vsub.f32 %v1210_v25, %v4932_v13 }
 0x1a2   : >>> { %v4980_v3 = vsub.f32 %v1216_v2, %v4968_v52 }
 0x1a3   : >>> { %1386 = vmatmul.mubr.f32.gmra.mxu0 %v1385_v59  ;;  %1609 = vmatmul.mubr.f32.gmra.mxu1 %v4811_v60  ;;  %v1213_v59 = vsel %vm1166_vm14, %v6057_v62, 0  ;;  %v5851_v62 = vand.u32 4294901760, %v4942_v34  ;;  %v5854_v25 = vand.u32 4294901760, %v4954_v12 }
 0x1a4   : >>> { %1391 = vmatprep.mubr.f32.mxu0 %v5855_v11  ;;  %1614 = vmatprep.mubr.f32.mxu1 %v5855_v11  ;;  %v4946_v41 = vand.u32 4294901760, %v1213_v59 }
 0x1a5   : >>> { %v1439_v47 = vsub.f32 %v4942_v34, %v5851_v62  ;;  %v1450_v62 = vsub.f32 %v4954_v12, %v5854_v25 }
 0x1a7   : >>> { %1397 = vmatmul.mubr.f32.gmra.mxu0 %v1396_v40  ;;  %1616 = vmatmul.mubr.f32.gmra.mxu1 %v4822_v35  ;;  %v1418_v40 = vand.u32 4294901760, %v1417_v4  ;;  %v1429_v4 = vand.u32 4294901760, %v1428_v31  ;;  %v1440_v31 = vand.u32 4294901760, %v1439_v47 }
 0x1a8   : >>> { %1402 = vmatprep.mubr.f32.mxu0 %v5855_v11  ;;  %1621 = vmatprep.mubr.f32.mxu1 %v5855_v11 }
 0x1ab   : >>> { %1408 = vmatmul.mubr.f32.gmra.mxu0 %v1407_v27  ;;  %1623 = vmatmul.mubr.f32.gmra.mxu1 %v4848_v50  ;;  %v4961_v27 = vsub.f32 %v1213_v59, %v4946_v41  ;;  %v1219_v59 = vsel %vm1166_vm14, %v6059_v46, 0  ;;  %v1471_v46 = vand.u32 4294901760, %v4980_v3 }
 0x1ac   : >>> { %1413 = vmatprep.mubr.f32.mxu0 %v5855_v11  ;;  %1628 = vmatprep.mubr.f32.mxu1 %v5855_v11  ;;  %v4982_v17 = vand.u32 4294901760, %v1219_v59 }
 0x1ae   : >>> { %v4992_v25 = vsub.f32 %v1219_v59, %v4982_v17 }
 0x1af   : >>> { %1419 = vmatmul.mubr.f32.gmra.mxu0 %v1418_v40  ;;  %1630 = vmatmul.mubr.f32.gmra.mxu1 %v4865_v44  ;;  %v1460_v40 = vand.u32 4294901760, %v4961_v27 }
 0x1b0   : >>> { %1424 = vmatprep.mubr.f32.mxu0 %v5855_v11  ;;  %1635 = vmatprep.mubr.f32.mxu1 %v5855_v11 }
 0x1b1   : >>> { %v1461_v47 = vsub.f32 %v4961_v27, %v1460_v40 }
 0x1b3   : >>> { %1430 = vmatmul.mubr.f32.gmra.mxu0 %v1429_v4  ;;  %1637 = vmatmul.mubr.f32.gmra.mxu1 %v4883_v23  ;;  %v1451_v4 = vand.u32 4294901760, %v1450_v62  ;;  %v1462_v2 = vand.u32 4294901760, %v1461_v47  ;;  %v1472_v62 = vsub.f32 %v4980_v3, %v1471_v46 }
 0x1b4   : >>> { %1435 = vmatprep.mubr.f32.mxu0 %v5855_v11  ;;  %1642 = vmatprep.mubr.f32.mxu1 %v5855_v11 }
 0x1b5   : >>> { %v1473_v59 = vand.u32 4294901760, %v1472_v62  ;;  %v6061_v62 = vand.u32 4294901760, %v4743_v63 }
 0x1b7   : >>> { %1441 = vmatmul.mubr.f32.gmra.mxu0 %v1440_v31  ;;  %1644 = vmatmul.mubr.f32.gmra.mxu1 %v4888_v48  ;;  %v1482_v31 = vand.u32 4294901760, %v4992_v25 }
 0x1b8   : >>> { %1446 = vmatprep.mubr.f32.mxu0 %v5855_v11  ;;  %1649 = vmatprep.mubr.f32.mxu1 %v5855_v11 }
 0x1bb   : >>> { %1452 = vmatmul.mubr.f32.gmra.mxu0 %v1451_v4  ;;  %1651 = vmatmul.mubr.f32.gmra.mxu1 %v4912_v29  ;;  %v1483_v4 = vsub.f32 %v4992_v25, %v1482_v31 }
 0x1bc   : >>> { %1457 = vmatprep.mubr.f32.mxu0 %v5855_v11  ;;  %1656 = vmatprep.mubr.f32.mxu1 %v5855_v11 }
 0x1bd   : >>> { %v1484_v47 = vand.u32 4294901760, %v1483_v4 }
 0x1bf   : >>> { %1463 = vmatmul.mubr.f32.gmra.mxu0 %v1462_v2  ;;  %1658 = vmatmul.mubr.f32.gmra.mxu1 %v4928_v10  ;;  %v6060_v2 = vand.u32 4294901760, %v4782_v0  ;;  %v6062_v0 = vand.u32 4294901760, %v4746_v14 }
 0x1c0   : >>> { %1468 = vmatprep.mubr.f32.mxu0 %v5855_v11  ;;  %1663 = vmatprep.mubr.f32.mxu1 %v5855_v11 }
 0x1c3   : >>> { %1474 = vmatmul.mubr.f32.gmra.mxu0 %v1473_v59  ;;  %1665 = vmatmul.mubr.f32.gmra.mxu1 %v4932_v13 }
 0x1c4   : >>> { %1479 = vmatprep.mubr.f32.mxu0 %v5855_v11  ;;  %1670 = vmatprep.mubr.f32.mxu1 %v5855_v11 }
 0x1c7   : >>> { %1485 = vmatmul.mubr.f32.gmra.mxu0 %v1484_v47  ;;  %1672 = vmatmul.mubr.f32.gmra.mxu1 %v4946_v41 }
 0x1c8   : >>> { %1677 = vmatprep.mubr.f32.mxu1 %v5855_v11  ;;  %1760 = vmatprep.mubr.f32.mxu0 %v5855_v11 }
 0x1cb   : >>> { %1679 = vmatmul.mubr.f32.gmra.mxu1 %v4968_v52  ;;  %1763 = vmatmul.mubr.f32.vlgmr.msra.gmra.mxu0 %v4743_v63  ;;  %v6063_v63 = vand.u32 4294901760, %v4749_v6 }
 0x1cc   : >>> { %1684 = vmatprep.mubr.f32.mxu1 %v5855_v11  ;;  %1768 = vmatprep.mubr.f32.mxu0 %v5855_v11 }
 0x1cd   : >>> { %2171 = vmatpush1.msra.mxu0 %v6060_v2 }
 0x1cf   : >>> { %1686 = vmatmul.mubr.f32.gmra.mxu1 %v4982_v17  ;;  %1771 = vmatmul.mubr.f32.gmra.mxu0 %v4746_v14  ;;  %v6065_v14 = vand.u32 4294901760, %v4792_v8 }
 0x1d0   : >>> { %1776 = vmatprep.mubr.f32.mxu0 %v5855_v11  ;;  %1971 = vmatprep.mubr.f32.mxu1 %v5855_v11 }
 0x1d3   : >>> { %1779 = vmatmul.mubr.f32.gmra.mxu0 %v4749_v6  ;;  %1975 = vmatmul.mubr.f32.vlgmr.msra.gmra.mxu1 %v6061_v62  ;;  %v6066_v6 = vand.u32 4294901760, %v4809_v32 }
 0x1d4   : >>> { %1784 = vmatprep.mubr.f32.mxu0 %v5855_v11  ;;  %1980 = vmatprep.mubr.f32.mxu1 %v5855_v11 }
 0x1d5   : >>> { %2364 = vmatpush1.msra.mxu1 %v4762_v15  ;;  %v6064_v15 = vand.u32 4294901760, %v4772_v26 }
 0x1d7   : >>> { %1787 = vmatmul.mubr.f32.gmra.mxu0 %v4772_v26  ;;  %1984 = vmatmul.mubr.f32.gmra.mxu1 %v6062_v0  ;;  %v6067_v26 = vand.u32 4294901760, %v4830_v61 }
 0x1d8   : >>> { %1792 = vmatprep.mubr.f32.mxu0 %v5855_v11  ;;  %1989 = vmatprep.mubr.f32.mxu1 %v5855_v11 }
 0x1db   : >>> { %1795 = vmatmul.mubr.f32.gmra.mxu0 %v4792_v8  ;;  %1993 = vmatmul.mubr.f32.gmra.mxu1 %v6063_v63  ;;  %v6068_v8 = vand.u32 4294901760, %v4839_v24 }
 0x1dc   : >>> { %1800 = vmatprep.mubr.f32.mxu0 %v5855_v11  ;;  %1998 = vmatprep.mubr.f32.mxu1 %v5855_v11 }
 0x1df   : >>> { %1803 = vmatmul.mubr.f32.gmra.mxu0 %v4809_v32  ;;  %2002 = vmatmul.mubr.f32.gmra.mxu1 %v6064_v15  ;;  %v6069_v32 = vand.u32 4294901760, %v4863_v36 }
 0x1e0   : >>> { %1808 = vmatprep.mubr.f32.mxu0 %v5855_v11  ;;  %2007 = vmatprep.mubr.f32.mxu1 %v5855_v11 }
 0x1e3   : >>> { %1811 = vmatmul.mubr.f32.gmra.mxu0 %v4830_v61  ;;  %2011 = vmatmul.mubr.f32.gmra.mxu1 %v6065_v14  ;;  %v6070_v61 = vand.u32 4294901760, %v4881_v1 }
 0x1e4   : >>> { %1816 = vmatprep.mubr.f32.mxu0 %v5855_v11  ;;  %2016 = vmatprep.mubr.f32.mxu1 %v5855_v11 }
 0x1e7   : >>> { %1819 = vmatmul.mubr.f32.gmra.mxu0 %v4839_v24  ;;  %2020 = vmatmul.mubr.f32.gmra.mxu1 %v6066_v6  ;;  %v6071_v24 = vand.u32 4294901760, %v4897_v33 }
 0x1e8   : >>> { %1824 = vmatprep.mubr.f32.mxu0 %v5855_v11  ;;  %2025 = vmatprep.mubr.f32.mxu1 %v5855_v11 }
 0x1eb   : >>> { %1827 = vmatmul.mubr.f32.gmra.mxu0 %v4863_v36  ;;  %2029 = vmatmul.mubr.f32.gmra.mxu1 %v6067_v26  ;;  %v6072_v36 = vand.u32 4294901760, %v4905_v5 }
 0x1ec   : >>> { %1832 = vmatprep.mubr.f32.mxu0 %v5855_v11  ;;  %2034 = vmatprep.mubr.f32.mxu1 %v5855_v11 }
 0x1ef   : >>> { %1835 = vmatmul.mubr.f32.gmra.mxu0 %v4881_v1  ;;  %2038 = vmatmul.mubr.f32.gmra.mxu1 %v6068_v8  ;;  %v6073_v1 = vand.u32 4294901760, %v4926_v38 }
 0x1f0   : >>> { %1840 = vmatprep.mubr.f32.mxu0 %v5855_v11  ;;  %2043 = vmatprep.mubr.f32.mxu1 %v5855_v11 }
 0x1f3   : >>> { %1843 = vmatmul.mubr.f32.gmra.mxu0 %v4897_v33  ;;  %2047 = vmatmul.mubr.f32.gmra.mxu1 %v6069_v32  ;;  %v6074_v33 = vand.u32 4294901760, %v4942_v34 }
 0x1f4   : >>> { %1848 = vmatprep.mubr.f32.mxu0 %v5855_v11  ;;  %2052 = vmatprep.mubr.f32.mxu1 %v5855_v11 }
 0x1f7   : >>> { %1851 = vmatmul.mubr.f32.gmra.mxu0 %v4905_v5  ;;  %2056 = vmatmul.mubr.f32.gmra.mxu1 %v6070_v61  ;;  %v6075_v5 = vand.u32 4294901760, %v4954_v12 }
 0x1f8   : >>> { %1856 = vmatprep.mubr.f32.mxu0 %v5855_v11  ;;  %2061 = vmatprep.mubr.f32.mxu1 %v5855_v11 }
 0x1fb   : >>> { %1859 = vmatmul.mubr.f32.gmra.mxu0 %v4926_v38  ;;  %2065 = vmatmul.mubr.f32.gmra.mxu1 %v6071_v24 }
 0x1fc   : >>> { %1864 = vmatprep.mubr.f32.mxu0 %v5855_v11  ;;  %2070 = vmatprep.mubr.f32.mxu1 %v5855_v11 }
 0x1ff   : >>> { %1867 = vmatmul.mubr.f32.gmra.mxu0 %v4942_v34  ;;  %2074 = vmatmul.mubr.f32.gmra.mxu1 %v6072_v36 }
 0x200   : >>> { %1872 = vmatprep.mubr.f32.mxu0 %v5855_v11  ;;  %2079 = vmatprep.mubr.f32.mxu1 %v5855_v11 }
 0x203   : >>> { %1875 = vmatmul.mubr.f32.gmra.mxu0 %v4954_v12  ;;  %2083 = vmatmul.mubr.f32.gmra.mxu1 %v6073_v1 }
 0x204   : >>> { %1880 = vmatprep.mubr.f32.mxu0 %v5855_v11  ;;  %2088 = vmatprep.mubr.f32.mxu1 %v5855_v11 }
 0x207   : >>> { %1883 = vmatmul.mubr.f32.gmra.mxu0 %v4961_v27  ;;  %2092 = vmatmul.mubr.f32.gmra.mxu1 %v6074_v33 }
 0x208   : >>> { %1888 = vmatprep.mubr.f32.mxu0 %v5855_v11  ;;  %2097 = vmatprep.mubr.f32.mxu1 %v5855_v11 }
 0x20b   : >>> { %1891 = vmatmul.mubr.f32.gmra.mxu0 %v4980_v3  ;;  %2101 = vmatmul.mubr.f32.gmra.mxu1 %v6075_v5  ;;  %v5118_v3 = vpop.permute.xlu0 %1101 }
 0x20c   : >>> { %1896 = vmatprep.mubr.f32.mxu0 %v5855_v11  ;;  %2106 = vmatprep.mubr.f32.mxu1 %v5855_v11 }
 0x20f   : >>> { %1899 = vmatmul.mubr.f32.gmra.mxu0 %v4992_v25  ;;  %2110 = vmatmul.mubr.f32.gmra.mxu1 %v1460_v40  ;;  %v5126_v34 = vpop.permute.xlu0 %1131 }
 0x210   : >>> { %2115 = vmatprep.mubr.f32.mxu1 %v5855_v11  ;;  %2204 = vmatprep.mubr.f32.mxu0 %v5855_v11 }
 0x213   : >>> { %2119 = vmatmul.mubr.f32.gmra.mxu1 %v1471_v46  ;;  %2206 = vmatmul.mubr.f32.vlgmr.msra.gmra.mxu0 %v4729_v53 }
 0x214   : >>> { %2124 = vmatprep.mubr.f32.mxu1 %v5855_v11  ;;  %2211 = vmatprep.mubr.f32.mxu0 %v5855_v11 }
 0x217   : >>> { %2128 = vmatmul.mubr.f32.gmra.mxu1 %v1482_v31  ;;  %2213 = vmatmul.mubr.f32.gmra.mxu0 %v4731_v42 }
 0x218   : >>> { %2218 = vmatprep.mubr.f32.mxu0 %v5855_v11  ;;  %2397 = vmatprep.mubr.f32.mxu1 %v5855_v11 }
 0x21b   : >>> { %2220 = vmatmul.mubr.f32.gmra.mxu0 %v4733_v7  ;;  %2399 = vmatmul.mubr.f32.vlgmr.msra.gmra.mxu1 %v4729_v53  ;;  %v5134_v53 = vpop.permute.xlu0 %1161 }
 0x21c   : >>> { %2225 = vmatprep.mubr.f32.mxu0 %v5855_v11  ;;  %2404 = vmatprep.mubr.f32.mxu1 %v5855_v11 }
 0x21f   : >>> { %2227 = vmatmul.mubr.f32.gmra.mxu0 %v4751_v39  ;;  %2406 = vmatmul.mubr.f32.gmra.mxu1 %v4731_v42  ;;  %v5140_v42 = vpop.permute.xlu1 %1096 }
 0x220   : >>> { %2232 = vmatprep.mubr.f32.mxu0 %v5855_v11  ;;  %2411 = vmatprep.mubr.f32.mxu1 %v5855_v11 }
 0x223   : >>> { %2234 = vmatmul.mubr.f32.gmra.mxu0 %v4774_v9  ;;  %2413 = vmatmul.mubr.f32.gmra.mxu1 %v4733_v7  ;;  %v5144_v7 = vpop.permute.xlu0 %1121 }
 0x224   : >>> { %2239 = vmatprep.mubr.f32.mxu0 %v5855_v11  ;;  %2418 = vmatprep.mubr.f32.mxu1 %v5855_v11 }
 0x227   : >>> { %2241 = vmatmul.mubr.f32.gmra.mxu0 %v4794_v49  ;;  %2420 = vmatmul.mubr.f32.gmra.mxu1 %v4751_v39  ;;  %v5150_v39 = vpop.permute.xlu1 %1126 }
 0x228   : >>> { %2246 = vmatprep.mubr.f32.mxu0 %v5855_v11  ;;  %2425 = vmatprep.mubr.f32.mxu1 %v5855_v11 }
 0x22b   : >>> { %2248 = vmatmul.mubr.f32.gmra.mxu0 %v4811_v60  ;;  %2427 = vmatmul.mubr.f32.gmra.mxu1 %v4774_v9  ;;  %v1087_v9 = vpop.permute.xlu0 %1086 }
 0x22c   : >>> { %2253 = vmatprep.mubr.f32.mxu0 %v5855_v11  ;;  %2432 = vmatprep.mubr.f32.mxu1 %v5855_v11 }
 0x22f   : >>> { %2255 = vmatmul.mubr.f32.gmra.mxu0 %v4822_v35  ;;  %2434 = vmatmul.mubr.f32.gmra.mxu1 %v4794_v49  ;;  %v5158_v49 = vpop.permute.xlu1 %1091  ;;  %v5162_v38 = vpop.permute.xlu0 %1151 }
 0x230   : >>> { %2260 = vmatprep.mubr.f32.mxu0 %v5855_v11  ;;  %2439 = vmatprep.mubr.f32.mxu1 %v5855_v11 }
 0x233   : >>> { %2262 = vmatmul.mubr.f32.gmra.mxu0 %v4848_v50  ;;  %2441 = vmatmul.mubr.f32.gmra.mxu1 %v4811_v60  ;;  %v5168_v60 = vpop.permute.xlu1 %1156 }
 0x234   : >>> { %2267 = vmatprep.mubr.f32.mxu0 %v5855_v11  ;;  %2446 = vmatprep.mubr.f32.mxu1 %v5855_v11 }
 0x237   : >>> { %2269 = vmatmul.mubr.f32.gmra.mxu0 %v4865_v44  ;;  %2448 = vmatmul.mubr.f32.gmra.mxu1 %v4822_v35  ;;  %v5172_v35 = vpop.permute.xlu0 %1111 }
 0x238   : >>> { %2274 = vmatprep.mubr.f32.mxu0 %v5855_v11  ;;  %2453 = vmatprep.mubr.f32.mxu1 %v5855_v11 }
 0x23b   : >>> { %2276 = vmatmul.mubr.f32.gmra.mxu0 %v4883_v23  ;;  %2455 = vmatmul.mubr.f32.gmra.mxu1 %v4848_v50  ;;  %v5178_v50 = vpop.permute.xlu1 %1116 }
 0x23c   : >>> { %2281 = vmatprep.mubr.f32.mxu0 %v5855_v11  ;;  %2460 = vmatprep.mubr.f32.mxu1 %v5855_v11 }
 0x23f   : >>> { %2283 = vmatmul.mubr.f32.gmra.mxu0 %v4888_v48  ;;  %2462 = vmatmul.mubr.f32.gmra.mxu1 %v4865_v44  ;;  %v5184_v44 = vpop.permute.xlu0 %1076  ;;  %v1082_v46 = vpop.permute.xlu1 %1081 }
 0x240   : >>> { %2288 = vmatprep.mubr.f32.mxu0 %v5855_v11  ;;  %2467 = vmatprep.mubr.f32.mxu1 %v5855_v11 }
 0x243   : >>> { %v1299_v12 = vpop.f32.mrf.mxu0  ;;  %2290 = vmatmul.mubr.f32.gmra.mxu0 %v4912_v29  ;;  %2469 = vmatmul.mubr.f32.gmra.mxu1 %v4883_v23  ;;  %v5216_v5 = vpop.permute.xlu1 %1146 }
 0x244   : >>> { %2295 = vmatprep.mubr.f32.mxu0 %v5855_v11  ;;  %2474 = vmatprep.mubr.f32.mxu1 %v5855_v11  ;;  %v1300_v40 = vadd.f32 %v1299_v12, %v5184_v44 }
 0x245   : >>> { %v5182_v27 = vpop.f32.mrf.mxu0 }
 0x247   : >>> { %v1310_v25 = vpop.f32.mrf.mxu0  ;;  %2297 = vmatmul.mubr.f32.gmra.mxu0 %v4928_v10  ;;  %2476 = vmatmul.mubr.f32.gmra.mxu1 %v4888_v48 }
 0x248   : >>> { %2302 = vmatprep.mubr.f32.mxu0 %v5855_v11  ;;  %2481 = vmatprep.mubr.f32.mxu1 %v5855_v11  ;;  %v1311_v47 = vadd.f32 %v1310_v25, %v1082_v46 }
 0x249   : >>> { %v1312_v23 = vpop.f32.mrf.mxu0 }
 0x24a   : >>> { %v1313_v15 = vadd.f32 %v1312_v23, %v1082_v46 }
 0x24b   : >>> { %v1321_v31 = vpop.f32.mrf.mxu0  ;;  %v1568_v59 = vpop.f32.mrf.mxu1  ;;  %2304 = vmatmul.mubr.f32.gmra.mxu0 %v4932_v13  ;;  %2483 = vmatmul.mubr.f32.gmra.mxu1 %v4912_v29 }
 0x24c   : >>> { %v5193_v4 = vadd.f32 %v1568_v59, %v1300_v40  ;;  %2309 = vmatprep.mubr.f32.mxu0 %v5855_v11  ;;  %2488 = vmatprep.mubr.f32.mxu1 %v5855_v11  ;;  %v1322_v63 = vadd.f32 %v1321_v31, %v1087_v9 }
 0x24d   : >>> { %v1323_v48 = vpop.f32.mrf.mxu0  ;;  %v5197_v2 = vpop.f32.mrf.mxu1 }
 0x24e   : >>> { %v1324_v61 = vadd.f32 %v1323_v48, %v1087_v9 }
 0x24f   : >>> { %v1332_v62 = vpop.f32.mrf.mxu0  ;;  %v1575_v0 = vpop.f32.mrf.mxu1  ;;  %2311 = vmatmul.mubr.f32.gmra.mxu0 %v4946_v41  ;;  %2490 = vmatmul.mubr.f32.gmra.mxu1 %v4928_v10 }
 0x250   : >>> { %v5201_v14 = vadd.f32 %v1575_v0, %v1311_v47  ;;  %2316 = vmatprep.mubr.f32.mxu0 %v5855_v11  ;;  %2495 = vmatprep.mubr.f32.mxu1 %v5855_v11  ;;  %v1333_v10 = vadd.f32 %v1332_v62, %v5158_v49  ;;  %v1107_v62 = vpop.permute.xlu1 %1106 }
 0x251   : >>> { %v1334_v29 = vpop.f32.mrf.mxu0  ;;  %v1577_v6 = vpop.f32.mrf.mxu1 }
 0x252   : >>> { %v5205_v26 = vadd.f32 %v1577_v6, %v1313_v15 }
 0x253   : >>> { %v1343_v8 = vpop.f32.mrf.mxu0  ;;  %v1582_v32 = vpop.f32.mrf.mxu1  ;;  %2318 = vmatmul.mubr.f32.gmra.mxu0 %v4968_v52  ;;  %2497 = vmatmul.mubr.f32.gmra.mxu1 %v4932_v13  ;;  %v1335_v13 = vadd.f32 %v1334_v29, %v5158_v49 }
 0x254   : >>> { %v5210_v24 = vadd.f32 %v1582_v32, %v1322_v63  ;;  %2323 = vmatprep.mubr.f32.mxu0 %v5855_v11  ;;  %2502 = vmatprep.mubr.f32.mxu1 %v5855_v11  ;;  %v1344_v9 = vadd.f32 %v1343_v8, %v5140_v42 }
 0x255   : >>> { %v1345_v36 = vpop.f32.mrf.mxu0  ;;  %v1584_v1 = vpop.f32.mrf.mxu1 }
 0x256   : >>> { %v5214_v33 = vadd.f32 %v1584_v1, %v1324_v61 }
 0x257   : >>> { %v1354_v12 = vpop.f32.mrf.mxu0  ;;  %v1589_v25 = vpop.f32.mrf.mxu1  ;;  %2325 = vmatmul.mubr.f32.gmra.mxu0 %v4982_v17  ;;  %2504 = vmatmul.mubr.f32.gmra.mxu1 %v4946_v41  ;;  %v1346_v41 = vadd.f32 %v1345_v36, %v5140_v42 }
 0x258   : >>> { %v5222_v40 = vadd.f32 %v1589_v25, %v1333_v10  ;;  %2509 = vmatprep.mubr.f32.mxu1 %v5855_v11  ;;  %2633 = vmatprep.mubr.f32.mxu0 %v5855_v11  ;;  %v1355_v49 = vadd.f32 %v1354_v12, %v5118_v3 }
 0x259   : >>> { %v1356_v23 = vpop.f32.mrf.mxu0  ;;  %v1591_v46 = vpop.f32.mrf.mxu1 }
 0x25a   : >>> { %v5226_v31 = vadd.f32 %v1591_v46, %v1335_v13  ;;  %v1357_v8 = vadd.f32 %v1356_v23, %v5118_v3 }
 0x25b   : >>> { %v1365_v59 = vpop.f32.mrf.mxu0  ;;  %v1596_v47 = vpop.f32.mrf.mxu1  ;;  %2511 = vmatmul.mubr.f32.gmra.mxu1 %v4968_v52 }
 0x25c   : >>> { %v5231_v48 = vadd.f32 %v1596_v47, %v1344_v9  ;;  %2516 = vmatprep.mubr.f32.mxu1 %v5855_v11  ;;  %v1366_v42 = vadd.f32 %v1365_v59, %v1107_v62 }
 0x25d   : >>> { %v1367_v0 = vpop.f32.mrf.mxu0  ;;  %v1598_v63 = vpop.f32.mrf.mxu1 }
 0x25e   : >>> { %v5234_v15 = vadd.f32 %v1598_v63, %v1346_v41  ;;  %v1368_v25 = vadd.f32 %v1367_v0, %v1107_v62 }
 0x25f   : >>> { %v1376_v29 = vpop.f32.mrf.mxu0  ;;  %v1603_v6 = vpop.f32.mrf.mxu1  ;;  %2518 = vmatmul.mubr.f32.gmra.mxu1 %v4982_v17 }
 0x260   : >>> { %v5238_v52 = vadd.f32 %v1603_v6, %v1355_v49  ;;  %2769 = vmatprep.mubr.f32.mxu1 %v5855_v11  ;;  %v1377_v12 = vadd.f32 %v1376_v29, %v5172_v35 }
 0x261   : >>> { %v1378_v32 = vpop.f32.mrf.mxu0  ;;  %v1605_v61 = vpop.f32.mrf.mxu1 }
 0x262   : >>> { %v5241_v10 = vadd.f32 %v1605_v61, %v1357_v8  ;;  %v1379_v59 = vadd.f32 %v1378_v32, %v5172_v35 }
 0x263   : >>> { %v1387_v36 = vpop.f32.mrf.mxu0  ;;  %v1610_v1 = vpop.f32.mrf.mxu1 }
 0x264   : >>> { %v5244_v13 = vadd.f32 %v1610_v1, %v1366_v42  ;;  %v1388_v47 = vadd.f32 %v1387_v36, %v5178_v50 }
 0x265   : >>> { %v1389_v9 = vpop.f32.mrf.mxu0  ;;  %v1612_v17 = vpop.f32.mrf.mxu1 }
 0x266   : >>> { %v5246_v46 = vadd.f32 %v1612_v17, %v1368_v25  ;;  %v1390_v0 = vadd.f32 %v1389_v9, %v5178_v50 }
 0x267   : >>> { %v1398_v3 = vpop.f32.mrf.mxu0  ;;  %v1617_v23 = vpop.f32.mrf.mxu1 }
 0x268   : >>> { %v5250_v41 = vadd.f32 %v1617_v23, %v1377_v12  ;;  %v1399_v8 = vadd.f32 %v1398_v3, %v5144_v7 }
 0x269   : >>> { %v1400_v49 = vpop.f32.mrf.mxu0  ;;  %v1619_v63 = vpop.f32.mrf.mxu1 }
 0x26a   : >>> { %v5252_v6 = vadd.f32 %v1619_v63, %v1379_v59  ;;  %v1401_v36 = vadd.f32 %v1400_v49, %v5144_v7 }
 0x26b   : >>> { %v1409_v29 = vpop.f32.mrf.mxu0  ;;  %v1624_v62 = vpop.f32.mrf.mxu1 }
 0x26c   : >>> { %v5256_v42 = vadd.f32 %v1624_v62, %v1388_v47  ;;  %v1410_v12 = vadd.f32 %v1409_v29, %v5150_v39 }
 0x26d   : >>> { %v1411_v61 = vpop.f32.mrf.mxu0  ;;  %v1626_v1 = vpop.f32.mrf.mxu1 }
 0x26e   : >>> { %v5258_v25 = vadd.f32 %v1626_v1, %v1390_v0  ;;  %v1412_v3 = vadd.f32 %v1411_v61, %v5150_v39  ;;  %v1137_v0 = vpop.permute.xlu1 %1136 }
 0x26f   : >>> { %v1420_v35 = vpop.f32.mrf.mxu0  ;;  %v1631_v32 = vpop.f32.mrf.mxu1 }
 0x270   : >>> { %v5262_v17 = vadd.f32 %v1631_v32, %v1399_v8  ;;  %v1421_v47 = vadd.f32 %v1420_v35, %v5126_v34 }
 0x271   : >>> { %v1422_v23 = vpop.f32.mrf.mxu0  ;;  %v1633_v59 = vpop.f32.mrf.mxu1 }
 0x272   : >>> { %v5264_v63 = vadd.f32 %v1633_v59, %v1401_v36  ;;  %v1423_v8 = vadd.f32 %v1422_v23, %v5126_v34  ;;  %v1142_v59 = vpop.permute.xlu0 %1141 }
 0x273   : >>> { %v1431_v50 = vpop.f32.mrf.mxu0  ;;  %v1638_v9 = vpop.f32.mrf.mxu1 }
 0x274   : >>> { %v5268_v62 = vadd.f32 %v1638_v9, %v1410_v12  ;;  %v1432_v36 = vadd.f32 %v1431_v50, %v1137_v0 }
 0x275   : >>> { %v1433_v1 = vpop.f32.mrf.mxu0  ;;  %v1640_v11 = vpop.f32.mrf.mxu1 }
 0x276   : >>> { %v5270_v7 = vadd.f32 %v1640_v11, %v1412_v3  ;;  %v1434_v12 = vadd.f32 %v1433_v1, %v1137_v0 }
 0x277   : >>> { %v1442_v49 = vpop.f32.mrf.mxu0  ;;  %v1645_v29 = vpop.f32.mrf.mxu1 }
 0x278   : >>> { %v5273_v32 = vadd.f32 %v1645_v29, %v1421_v47  ;;  %v1443_v20 = vadd.f32 %v1442_v49, %v1142_v59 }
 0x279   : >>> { %v1444_v18 = vpop.f32.mrf.mxu0  ;;  %v1647_v19 = vpop.f32.mrf.mxu1 }
 0x27a   : >>> { %v5275_v39 = vadd.f32 %v1647_v19, %v1423_v8  ;;  %v1445_v50 = vadd.f32 %v1444_v18, %v1142_v59 }
 0x27b   : >>> { %v1453_v61 = vpop.f32.mrf.mxu0  ;;  %v1652_v35 = vpop.f32.mrf.mxu1 }
 0x27c   : >>> { %v5277_v9 = vadd.f32 %v1652_v35, %v1432_v36  ;;  %v1454_v23 = vadd.f32 %v1453_v61, %v5216_v5 }
 0x27d   : >>> { %v1455_v11 = vpop.f32.mrf.mxu0  ;;  %v1654_v3 = vpop.f32.mrf.mxu1 }
 0x27e   : >>> { %v5279_v21 = vadd.f32 %v1654_v3, %v1434_v12  ;;  %v1456_v1 = vadd.f32 %v1455_v11, %v5216_v5 }
 0x27f   : >>> { %v1464_v51 = vpop.f32.mrf.mxu0  ;;  %v1659_v34 = vpop.f32.mrf.mxu1 }
 0x280   : >>> { %v5282_v47 = vadd.f32 %v1659_v34, %v1443_v20  ;;  %v1465_v49 = vadd.f32 %v1464_v51, %v5162_v38 }
 0x281   : >>> { %v1466_v29 = vpop.f32.mrf.mxu0  ;;  %v1661_v19 = vpop.f32.mrf.mxu1 }
 0x282   : >>> { %v5284_v8 = vadd.f32 %v1661_v19, %v1445_v50  ;;  %v1467_v20 = vadd.f32 %v1466_v29, %v5162_v38 }
 0x283   : >>> { %v1475_v54 = vpop.f32.mrf.mxu0  ;;  %v1666_v0 = vpop.f32.mrf.mxu1 }
 0x284   : >>> { %v5288_v36 = vadd.f32 %v1666_v0, %v1454_v23  ;;  %v1476_v59 = vadd.f32 %v1475_v54, %v5168_v60 }
 0x285   : >>> { %v1477_v35 = vpop.f32.mrf.mxu0  ;;  %v1668_v12 = vpop.f32.mrf.mxu1 }
 0x286   : >>> { %v5290_v3 = vadd.f32 %v1668_v12, %v1456_v1  ;;  %v1478_v11 = vadd.f32 %v1477_v35, %v5168_v60 }
 0x287   : >>> { %v1486_v61 = vpop.f32.mrf.mxu0  ;;  %v1673_v18 = vpop.f32.mrf.mxu1 }
 0x288   : >>> { %v5294_v34 = vadd.f32 %v1673_v18, %v1465_v49  ;;  %v1487_v23 = vadd.f32 %v1486_v61, %v5134_v53  ;;  %v1302_v18 = vadd.f32 %v5182_v27, %v5184_v44 }
 0x289   : >>> { %v1488_v50 = vpop.f32.mrf.mxu0  ;;  %v1675_v19 = vpop.f32.mrf.mxu1 }
 0x28a   : >>> { %v5296_v55 = vadd.f32 %v1675_v19, %v1467_v20  ;;  %v1489_v20 = vadd.f32 %v1488_v50, %v5134_v53 }
 0x28b   : >>> { %v1680_v5 = vpop.f32.mrf.mxu1  ;;  %v1764_v51 = vpop.f32.mrf.mxu0 }
 0x28c   : >>> { %v5300_v0 = vadd.f32 %v1680_v5, %v1476_v59  ;;  %v1765_v1 = vadd.f32 %v1764_v51, %v5193_v4  ;;  %v1571_v59 = vadd.f32 %v5197_v2, %v1302_v18 }
 0x28d   : >>> { %v1682_v12 = vpop.f32.mrf.mxu1  ;;  %v1766_v38 = vpop.f32.mrf.mxu0 }
 0x28e   : >>> { %v5303_v29 = vadd.f32 %v1682_v12, %v1478_v11  ;;  %v1767_v12 = vadd.f32 %v1766_v38, %v1571_v59 }
 0x28f   : >>> { %v1687_v54 = vpop.f32.mrf.mxu1  ;;  %v1772_v49 = vpop.f32.mrf.mxu0 }
 0x290   : >>> { %v5308_v19 = vadd.f32 %v1687_v54, %v1487_v23  ;;  %v1773_v60 = vadd.f32 %v1772_v49, %v5201_v14 }
 0x291   : >>> { %v1689_v35 = vpop.f32.mrf.mxu1  ;;  %v1774_v61 = vpop.f32.mrf.mxu0 }
 0x292   : >>> { %v5312_v4 = vadd.f32 %v1689_v35, %v1489_v20  ;;  %v1775_v5 = vadd.f32 %v1774_v61, %v5205_v26 }
 0x293   : >>> { %v1780_v51 = vpop.f32.mrf.mxu0  ;;  %v1976_v11 = vpop.f32.mrf.mxu1 }
 0x294   : >>> { %v1781_v56 = vadd.f32 %v1780_v51, %v5210_v24  ;;  %v5316_v27 = vadd.f32 %v1976_v11, %v1765_v1 }
 0x295   : >>> { %v1782_v53 = vpop.f32.mrf.mxu0  ;;  %v1978_v44 = vpop.f32.mrf.mxu1 }
 0x296   : >>> { %v1783_v50 = vadd.f32 %v1782_v53, %v5214_v33  ;;  %v5319_v14 = vadd.f32 %v1978_v44, %v1767_v12 }
 0x297   : >>> { %v1788_v23 = vpop.f32.mrf.mxu0  ;;  %v1985_v54 = vpop.f32.mrf.mxu1 }
 0x298   : >>> { %v1789_v2 = vadd.f32 %v1788_v23, %v5222_v40  ;;  %v5322_v49 = vadd.f32 %v1985_v54, %v1773_v60 }
 0x299   : >>> { %v1790_v26 = vpop.f32.mrf.mxu0  ;;  %v1987_v18 = vpop.f32.mrf.mxu1 }
 0x29a   : >>> { %v1791_v38 = vadd.f32 %v1790_v26, %v5226_v31  ;;  %v5325_v20 = vadd.f32 %v1987_v18, %v1775_v5 }
 0x29b   : >>> { %v1796_v24 = vpop.f32.mrf.mxu0  ;;  %v1994_v1 = vpop.f32.mrf.mxu1 }
 0x29c   : >>> { %v1797_v35 = vadd.f32 %v1796_v24, %v5231_v48  ;;  %v5328_v61 = vadd.f32 %v1994_v1, %v1781_v56 }
 0x29d   : >>> { %v1798_v33 = vpop.f32.mrf.mxu0  ;;  %v1996_v59 = vpop.f32.mrf.mxu1 }
 0x29e   : >>> { %v1799_v51 = vadd.f32 %v1798_v33, %v5234_v15  ;;  %v5331_v11 = vadd.f32 %v1996_v59, %v1783_v50 }
 0x29f   : >>> { %v1804_v40 = vpop.f32.mrf.mxu0  ;;  %v2003_v60 = vpop.f32.mrf.mxu1 }
 0x2a0   : >>> { %v1805_v12 = vadd.f32 %v1804_v40, %v5238_v52  ;;  %v5334_v53 = vadd.f32 %v2003_v60, %v1789_v2 }
 0x2a1   : >>> { %v1806_v31 = vpop.f32.mrf.mxu0  ;;  %v2005_v5 = vpop.f32.mrf.mxu1 }
 0x2a2   : >>> { %v1807_v44 = vadd.f32 %v1806_v31, %v5241_v10  ;;  %v5337_v23 = vadd.f32 %v2005_v5, %v1791_v38 }
 0x2a3   : >>> { %v1812_v56 = vpop.f32.mrf.mxu0  ;;  %v2012_v48 = vpop.f32.mrf.mxu1 }
 0x2a4   : >>> { %v1813_v54 = vadd.f32 %v1812_v56, %v5244_v13  ;;  %v5340_v26 = vadd.f32 %v2012_v48, %v1797_v35 }
 0x2a5   : >>> { %v1814_v15 = vpop.f32.mrf.mxu0  ;;  %v2014_v50 = vpop.f32.mrf.mxu1 }
 0x2a6   : >>> { %v1815_v18 = vadd.f32 %v1814_v15, %v5246_v46  ;;  %v5343_v24 = vadd.f32 %v2014_v50, %v1799_v51 }
 0x2a7   : >>> { %v1820_v52 = vpop.f32.mrf.mxu0  ;;  %v2021_v2 = vpop.f32.mrf.mxu1 }
 0x2a8   : >>> { %v1821_v1 = vadd.f32 %v1820_v52, %v5250_v41  ;;  %v5346_v33 = vadd.f32 %v2021_v2, %v1805_v12 }
 0x2a9   : >>> { %v1822_v10 = vpop.f32.mrf.mxu0  ;;  %v2023_v38 = vpop.f32.mrf.mxu1 }
 0x2aa   : >>> { %v1823_v59 = vadd.f32 %v1822_v10, %v5252_v6  ;;  %v5349_v40 = vadd.f32 %v2023_v38, %v1807_v44 }
 0x2ab   : >>> { %v1828_v13 = vpop.f32.mrf.mxu0  ;;  %v2030_v35 = vpop.f32.mrf.mxu1 }
 0x2ac   : >>> { %v1829_v60 = vadd.f32 %v1828_v13, %v5256_v42  ;;  %v5352_v31 = vadd.f32 %v2030_v35, %v1813_v54 }
 0x2ad   : >>> { %v1830_v46 = vpop.f32.mrf.mxu0  ;;  %v2032_v51 = vpop.f32.mrf.mxu1 }
 0x2ae   : >>> { %v1831_v5 = vadd.f32 %v1830_v46, %v5258_v25  ;;  %v5355_v56 = vadd.f32 %v2032_v51, %v1815_v18 }
 0x2af   : >>> { %v1836_v41 = vpop.f32.mrf.mxu0  ;;  %v2039_v12 = vpop.f32.mrf.mxu1 }
 0x2b0   : >>> { %v1837_v48 = vadd.f32 %v1836_v41, %v5262_v17  ;;  %v5358_v15 = vadd.f32 %v2039_v12, %v1821_v1 }
 0x2b1   : >>> { %v1838_v6 = vpop.f32.mrf.mxu0  ;;  %v2041_v44 = vpop.f32.mrf.mxu1 }
 0x2b2   : >>> { %v1839_v50 = vadd.f32 %v1838_v6, %v5264_v63  ;;  %v5361_v52 = vadd.f32 %v2041_v44, %v1823_v59 }
 0x2b3   : >>> { %v1844_v42 = vpop.f32.mrf.mxu0  ;;  %v2048_v54 = vpop.f32.mrf.mxu1 }
 0x2b4   : >>> { %v1845_v2 = vadd.f32 %v1844_v42, %v5268_v62  ;;  %v5364_v10 = vadd.f32 %v2048_v54, %v1829_v60 }
 0x2b5   : >>> { %v1846_v25 = vpop.f32.mrf.mxu0  ;;  %v2050_v18 = vpop.f32.mrf.mxu1 }
 0x2b6   : >>> { %v1847_v38 = vadd.f32 %v1846_v25, %v5270_v7  ;;  %v5367_v13 = vadd.f32 %v2050_v18, %v1831_v5 }
 0x2b7   : >>> { %v1852_v17 = vpop.f32.mrf.mxu0  ;;  %v2057_v1 = vpop.f32.mrf.mxu1 }
 0x2b8   : >>> { %v1853_v35 = vadd.f32 %v1852_v17, %v5273_v32  ;;  %v5370_v46 = vadd.f32 %v2057_v1, %v1837_v48 }
 0x2b9   : >>> { %v1854_v63 = vpop.f32.mrf.mxu0  ;;  %v2059_v59 = vpop.f32.mrf.mxu1 }
 0x2ba   : >>> { %v1855_v51 = vadd.f32 %v1854_v63, %v5275_v39  ;;  %v5373_v41 = vadd.f32 %v2059_v59, %v1839_v50 }
 0x2bb   : >>> { %v1860_v62 = vpop.f32.mrf.mxu0  ;;  %v2066_v60 = vpop.f32.mrf.mxu1 }
 0x2bc   : >>> { %v1861_v12 = vadd.f32 %v1860_v62, %v5277_v9  ;;  %v5376_v6 = vadd.f32 %v2066_v60, %v1845_v2 }
 0x2bd   : >>> { %v1862_v7 = vpop.f32.mrf.mxu0  ;;  %v2068_v5 = vpop.f32.mrf.mxu1 }
 0x2be   : >>> { %v1863_v44 = vadd.f32 %v1862_v7, %v5279_v21  ;;  %v5379_v42 = vadd.f32 %v2068_v5, %v1847_v38 }
 0x2bf   : >>> { %v1868_v32 = vpop.f32.mrf.mxu0  ;;  %v2075_v48 = vpop.f32.mrf.mxu1 }
 0x2c0   : >>> { %v1869_v54 = vadd.f32 %v1868_v32, %v5282_v47  ;;  %v5382_v25 = vadd.f32 %v2075_v48, %v1853_v35 }
 0x2c1   : >>> { %v1870_v39 = vpop.f32.mrf.mxu0  ;;  %v2077_v50 = vpop.f32.mrf.mxu1 }
 0x2c2   : >>> { %v1871_v18 = vadd.f32 %v1870_v39, %v5284_v8  ;;  %v5385_v17 = vadd.f32 %v2077_v50, %v1855_v51 }
 0x2c3   : >>> { %v1876_v9 = vpop.f32.mrf.mxu0  ;;  %v2084_v2 = vpop.f32.mrf.mxu1 }
 0x2c4   : >>> { %v1877_v1 = vadd.f32 %v1876_v9, %v5288_v36  ;;  %v5388_v63 = vadd.f32 %v2084_v2, %v1861_v12 }
 0x2c5   : >>> { %v1878_v21 = vpop.f32.mrf.mxu0  ;;  %v2086_v38 = vpop.f32.mrf.mxu1 }
 0x2c6   : >>> { %v1879_v59 = vadd.f32 %v1878_v21, %v5290_v3  ;;  %v5391_v62 = vadd.f32 %v2086_v38, %v1863_v44 }
 0x2c7   : >>> { %v1884_v47 = vpop.f32.mrf.mxu0  ;;  %v2093_v35 = vpop.f32.mrf.mxu1 }
 0x2c8   : >>> { %v1885_v60 = vadd.f32 %v1884_v47, %v5294_v34  ;;  %v5394_v7 = vadd.f32 %v2093_v35, %v1869_v54 }
 0x2c9   : >>> { %v1886_v8 = vpop.f32.mrf.mxu0  ;;  %v2095_v51 = vpop.f32.mrf.mxu1 }
 0x2ca   : >>> { %v1887_v5 = vadd.f32 %v1886_v8, %v5296_v55  ;;  %v5397_v32 = vadd.f32 %v2095_v51, %v1871_v18 }
 0x2cb   : >>> { %v1892_v36 = vpop.f32.mrf.mxu0  ;;  %v2102_v12 = vpop.f32.mrf.mxu1 }
 0x2cc   : >>> { %v1893_v48 = vadd.f32 %v1892_v36, %v5300_v0  ;;  %v5400_v39 = vadd.f32 %v2102_v12, %v1877_v1 }
 0x2cd   : >>> { %v1894_v3 = vpop.f32.mrf.mxu0  ;;  %v2104_v44 = vpop.f32.mrf.mxu1 }
 0x2ce   : >>> { %v1895_v50 = vadd.f32 %v1894_v3, %v5303_v29  ;;  %v5403_v9 = vadd.f32 %v2104_v44, %v1879_v59 }
 0x2cf   : >>> { %v1900_v34 = vpop.f32.mrf.mxu0  ;;  %v2111_v54 = vpop.f32.mrf.mxu1 }
 0x2d0   : >>> { %v1901_v2 = vadd.f32 %v1900_v34, %v5308_v19  ;;  %v5406_v21 = vadd.f32 %v2111_v54, %v1885_v60 }
 0x2d1   : >>> { %v1902_v55 = vpop.f32.mrf.mxu0  ;;  %v2113_v18 = vpop.f32.mrf.mxu1 }
 0x2d2   : >>> { %v1903_v38 = vadd.f32 %v1902_v55, %v5312_v4  ;;  %v5409_v47 = vadd.f32 %v2113_v18, %v1887_v5 }
 0x2d3   : >>> { %v2120_v0 = vpop.f32.mrf.mxu1  ;;  %v2207_v1 = vpop.f32.mrf.mxu0 }
 0x2d4   : >>> { %v5411_v35 = vadd.f32 %v2120_v0, %v1893_v48  ;;  %v2208_v29 = vadd.f32 %v2207_v1, %v5316_v27 }
 0x2d5   : >>> { %v2122_v59 = vpop.f32.mrf.mxu1  ;;  %v2209_v8 = vpop.f32.mrf.mxu0 }
 0x2d6   : >>> { %6076 = vst [vmem:[#allocation84_spill] sm:$0xff] %v5411_v35  ;;  %v5414_v51 = vadd.f32 %v2122_v59, %v1895_v50  ;;  %v2210_v19 = vadd.f32 %v2209_v8, %v5319_v14 }
 0x2d7   : >>> { %v2129_v60 = vpop.f32.mrf.mxu1  ;;  %v2214_v36 = vpop.f32.mrf.mxu0 }
 0x2d8   : >>> { %6077 = vst [vmem:[#allocation85_spill] sm:$0xff] %v5414_v51  ;;  %v5417_v12 = vadd.f32 %v2129_v60, %v1901_v2  ;;  %v2215_v4 = vadd.f32 %v2214_v36, %v5322_v49 }
 0x2d9   : >>> { %v2131_v5 = vpop.f32.mrf.mxu1  ;;  %v2216_v3 = vpop.f32.mrf.mxu0 }
 0x2da   : >>> { %6078 = vst [vmem:[#allocation86_spill] sm:$0xff] %v5417_v12  ;;  %v5420_v44 = vadd.f32 %v2131_v5, %v1903_v38  ;;  %v2217_v48 = vadd.f32 %v2216_v3, %v5325_v20 }
 0x2db   : >>> { %v2221_v34 = vpop.f32.mrf.mxu0  ;;  %v2400_v27 = vpop.f32.mrf.mxu1 }
 0x2dc   : >>> { %6079 = vst [vmem:[#allocation87_spill] sm:$0xff] %v5420_v44  ;;  %v2222_v54 = vadd.f32 %v2221_v34, %v5328_v61  ;;  %v2401_v50 = vadd.f32 %v2400_v27, %v2208_v29 }
 0x2dd   : >>> { %v2223_v55 = vpop.f32.mrf.mxu0  ;;  %v2402_v18 = vpop.f32.mrf.mxu1 }
 0x2de   : >>> { %v2224_v14 = vadd.f32 %v2223_v55, %v5331_v11  ;;  %v2403_v0 = vadd.f32 %v2402_v18, %v2210_v19 }
 0x2df   : >>> { %v2228_v2 = vpop.f32.mrf.mxu0  ;;  %v2407_v1 = vpop.f32.mrf.mxu1 }
 0x2e0   : >>> { %v2408_v59 = vadd.f32 %v2407_v1, %v2215_v4 }
 0x2e1   : >>> { %v2230_v49 = vpop.f32.mrf.mxu0  ;;  %v2409_v8 = vpop.f32.mrf.mxu1 }
 0x2e2   : >>> { %v2410_v60 = vadd.f32 %v2409_v8, %v2217_v48 }
 0x2e3   : >>> { %v2235_v38 = vpop.f32.mrf.mxu0  ;;  %v2414_v36 = vpop.f32.mrf.mxu1 }
 0x2e4   : >>> { %v2415_v5 = vadd.f32 %v2414_v36, %v2222_v54 }
 0x2e5   : >>> { %v2237_v20 = vpop.f32.mrf.mxu0  ;;  %v2416_v3 = vpop.f32.mrf.mxu1 }
 0x2e6   : >>> { %v2417_v57 = vadd.f32 %v2416_v3, %v2224_v14 }
 0x2e7   : >>> { %v5425_v58 = vpop.f32.mrf.mxu0  ;;  %v2421_v61 = vpop.f32.mrf.mxu1 }
 0x2e9   : >>> { %v5427_v29 = vpop.f32.mrf.mxu0  ;;  %v2423_v34 = vpop.f32.mrf.mxu1 }
 0x2eb   : >>> { %v2249_v11 = vpop.f32.mrf.mxu0  ;;  %v2428_v19 = vpop.f32.mrf.mxu1 }
 0x2ec   : >>> { %v2250_v54 = vadd.f32 %v2249_v11, %v5352_v31 }
 0x2ed   : >>> { %v2251_v27 = vpop.f32.mrf.mxu0  ;;  %v2430_v55 = vpop.f32.mrf.mxu1 }
 0x2ee   : >>> { %v2252_v36 = vadd.f32 %v2251_v27, %v5355_v56 }
 0x2ef   : >>> { %v2256_v4 = vpop.f32.mrf.mxu0  ;;  %v5429_v18 = vpop.f32.mrf.mxu1 }
 0x2f0   : >>> { %v2257_v16 = vadd.f32 %v2256_v4, %v5358_v15 }
 0x2f1   : >>> { %v2258_v48 = vpop.f32.mrf.mxu0  ;;  %v5431_v1 = vpop.f32.mrf.mxu1 }
 0x2f2   : >>> { %v2259_v44 = vadd.f32 %v2258_v48, %v5361_v52 }
 0x2f3   : >>> { %v2263_v8 = vpop.f32.mrf.mxu0  ;;  %v2442_v14 = vpop.f32.mrf.mxu1 }
 0x2f4   : >>> { %v2443_v3 = vadd.f32 %v2442_v14, %v2250_v54  ;;  %v2264_v35 = vadd.f32 %v2263_v8, %v5364_v10  ;;  %v2231_v10 = vadd.f32 %v2230_v49, %v5337_v23  ;;  %v2238_v23 = vadd.f32 %v2237_v20, %v5343_v24 }
 0x2f5   : >>> { %v2265_v22 = vpop.f32.mrf.mxu0  ;;  %v2444_v28 = vpop.f32.mrf.mxu1  ;;  %v2245_v24 = vadd.f32 %v5427_v29, %v5349_v40 }
 0x2f6   : >>> { %v5436_v43 = vmul.f32 %v2443_v3, %v2401_v50  ;;  %v2445_v30 = vadd.f32 %v2444_v28, %v2252_v36  ;;  %v2266_v15 = vadd.f32 %v2265_v22, %v5367_v13  ;;  %v2431_v3 = vadd.f32 %v2430_v55, %v2238_v23 }
 0x2f7   : >>> { %v2270_v37 = vpop.f32.mrf.mxu0  ;;  %v2449_v45 = vpop.f32.mrf.mxu1 }
 0x2f8   : >>> { %v5439_v12 = vmul.f32 %v2445_v30, %v2403_v0  ;;  %v2450_v51 = vadd.f32 %v2449_v45, %v2257_v16  ;;  %v2229_v30 = vadd.f32 %v2228_v2, %v5334_v53  ;;  %v2271_v16 = vadd.f32 %v2270_v37, %v5370_v46 }
 0x2f9   : >>> { %v2272_v31 = vpop.f32.mrf.mxu0  ;;  %v2451_v11 = vpop.f32.mrf.mxu1  ;;  %v2424_v53 = vadd.f32 %v2423_v34, %v2231_v10 }
 0x2fa   : >>> { %v5442_v56 = vmul.f32 %v2450_v51, %v2408_v59  ;;  %v2452_v27 = vadd.f32 %v2451_v11, %v2259_v44  ;;  %v2422_v0 = vadd.f32 %v2421_v61, %v2229_v30  ;;  %v2273_v59 = vadd.f32 %v2272_v31, %v5373_v41 }
 0x2fb   : >>> { %v2277_v54 = vpop.f32.mrf.mxu0  ;;  %v2456_v14 = vpop.f32.mrf.mxu1 }
 0x2fc   : >>> { %v5445_v50 = vmul.f32 %v2452_v27, %v2410_v60  ;;  %v2457_v28 = vadd.f32 %v2456_v14, %v2264_v35  ;;  %v2236_v35 = vadd.f32 %v2235_v38, %v5340_v26  ;;  %v2278_v37 = vadd.f32 %v2277_v54, %v5376_v6 }
 0x2fd   : >>> { %v2279_v4 = vpop.f32.mrf.mxu0  ;;  %v2458_v36 = vpop.f32.mrf.mxu1  ;;  %v2243_v26 = vadd.f32 %v5425_v58, %v5346_v33  ;;  %v2438_v33 = vadd.f32 %v5431_v1, %v2245_v24 }
 0x2fe   : >>> { %v5449_v45 = vmul.f32 %v2457_v28, %v2415_v5  ;;  %v2459_v52 = vadd.f32 %v2458_v36, %v2266_v15  ;;  %v2429_v61 = vadd.f32 %v2428_v19, %v2236_v35  ;;  %v2280_v41 = vadd.f32 %v2279_v4, %v5379_v42 }
 0x2ff   : >>> { %v2284_v51 = vpop.f32.mrf.mxu0  ;;  %v2463_v44 = vpop.f32.mrf.mxu1  ;;  %v2436_v42 = vadd.f32 %v5429_v18, %v2243_v26 }
 0x300   : >>> { %v5453_v22 = vmul.f32 %v2459_v52, %v2417_v57  ;;  %v2464_v13 = vadd.f32 %v2463_v44, %v2271_v16  ;;  %v2285_v6 = vadd.f32 %v2284_v51, %v5382_v25 }
 0x301   : >>> { %v2286_v60 = vpop.f32.mrf.mxu0  ;;  %v2465_v48 = vpop.f32.mrf.mxu1 }
 0x302   : >>> { %v5457_v46 = vmul.f32 %v2464_v13, %v2422_v0  ;;  %v2466_v2 = vadd.f32 %v2465_v48, %v2273_v59  ;;  %v2287_v27 = vadd.f32 %v2286_v60, %v5385_v17 }
 0x303   : >>> { %v2291_v49 = vpop.f32.mrf.mxu0  ;;  %v2470_v5 = vpop.f32.mrf.mxu1 }
 0x304   : >>> { %v5461_v57 = vmul.f32 %v2466_v2, %v2424_v53  ;;  %v2471_v8 = vadd.f32 %v2470_v5, %v2278_v37  ;;  %v2292_v55 = vadd.f32 %v2291_v49, %v5388_v63 }
 0x305   : >>> { %v2293_v38 = vpop.f32.mrf.mxu0  ;;  %v2472_v34 = vpop.f32.mrf.mxu1 }
 0x306   : >>> { %v2532_v31 = vmul.f32 %v2471_v8, %v2429_v61  ;;  %v2473_v11 = vadd.f32 %v2472_v34, %v2280_v41  ;;  %v2294_v40 = vadd.f32 %v2293_v38, %v5391_v62 }
 0x307   : >>> { %v2298_v20 = vpop.f32.mrf.mxu0  ;;  %v2477_v19 = vpop.f32.mrf.mxu1 }
 0x308   : >>> { %v2533_v54 = vmul.f32 %v2473_v11, %v2431_v3  ;;  %v2478_v14 = vadd.f32 %v2477_v19, %v2285_v6  ;;  %v2299_v17 = vadd.f32 %v2298_v20, %v5394_v7  ;;  %v6081_v3 = vld [vmem:[#allocation85_spill] sm:$0xff] }
 0x309   : >>> { %v2300_v15 = vpop.f32.mrf.mxu0  ;;  %v2479_v58 = vpop.f32.mrf.mxu1  ;;  %v6082_v11 = vld [vmem:[#allocation41_spill] sm:$0xff] }
 0x30a   : >>> { %v5472_v25 = vmul.f32 %v2478_v14, %v2436_v42  ;;  %v2480_v28 = vadd.f32 %v2479_v58, %v2287_v27  ;;  %v2301_v0 = vadd.f32 %v2300_v15, %v5397_v32  ;;  %v2555_v24 = vsel %vm2553_vm0, %v6082_v11, 0  ;;  %v6083_v42 = vld [vmem:[#allocation86_spill] sm:$0xff]  ;;  %v6084_v58 = vld [vmem:[#allocation87_spill] sm:$0xff] }
 0x30b   : >>> { %v2305_v4 = vpop.f32.mrf.mxu0  ;;  %v2484_v36 = vpop.f32.mrf.mxu1  ;;  %v5501_v15 = vand.u32 4294901760, %v2555_v24 }
 0x30c   : >>> { %v2535_v29 = vmul.f32 %v2480_v28, %v2438_v33  ;;  %v2485_v30 = vadd.f32 %v2484_v36, %v2292_v55  ;;  %v2306_v35 = vadd.f32 %v2305_v4, %v5400_v39 }
 0x30d   : >>> { %v2307_v18 = vpop.f32.mrf.mxu0  ;;  %v2486_v16 = vpop.f32.mrf.mxu1 }
 0x30e   : >>> { %v5477_v52 = vmul.f32 %v5436_v43, %v2485_v30  ;;  %v2487_v10 = vadd.f32 %v2486_v16, %v2294_v40  ;;  %v2308_v48 = vadd.f32 %v2307_v18, %v5403_v9  ;;  %v6080_v9 = vld [vmem:[#allocation84_spill] sm:$0xff]  ;;  %v5514_v18 = vsub.f32 %v2555_v24, %v5501_v15 }
 0x30f   : >>> { %v2312_v1 = vpop.f32.mrf.mxu0  ;;  %v2491_v51 = vpop.f32.mrf.mxu1 }
 0x310   : >>> { %v5480_v63 = vmul.f32 %v5439_v12, %v2487_v10  ;;  %v2492_v44 = vadd.f32 %v2491_v51, %v2299_v17  ;;  %v2313_v32 = vadd.f32 %v2312_v1, %v5406_v21 }
 0x311   : >>> { %v2314_v59 = vpop.f32.mrf.mxu0  ;;  %v2493_v62 = vpop.f32.mrf.mxu1 }
 0x312   : >>> { %v5484_v13 = vmul.f32 %v5442_v56, %v2492_v44  ;;  %v2494_v7 = vadd.f32 %v2493_v62, %v2301_v0  ;;  %v2315_v5 = vadd.f32 %v2314_v59, %v5409_v47 }
 0x313   : >>> { %v2319_v60 = vpop.f32.mrf.mxu0  ;;  %v2498_v43 = vpop.f32.mrf.mxu1 }
 0x314   : >>> { %v5489_v53 = vmul.f32 %v5445_v50, %v2494_v7  ;;  %v2499_v12 = vadd.f32 %v2498_v43, %v2306_v35  ;;  %v2320_v50 = vadd.f32 %v2319_v60, %v6080_v9  ;;  %v5537_v59 = vand.u32 4294901760, %v5484_v13 }
 0x315   : >>> { %v2321_v37 = vpop.f32.mrf.mxu0  ;;  %v2500_v2 = vpop.f32.mrf.mxu1  ;;  %v2636_v35 = vand.u32 4294901760, %v5514_v18  ;;  %v5547_v7 = vand.u32 4294901760, %v5480_v63 }
 0x316   : >>> { %v2501_v23 = vadd.f32 %v2500_v2, %v2308_v48  ;;  %v2540_v49 = vmul.f32 %v5449_v45, %v2499_v12  ;;  %v2322_v21 = vadd.f32 %v2321_v37, %v6081_v3  ;;  %v5529_v44 = vand.u32 4294901760, %v5489_v53 }
 0x317   : >>> { %v2505_v56 = vpop.f32.mrf.mxu1  ;;  %v2326_v41 = vpop.f32.mrf.mxu0  ;;  %v5558_v12 = vand.u32 4294901760, %v5477_v52 }
 0x318   : >>> { %v2541_v39 = vmul.f32 %v5453_v22, %v2501_v23  ;;  %v2506_v61 = vadd.f32 %v2505_v56, %v2313_v32  ;;  %v2327_v27 = vadd.f32 %v2326_v41, %v6083_v42  ;;  %v5521_v10 = vand.u32 4294901760, %v2540_v49 }
 0x319   : >>> { %v2507_v8 = vpop.f32.mrf.mxu1  ;;  %v2328_v47 = vpop.f32.mrf.mxu0  ;;  %v5568_v23 = vsub.f32 %v5489_v53, %v5529_v44  ;;  %v2637_v53 = vsub.f32 %v5514_v18, %v2636_v35  ;;  %v5587_v41 = vsub.f32 %v5480_v63, %v5547_v7 }
 0x31a   : >>> { %v2542_v26 = vmul.f32 %v5457_v46, %v2506_v61  ;;  %v2508_v38 = vadd.f32 %v2507_v8, %v2315_v5  ;;  %v2329_v46 = vadd.f32 %v2328_v47, %v6084_v58  ;;  %v5516_v16 = vand.u32 4294901760, %v2541_v39 }
 0x31b   : >>> { %v2512_v34 = vpop.f32.mrf.mxu1  ;;  %v5561_v37 = vsub.f32 %v2540_v49, %v5521_v10  ;;  %v5575_v49 = vsub.f32 %v5484_v13, %v5537_v59  ;;  %v2715_v3 = vand.u32 4294901760, %v5568_v23  ;;  %v2638_v11 = vand.u32 4294901760, %v2637_v53 }
 0x31c   : >>> { %v2543_v6 = vmul.f32 %v5461_v57, %v2508_v38  ;;  %v2513_v45 = vadd.f32 %v2512_v34, %v2320_v50  ;;  %v5510_v30 = vand.u32 4294901760, %v2542_v26  ;;  %v5550_v60 = vsub.f32 %v2541_v39, %v5516_v16 }
 0x31d   : >>> { %v2514_v20 = vpop.f32.mrf.mxu1  ;;  %v5599_v50 = vsub.f32 %v5477_v52, %v5558_v12  ;;  %v2721_v52 = vand.u32 4294901760, %v5575_v49  ;;  %v2727_v47 = vand.u32 4294901760, %v5587_v41  ;;  %v6085_v53 = vmov 0.0  }
 0x31e   : >>> { %v2544_v22 = vmul.f32 %v2532_v31, %v2513_v45  ;;  %v2515_v19 = vadd.f32 %v2514_v20, %v2322_v21  ;;  %v5506_v57 = vand.u32 4294901760, %v2543_v6  ;;  %v2703_v9 = vand.u32 4294901760, %v5550_v60 }
 0x31f   : >>> { %v2519_v14 = vpop.f32.mrf.mxu1  ;;  %v2733_v20 = vand.u32 4294901760, %v5599_v50  ;;  %v2722_v58 = vsub.f32 %v5575_v49, %v2721_v52 }
 0x320   : >>> { %v2545_v33 = vmul.f32 %v2533_v54, %v2515_v19  ;;  %v5504_v55 = vand.u32 4294901760, %v2544_v22  ;;  %v2520_v28 = vadd.f32 %v2519_v14, %v2327_v27  ;;  %v2704_v24 = vsub.f32 %v5550_v60, %v2703_v9 }
 0x321   : >>> { %v2521_v4 = vpop.f32.mrf.mxu1  ;;  %v2716_v27 = vsub.f32 %v5568_v23, %v2715_v3 }
 0x322   : >>> { %v5508_v36 = vand.u32 4294901760, %v2545_v33  ;;  %v2522_v40 = vadd.f32 %v2521_v4, %v2329_v46  ;;  %v2546_v31 = vmul.f32 %v5472_v25, %v2520_v28  ;;  %v5524_v1 = vsub.f32 %v2544_v22, %v5504_v55 }
 0x323   : >>> { %v5532_v25 = vsub.f32 %v2543_v6, %v5506_v57  ;;  %v2705_v46 = vand.u32 4294901760, %v2704_v24  ;;  %v2734_v4 = vsub.f32 %v5599_v50, %v2733_v20  ;;  %v6090_v24 = vld [vmem:[#allocation83_spill] sm:$0xff] (%p1064_p11) }
 0x324   : >>> { %v5519_v54 = vsub.f32 %v2545_v33, %v5508_v36  ;;  %v2547_v17 = vmul.f32 %v2535_v29, %v2522_v40  ;;  %v5526_v51 = vand.u32 4294901760, %v2546_v31  ;;  %v5540_v29 = vsub.f32 %v2542_v26, %v5510_v30 }
 0x325   : >>> { %v2685_v2 = vand.u32 4294901760, %v5524_v1  ;;  %v2691_v5 = vand.u32 4294901760, %v5532_v25  ;;  %v2709_v26 = vand.u32 4294901760, %v5561_v37  ;;  %v2728_v33 = vsub.f32 %v5587_v41, %v2727_v47 }
 0x326   : >>> { %v5534_v0 = vand.u32 4294901760, %v2547_v17  ;;  %v5543_v62 = vsub.f32 %v2546_v31, %v5526_v51  ;;  %v2679_v48 = vand.u32 4294901760, %v5519_v54  ;;  %v2697_v39 = vand.u32 4294901760, %v5540_v29 }
 0x327   : >>> { %v2686_v63 = vsub.f32 %v5524_v1, %v2685_v2  ;;  %v2692_v34 = vsub.f32 %v5532_v25, %v2691_v5  ;;  %v2710_v19 = vsub.f32 %v5561_v37, %v2709_v26  ;;  %v2717_v40 = vand.u32 4294901760, %v2716_v27 }
 0x328   : >>> { %v5553_v43 = vsub.f32 %v2547_v17, %v5534_v0  ;;  %2578 = vmatprep.subr.mxu0 %v5534_v0  ;;  %v2673_v32 = vand.u32 4294901760, %v5543_v62  ;;  %v2680_v8 = vsub.f32 %v5519_v54, %v2679_v48  ;;  %v2698_v6 = vsub.f32 %v5540_v29, %v2697_v39 }
 0x329   : >>> { %2580 = vmatpush1.msra.mxu0 %v5526_v51  ;;  %v2687_v22 = vand.u32 4294901760, %v2686_v63  ;;  %v2693_v42 = vand.u32 4294901760, %v2692_v34  ;;  %v2711_v28 = vand.u32 4294901760, %v2710_v19  ;;  %v2723_v31 = vand.u32 4294901760, %v2722_v58 }
 0x32a   : >>> { %2582 = vmatprep.subr.mxu0 %v5508_v36  ;;  %v2667_v56 = vand.u32 4294901760, %v5553_v43  ;;  %v2674_v61 = vsub.f32 %v5543_v62, %v2673_v32  ;;  %v2681_v45 = vand.u32 4294901760, %v2680_v8  ;;  %v2699_v14 = vand.u32 4294901760, %v2698_v6 }
 0x32b   : >>> { %2584 = vmatpush1.msra.mxu0 %v5504_v55  ;;  %v2729_v17 = vand.u32 4294901760, %v2728_v33 }
 0x32c   : >>> { %2586 = vmatprep.subr.mxu0 %v5506_v57  ;;  %v2668_v13 = vsub.f32 %v5553_v43, %v2667_v56  ;;  %v2675_v21 = vand.u32 4294901760, %v2674_v61  ;;  %v2735_v61 = vand.u32 4294901760, %v2734_v4 }
 0x32d   : >>> { %2588 = vmatpush1.msra.mxu0 %v5510_v30 }
 0x32e   : >>> { %2590 = vmatprep.subr.mxu0 %v5516_v16  ;;  %v2669_v38 = vand.u32 4294901760, %v2668_v13 }
 0x32f   : >>> { %2592 = vmatpush1.msra.mxu0 %v5521_v10 }
 0x330   : >>> { %2594 = vmatprep.subr.mxu0 %v5529_v44  ;;  %2670 = vmatprep.subr.mxu1 %v2669_v38 }
 0x331   : >>> { %2596 = vmatpush1.msra.mxu0 %v5537_v59  ;;  %2676 = vmatpush1.msra.mxu1 %v2675_v21  ;;  %v6088_v21 = vld [vmem:[#allocation82_spill] sm:$0xff] (%p1064_p11) }
 0x332   : >>> { %2598 = vmatprep.subr.mxu0 %v5547_v7  ;;  %2682 = vmatprep.subr.mxu1 %v2681_v45  ;;  %v3172_v6 = vcombine.high (%p1064_p11), %v6088_v21, %v6088_v21  ;;  %v6089_v45 = vld [vmem:[#allocation81_spill] sm:$0xff] (%p1064_p11) }
 0x333   : >>> { %2600 = vmatpush1.msra.mxu0 %v5558_v12  ;;  %2688 = vmatpush1.msra.mxu1 %v2687_v22 }
 0x334   : >>> { %2639 = vmatmul.mubr.f32.vlgmr.msra.gmra.mxu0 %v2638_v11  ;;  %2694 = vmatprep.subr.mxu1 %v2693_v42  ;;  %v3173_v11 = vcombine.high (%p1064_p11), %v6089_v45, %v6089_v45 }
 0x335   : >>> { %2799 = vmatprep.subr.mxu0 %v5553_v43  ;;  %2700 = vmatpush1.msra.mxu1 %v2699_v14 }
 0x336   : >>> { %2802 = vmatpush1.msra.mxu0 %v5543_v62  ;;  %2706 = vmatprep.subr.mxu1 %v2705_v46 }
 0x337   : >>> { %2805 = vmatprep.subr.mxu0 %v5519_v54  ;;  %2712 = vmatpush1.msra.mxu1 %v2711_v28  ;;  %v6092_v28 = vld [vmem:[#allocation77_spill] sm:$0xff] (%p1064_p11) }
 0x338   : >>> { %2808 = vmatpush1.msra.mxu0 %v5524_v1  ;;  %2718 = vmatprep.subr.mxu1 %v2717_v40  ;;  %v6093_v40 = vld [vmem:[#allocation76_spill] sm:$0xff] (%p1064_p11) }
 0x339   : >>> { %2811 = vmatprep.subr.mxu0 %v5532_v25  ;;  %2724 = vmatpush1.msra.mxu1 %v2723_v31 }
 0x33a   : >>> { %2814 = vmatpush1.msra.mxu0 %v5540_v29  ;;  %2730 = vmatprep.subr.mxu1 %v2729_v17  ;;  %v6094_v17 = vld [vmem:[#allocation78_spill] sm:$0xff] (%p1064_p11) }
 0x33b   : >>> { %2817 = vmatprep.subr.mxu0 %v5550_v60  ;;  %2736 = vmatpush1.msra.mxu1 %v2735_v61 }
 0x33c   : >>> { %2820 = vmatpush1.msra.mxu0 %v5561_v37  ;;  %2771 = vmatmul.mubr.f32.vlgmr.msra.gmra.mxu1 %v5501_v15 }
 0x33d   : >>> { %2823 = vmatprep.subr.mxu0 %v5568_v23  ;;  %2895 = vmatprep.subr.mxu1 %v5534_v0  ;;  %v3694_v23 = vmov (%p1064_p11), 0  }
 0x33e   : >>> { %2826 = vmatpush1.msra.mxu0 %v5575_v49  ;;  %2897 = vmatpush1.msra.mxu1 %v5526_v51 }
 0x33f   : >>> { %2829 = vmatprep.subr.mxu0 %v5587_v41  ;;  %2899 = vmatprep.subr.mxu1 %v5508_v36 }
 0x340   : >>> { %2832 = vmatpush1.msra.mxu0 %v5599_v50  ;;  %2865 = vmatprep.mubr.f32.mxu0 %v6085_v53 }
 0x341   : >>> { %2901 = vmatpush1.msra.mxu1 %v5504_v55  ;;  %2868 = vmatmul.mubr.f32.vlgmr.msra.gmra.mxu0 %v5514_v18 }
 0x342   : >>> { %2903 = vmatprep.subr.mxu1 %v5506_v57  ;;  %2983 = vmatprep.subr.mxu0 %v2667_v56  ;;  %v6086_v56 = vld [vmem:[#allocation43_spill] sm:$0xff] (%p1064_p11) }
 0x343   : >>> { %2905 = vmatpush1.msra.mxu1 %v5510_v30  ;;  %2987 = vmatpush1.msra.mxu0 %v2673_v32 }
 0x344   : >>> { %2907 = vmatprep.subr.mxu1 %v5516_v16  ;;  %2991 = vmatprep.subr.mxu0 %v2679_v48 }
 0x345   : >>> { %2909 = vmatpush1.msra.mxu1 %v5521_v10  ;;  %2995 = vmatpush1.msra.mxu0 %v2685_v2 }
 0x346   : >>> { %2911 = vmatprep.subr.mxu1 %v5529_v44  ;;  %2999 = vmatprep.subr.mxu0 %v2691_v5 }
 0x347   : >>> { %2913 = vmatpush1.msra.mxu1 %v5537_v59  ;;  %3003 = vmatpush1.msra.mxu0 %v2697_v39 }
 0x348   : >>> { %2915 = vmatprep.subr.mxu1 %v5547_v7  ;;  %3007 = vmatprep.subr.mxu0 %v2703_v9 }
 0x349   : >>> { %2917 = vmatpush1.msra.mxu1 %v5558_v12  ;;  %2950 = vmatprep.mubr.f32.mxu1 %v6085_v53 }
 0x34a   : >>> { %3011 = vmatpush1.msra.mxu0 %v2709_v26  ;;  %2954 = vmatmul.mubr.f32.vlgmr.msra.gmra.mxu1 %v2636_v35  ;;  %v6087_v26 = vlaneseq (%p1064_p11) }
 0x34b   : >>> { %3015 = vmatprep.subr.mxu0 %v2715_v3  ;;  %3089 = vmatprep.subr.mxu1 %v5534_v0 }
 0x34c   : >>> { %3019 = vmatpush1.msra.mxu0 %v2721_v52  ;;  %3091 = vmatpush1.msra.mxu1 %v5526_v51  ;;  %v3277_v63 = vshrl.u32 (%p1064_p11), %v6087_v26, 7 }
 0x34d   : >>> { %3023 = vmatprep.subr.mxu0 %v2727_v47  ;;  %3093 = vmatprep.subr.mxu1 %v5508_v36  ;;  %v3174_v47 = vcombine.high (%p1064_p11), %v6090_v24, %v6090_v24 }
 0x34e   : >>> { %3027 = vmatpush1.msra.mxu0 %v2733_v20  ;;  %3060 = vmatprep.mubr.f32.mxu0 %v6085_v53  ;;  %v6091_v20 = vld [vmem:[#allocation80_spill] sm:$0xff] (%p1064_p11)  ;;  %v5725_v27 = vsub.s32 (%p1064_p11), 1, %v3277_v63  ;;  %v5727_v14 = vsub.s32 (%p1064_p11), 5, %v3277_v63 }
 0x34f   : >>> { %3095 = vmatpush1.msra.mxu1 %v5504_v55  ;;  %3062 = vmatmul.mubr.f32.vlgmr.msra.gmra.mxu0 %v5501_v15  ;;  %v3175_v22 = vcombine.high (%p1064_p11), %v6091_v20, %v6091_v20 }
 0x350   : >>> { %3097 = vmatprep.subr.mxu1 %v5506_v57  ;;  %3144 = vmatprep.mubr.f32.mxu1 %v6085_v53  ;;  %v6095_v53 = vld [vmem:[#allocation79_spill] sm:$0xff] (%p1064_p11) }
 0x351   : >>> { %3099 = vmatpush1.msra.mxu1 %v5510_v30  ;;  %v2551_v30 = vpop.permute.xlu0 %2550  ;;  %3604 = vset.pattern.permute.xlu0 (%p1064_p11), %v3694_v23 }
 0x352   : >>> { %3101 = vmatprep.subr.mxu1 %v5516_v16  ;;  %3165 = vperm.xlu0 (%p1064_p11), %3604, %v6086_v56  }
 0x353   : >>> { %3103 = vmatpush1.msra.mxu1 %v5521_v10 }
 0x354   : >>> { %3105 = vmatprep.subr.mxu1 %v5529_v44 }
 0x355   : >>> { %3107 = vmatpush1.msra.mxu1 %v5537_v59 }
 0x356   : >>> { %3109 = vmatprep.subr.mxu1 %v5547_v7 }
 0x357   : >>> { %3111 = vmatpush1.msra.mxu1 %v5558_v12 }
 0x358   : >>> { %3146 = vmatmul.mubr.f32.vlgmr.msra.gmra.mxu1 %v5501_v15 }
 0x3cd   : >> { %v3166_v33 = vpop.permute.xlu0 (%p1064_p11), %3165 }
 0x3f4   : >>> { %v2640_v55 = vpop.f32.mrf.mxu0 }
 0x3f5   : >>> { %v2641_v51 = vadd.f32 %v2640_v55, %v2551_v30 }
 0x3f6   : >>> { %v2642_v57 = vpop.f32.mrf.mxu0 }
 0x3f7   : >>> { %v2643_v10 = vadd.f32 %v2642_v57, %v2551_v30  ;;  %v3180_v57 = vmul.f32 (%p1064_p11), %v3166_v33, %v6088_v21  ;;  %v3184_v30 = vmul.f32 (%p1064_p11), %v3166_v33, %v6090_v24 }
 0x3fc   : >>> { %v2772_v36 = vpop.f32.mrf.mxu1 }
 0x3fd   : >>> { %v2773_v44 = vadd.f32 %v2772_v36, %v2641_v51  ;;  %v3181_v36 = vmul.f32 (%p1064_p11), %v3172_v6, %v3166_v33  ;;  %v3187_v51 = vmul.f32 (%p1064_p11), %v3175_v22, %v3166_v33 }
 0x3fe   : >>> { %v2774_v54 = vpop.f32.mrf.mxu1 }
 0x3ff   : >>> { %v2775_v0 = vadd.f32 %v2774_v54, %v2643_v10  ;;  %v3183_v54 = vmul.f32 (%p1064_p11), %v3173_v11, %v3166_v33 }
 0x401   : >>> { %v2869_v18 = vpop.f32.mrf.mxu0 }
 0x402   : >>> { %v2870_v29 = vadd.f32 %v2869_v18, %v2773_v44  ;;  %v3182_v18 = vmul.f32 (%p1064_p11), %v3166_v33, %v6089_v45 }
 0x403   : >>> { %v2871_v1 = vpop.f32.mrf.mxu0 }
 0x404   : >>> { %v2872_v62 = vadd.f32 %v2871_v1, %v2775_v0  ;;  %v3185_v1 = vmul.f32 (%p1064_p11), %v3174_v47, %v3166_v33 }
 0x40a   : >>> { %v2955_v16 = vpop.f32.mrf.mxu1 }
 0x40b   : >>> { %v2956_v7 = vadd.f32 %v2955_v16, %v2870_v29  ;;  %v3186_v16 = vmul.f32 (%p1064_p11), %v3166_v33, %v6091_v20 }
 0x40c   : >>> { %v2957_v59 = vpop.f32.mrf.mxu1 }
 0x40d   : >>> { %v2958_v15 = vadd.f32 %v2957_v59, %v2872_v62 }
 0x40f   : >>> { %v3063_v25 = vpop.f32.mrf.mxu0 }
 0x410   : >>> { %v3064_v43 = vadd.f32 %v3063_v25, %v2956_v7 }
 0x411   : >>> { %v3065_v35 = vpop.f32.mrf.mxu0 }
 0x412   : >>> { %v3066_v48 = vadd.f32 %v3065_v35, %v2958_v15 }
 0x418   : >>> { %v3147_v60 = vpop.f32.mrf.mxu1 }
 0x419   : >>> { %v3148_v37 = vadd.f32 %v3147_v60, %v3064_v43 }
 0x41a   : >>> { %v3149_v12 = vpop.f32.mrf.mxu1 }
 0x41b   : >>> { %v3150_v2 = vadd.f32 %v3149_v12, %v3066_v48  ;;  %1066 = sbr.rel (!%p1064_p11) target bundleno = 373 (0x175), region = 122 }
 0x41d   : >>> { %v3154_v32 = vcombine.low %v3148_v37, %v3150_v2 }
 0x41f   : >>> { %3158 = vst [vmem:[%s3157_s15] sm:$0x77] %v3154_v32 }
 0x426   : >> { %v3159_v5 = vld [vmem:[#allocation3] sm:$0x77]  ;;  %v3160_v49 = vld [vmem:[#allocation3 + $0x8] sm:$0x77]  ;;  %v3161_v39 = vld [vmem:[#allocation3 + $0x10] sm:$0x77] }
 0x427   : >> { %v3162_v41 = vld [vmem:[#allocation3 + $0x18] sm:$0x77]  ;;  %v3236_v13 = vmul.f32 0.5, %v3159_v5  ;;  %v3237_v8 = vmul.f32 0.5, %v3160_v49  ;;  %v3238_v9 = vmul.f32 0.5, %v3161_v39  ;;  %v3192_v19 = vcombine.high %v3159_v5, %v3159_v5 }
 0x428   : >> { %v3239_v50 = vmul.f32 0.5, %v3162_v41  ;;  %v3193_v42 = vcombine.high %v3160_v49, %v3160_v49  ;;  %v3194_v58 = vcombine.high %v3161_v39, %v3161_v39  ;;  %v3195_v46 = vcombine.high %v3162_v41, %v3162_v41 }
 0x429   : >> { %v3496_v38 = vrot.slane %v3236_v13, 9  ;;  %v3497_v34 = vrot.slane %v3237_v8, 9  ;;  %v3498_v3 = vrot.slane %v3238_v9, 9  ;;  %v3200_v10 = vadd.f32 %v3180_v57, %v3159_v5 }
 0x42a   : >> { %v3499_v52 = vrot.slane %v3239_v50, 9  ;;  %v3201_v25 = vadd.f32 %v3192_v19, %v3181_v36  ;;  %v3202_v44 = vadd.f32 %v3182_v18, %v3160_v49  ;;  %v3203_v0 = vadd.f32 %v3193_v42, %v3183_v54 }
 0x42b   : >> { %v3256_v4 = vadd.f32 %v3496_v38, %v6092_v28  ;;  %v3257_v31 = vadd.f32 %v3497_v34, %v6093_v40  ;;  %v3258_v61 = vadd.f32 %v3498_v3, %v6094_v17  ;;  %v3204_v59 = vadd.f32 %v3184_v30, %v3161_v39 }
 0x42c   : >> { %v3259_v55 = vadd.f32 %v3499_v52, %v6095_v53  ;;  %v3205_v29 = vadd.f32 %v3194_v58, %v3185_v1  ;;  %v3206_v62 = vadd.f32 %v3186_v16, %v3162_v41  ;;  %v3207_v35 = vadd.f32 %v3195_v46, %v3187_v51 }
 0x42d   : >> { %v3208_v7 = vmul.f32 0.5, %v3200_v10  ;;  %v3209_v15 = vmul.f32 0.5, %v3201_v25  ;;  %v3210_v60 = vmul.f32 0.5, %v3202_v44  ;;  %v3211_v43 = vmul.f32 0.5, %v3203_v0 }
 0x42e   : >> { %v3212_v48 = vmul.f32 0.5, %v3204_v59  ;;  %v3213_v12 = vmul.f32 0.5, %v3205_v29  ;;  %v3214_v37 = vmul.f32 0.5, %v3206_v62  ;;  %v3215_v2 = vmul.f32 0.5, %v3207_v35 }
 0x42f   : >> { %v3224_v32 = vcombine.low %v3208_v7, %v3209_v15  ;;  %v3225_v23 = vcombine.low %v3210_v60, %v3211_v43  ;;  %v3279_v56 = vrot.slane %v3256_v4, %v5725_v27  ;;  %v3283_v5 = vrot.slane %v3256_v4, %v5727_v14 }
 0x430   : >> { %v3226_v49 = vcombine.low %v3212_v48, %v3213_v12  ;;  %v3227_v39 = vcombine.low %v3214_v37, %v3215_v2  ;;  %v3287_v41 = vrot.slane %v3257_v31, %v5725_v27  ;;  %v3291_v13 = vrot.slane %v3257_v31, %v5727_v14 }
 0x431   : >> { %v3232_v8 = vadd.f32 %v3224_v32, %v6092_v28  ;;  %v3233_v9 = vadd.f32 %v3225_v23, %v6093_v40  ;;  %v3295_v50 = vrot.slane %v3258_v61, %v5725_v27  ;;  %v3303_v26 = vrot.slane %v3259_v55, %v5725_v27 }
 0x432   : >> { %v3234_v63 = vadd.f32 %v3226_v49, %v6094_v17  ;;  %v3235_v38 = vadd.f32 %v3227_v39, %v6095_v53  ;;  %v3299_v34 = vrot.slane %v3258_v61, %v5727_v14  ;;  %v3307_v3 = vrot.slane %v3259_v55, %v5727_v14 }
 0x433   : >> { %v3264_v52 = vcombine.high %v3232_v8, %v3232_v8  ;;  %v3265_v21 = vcombine.high %v3233_v9, %v3233_v9  ;;  %v3317_v11 = vsel %vm3316_vm2, %v3232_v8, %v3279_v56  ;;  %v3319_v24 = vsel %vm3316_vm2, %v3233_v9, %v3287_v41 }
 0x434   : >> { %v3266_v6 = vcombine.high %v3234_v63, %v3234_v63  ;;  %v3267_v45 = vcombine.high %v3235_v38, %v3235_v38  ;;  %v3321_v22 = vsel %vm3316_vm2, %v3234_v63, %v3295_v50  ;;  %v3323_v19 = vsel %vm3316_vm2, %v3235_v38, %v3303_v26 }
 0x435   : >> { %v3318_v47 = vsel %vm3316_vm2, %v3264_v52, %v3283_v5  ;;  %v3320_v20 = vsel %vm3316_vm2, %v3265_v21, %v3291_v13 }
 0x436   : >> { %v3322_v42 = vsel %vm3316_vm2, %v3266_v6, %v3299_v34  ;;  %v3324_v27 = vsel %vm3316_vm2, %v3267_v45, %v3307_v3  ;;  %v3333_v14 = vcombine.low %v3317_v11, %v3318_v47  ;;  %v3334_v58 = vcombine.low %v3319_v24, %v3320_v20 }
 0x437   : >> { %v3335_v46 = vcombine.low %v3321_v22, %v3322_v42  ;;  %v3336_v33 = vcombine.low %v3323_v19, %v3324_v27 }
 0x438   : >> { %3341 = vst [vmem:[#allocation2] sm:$0x77] %v3333_v14  ;;  %3342 = vst [vmem:[#allocation2 + $0x8] sm:$0x77] %v3334_v58 }
 0x439   : >> { %3348 = vst [vmem:[%s3347_s18] sm:$0x77] %v3333_v14  ;;  %3349 = vst [vmem:[%s3347_s18 + $0x8] sm:$0x77] %v3334_v58 }
 0x43a   : >> { %3343 = vst [vmem:[#allocation2 + $0x10] sm:$0x77] %v3335_v46  ;;  %3344 = vst [vmem:[#allocation2 + $0x18] sm:$0x77] %v3336_v33 }
 0x43b   : >> { %3350 = vst [vmem:[%s3347_s18 + $0x10] sm:$0x77] %v3335_v46  ;;  %3351 = vst [vmem:[%s3347_s18 + $0x18] sm:$0x77] %v3336_v33 }
 0x43d   : > { %407 = sbr.rel (!%p405_p12) target bundleno = 68 (0x44), region = 133 }
 0x442   : > { %3358 = sbr.rel (!%p3781_p5) target bundleno = 1102 (0x44e), region = 70  ;;  %s3502_s19 = sshll.u32 (%p3781_p5), %s3659_s27, 3  ;;  %v3377_v28 = vld [vmem:[%s3800_s10] sm:$0xff] (%p3781_p5)  ;;  %v3379_v4 = vld [vmem:[%s3800_s10 + $0x8] sm:$0xff] (%p3781_p5)  ;;  %v3381_v40 = vld [vmem:[%s3800_s10 + $0x10] sm:$0xff] (%p3781_p5) }
 0x443   : > { %s3509_s22 = smul.u32 (%p3781_p5), 48, %s3655_s26  ;;  %v3383_v31 = vld [vmem:[%s3800_s10 + $0x18] sm:$0xff] (%p3781_p5)  ;;  %v3385_v17 = vld [vmem:[%s3800_s10 + $0x20] sm:$0xff] (%p3781_p5)  ;;  %v3387_v61 = vld [vmem:[%s3800_s10 + $0x28] sm:$0xff] (%p3781_p5) }
 0x444   : > { %v3389_v53 = vld [vmem:[%s3800_s10 + $0x30] sm:$0xff] (%p3781_p5)  ;;  %v3391_v55 = vld [vmem:[%s3800_s10 + $0x38] sm:$0xff] (%p3781_p5)  ;;  %v3393_v57 = vld [vmem:[%s3800_s10 + $0x40] sm:$0xff] (%p3781_p5) }
 0x445   : > { %s3362_s12 = sadd.s32 (%p3781_p5), %s3509_s22, %s3502_s19  ;;  %v3395_v36 = vld [vmem:[%s3800_s10 + $0x48] sm:$0xff] (%p3781_p5)  ;;  %v3397_v18 = vld [vmem:[%s3800_s10 + $0x50] sm:$0xff] (%p3781_p5)  ;;  %v3399_v54 = vld [vmem:[%s3800_s10 + $0x58] sm:$0xff] (%p3781_p5) }
 0x446   : > { %s3504_s20 = sshll.u32 (%p3781_p5), %s3362_s12, 2 }
 0x447   : > { %s3364_s24 = scalar_lea.vmem %s5809_s7, %s3504_s20 }
 0x448   : > { %3378 = vst [vmem:[%s3364_s24] sm:$0xff] %v3377_v28  ;;  %3380 = vst [vmem:[%s3364_s24 + $0x8] sm:$0xff] %v3379_v4 }
 0x449   : > { %3382 = vst [vmem:[%s3364_s24 + $0x10] sm:$0xff] %v3381_v40  ;;  %3384 = vst [vmem:[%s3364_s24 + $0x18] sm:$0xff] %v3383_v31 }
 0x44a   : > { %3386 = vst [vmem:[%s3364_s24 + $0x40] sm:$0xff] %v3385_v17  ;;  %3388 = vst [vmem:[%s3364_s24 + $0x48] sm:$0xff] %v3387_v61 }
 0x44b   : > { %3390 = vst [vmem:[%s3364_s24 + $0x50] sm:$0xff] %v3389_v53  ;;  %3392 = vst [vmem:[%s3364_s24 + $0x58] sm:$0xff] %v3391_v55 }
 0x44c   : > { %3394 = vst [vmem:[%s3364_s24 + $0x80] sm:$0xff] %v3393_v57  ;;  %3396 = vst [vmem:[%s3364_s24 + $0x88] sm:$0xff] %v3395_v36 }
 0x44d   : > { %3398 = vst [vmem:[%s3364_s24 + $0x90] sm:$0xff] %v3397_v18  ;;  %3400 = vst [vmem:[%s3364_s24 + $0x98] sm:$0xff] %v3399_v54 }
 0x44e PF: > { %s17_s30 = sadd.s32 1, %s3671_s30   ;;  %s6096_s24 = smov %s3651_s25 }
 0x44f   : > { %p14_p13 = scmp.ge.s32.totalorder %s17_s30, 6   ;;  %s6097_s25 = smov %s3792_s16 }
 0x450   : > { %s6098_s26 = smov %s3663_s28  ;;  %s6099_s27 = smov %s3667_s29 }
 0x451   : > { %s6100_s28 = smov %s6103_s8  ;;  %s6101_s29 = smov %s6107_s9 }
 0x452   :  { %16 = sbr.rel (!%p14_p13) target bundleno = 4 (0x4), region = 144 }

</bundles_post_ra>
